<compile_context>
chip_gen: v7x
topology: tpu7x:2x2x1
jax: 0.10.0
libtpu: 0.0.40
codegen_flags: <defaults>
</compile_context>

<pallas_src>
import jax
import jax.numpy as jnp
import numpy as np
from jax import lax
from jax.experimental import pallas as pl
from jax.experimental.pallas import tpu as pltpu

NEG_SLOPE = 0.01  # nn.LeakyReLU() default


def _leaky(x):
    return jnp.where(x >= 0, x, NEG_SLOPE * x)


# ---------------------------------------------------------------------------
# Fused kernel: stem conv + LeakyReLU + maxpool + conv1 + LeakyReLU + linear
# ---------------------------------------------------------------------------
def fused_net_kernel(xg_ref, t1_ref, b1_ref, t2_ref, b2_ref, w3_ref, b3_ref,
                     out_ref, ppad_ref):
    # xg_ref : (TB, 6, 16, 32)  strided rows of the zero-padded image:
    #                           xg[b, s, yo, w] = xpad[b, 2*yo + s, w]
    # t1_ref : (5, 32, 1280)    stem width-Toeplitz weights, cols = (p, w1, co)
    # b1_ref : (1, 1280)        stem bias row (zero on the pad columns)
    # t2_ref : (5, 640, 64)     conv1 width-Toeplitz weights, rows=(w1,c), cols=(x,f)
    # b2_ref : (1, 64)          conv1 bias row (zero on x>=14 columns)
    # w3_ref : (14, 64, 10)     classifier weights permuted to the (y, x, f) layout
    # b3_ref : (1, 10)
    # out_ref: (TB, 1, 10)
    # ppad_ref: (TB, 24, 640)   VMEM scratch: zero 'same'-padded conv1 input
    tb = xg_ref.shape[0]
    b1row = b1_ref[...]

    # ---- stem: Conv2d(1->32, 5, 'same') + LeakyReLU + MaxPool2d(2) ----------
    # Stem output row y = 2*yo + q; both 2x2-pool parities reduce element-wise.
    pooled = None
    for q in range(2):                               # pool parity along y
        acc = jnp.zeros((tb * 16, 1280), jnp.float32)
        for ky in range(5):                          # conv taps along y
            s = q + ky
            xk = xg_ref[:, s:s + 1, :, :].reshape(tb * 16, 32)
            acc = acc + jnp.dot(xk, t1_ref[ky],
                                preferred_element_type=jnp.float32)
        a = _leaky(acc + b1row)                      # (tb*16, 1280)
        m = jnp.maximum(a[:, 0:640], a[:, 640:1280])  # pool parity along x
        pooled = m if pooled is None else jnp.maximum(pooled, m)
    pooled = pooled.reshape(tb, 16, 640)             # rows yo=14,15 are junk

    # ---- zero 'same'-padded conv1 input (rows 2..15 hold pooled yo=0..13) ---
    ppad_ref[...] = jnp.zeros((tb, 24, 640), jnp.float32)
    ppad_ref[:, 2:16, :] = pooled[:, 0:14, :]

    # ---- conv1: Conv2d(32->4, 5, 'same') + LeakyReLU ------------------------
    acc2 = jnp.zeros((tb * 16, 64), jnp.float32)
    for ky in range(5):
        lhs = ppad_ref[:, ky:ky + 16, :].reshape(tb * 16, 640)
        acc2 = acc2 + jnp.dot(lhs, t2_ref[ky],
                              preferred_element_type=jnp.float32)
    h = _leaky(acc2 + b2_ref[...]).reshape(tb, 16, 64)  # rows y=14,15 junk

    # ---- classifier: Flatten (order folded into w3) + Linear(784 -> 10) -----
    logits = jnp.zeros((tb, 10), jnp.float32)
    for y in range(14):
        logits = logits + jnp.dot(h[:, y, :], w3_ref[y],
                                  preferred_element_type=jnp.float32)
    out_ref[...] = (logits + b3_ref[...])[:, None, :]


# ---------------------------------------------------------------------------
# Host-side glue: weight re-layout (tiny) + strided-row input view
# ---------------------------------------------------------------------------
def _pick_batch_block(n):
    """Images per grid step; keep >= 2 grid steps when possible (v7x: 2 TCs)."""
    if n >= 16:
        return 8
    return max(1, n // 2) if n >= 2 else 1


def _prep_params(W1, b1, W2, b2, W3, b3):
    f32 = jnp.float32
    # stem Toeplitz: T1[ky, w0, p*640 + w1*32 + co] = W1[co, 0, ky, kx],
    #                kx = w0 - (2*(w1-2) + p); zero outside the valid range.
    wt1 = jnp.transpose(W1[:, 0], (1, 2, 0)).astype(f32)           # (ky, kx, co)
    w0 = np.arange(32).reshape(32, 1, 1)
    p = np.arange(2).reshape(1, 2, 1)
    w1 = np.arange(20).reshape(1, 1, 20)
    kx = w0 - (2 * (w1 - 2) + p)                                    # (32, 2, 20)
    valid1 = ((kx >= 0) & (kx <= 4) & (w1 >= 2) & (w1 <= 15)).astype(np.float32)
    t1 = (wt1[:, np.clip(kx, 0, 4), :] * valid1[None, :, :, :, None]
          ).reshape(5, 32, 1280)
    w1mask = ((np.arange(20) >= 2) & (np.arange(20) <= 15)).astype(np.float32)
    b1row = (jnp.broadcast_to(b1.astype(f32)[None, None, :], (2, 20, 32))
             * w1mask[None, :, None]).reshape(1, 1280)

    # conv1 Toeplitz: T2[ky, w1*32 + c, x*4 + f] = W2[f, c, ky, w1 - x]
    wt2 = jnp.transpose(W2, (2, 3, 1, 0)).astype(f32)               # (ky, kx, c, f)
    w1b = np.arange(20).reshape(20, 1)
    xb = np.arange(16).reshape(1, 16)
    kx2 = w1b - xb
    valid2 = ((kx2 >= 0) & (kx2 <= 4) & (xb <= 13)).astype(np.float32)
    t2 = wt2[:, np.clip(kx2, 0, 4), :, :] * valid2[None, :, :, None, None]
    t2 = jnp.transpose(t2, (0, 1, 3, 2, 4)).reshape(5, 640, 64)
    xmask = (np.arange(16) <= 13).astype(np.float32)
    b2row = (jnp.broadcast_to(b2.astype(f32)[None, :], (16, 4))
             * xmask[:, None]).reshape(1, 64)

    # classifier weights permuted to the kernel's (y, x, f) activation layout
    yi = np.arange(14).reshape(14, 1, 1)
    xi = np.arange(16).reshape(1, 16, 1)
    fi = np.arange(4).reshape(1, 1, 4)
    src = fi * 196 + yi * 14 + np.minimum(xi, 13)     # PyTorch (c, h, w) flatten
    mask3 = np.broadcast_to(xi <= 13, (14, 16, 4)).astype(np.float32)
    w3p = W3.T.astype(f32)[src.reshape(14, 64), :] * mask3.reshape(14, 64, 1)
    b3row = b3.astype(f32).reshape(1, 10)
    return t1, b1row, t2, b2row, w3p, b3row


def net_forward(x, params):
    """Pallas forward pass of Net for NCHW input x of shape (N, 1, 28, 28)."""
    W1, b1, W2, b2, W3, b3 = params
    n = x.shape[0]
    tb = _pick_batch_block(n)
    nblk = -(-n // tb)
    npad = nblk * tb

    img = x[:, 0].astype(jnp.float32)                              # (n, 28, 28)
    if npad != n:
        img = jnp.pad(img, ((0, npad - n), (0, 0), (0, 0)))
    # 'same' pad (+4 extra zero rows so every strided 16-row view stays in bounds)
    xpad = jnp.pad(img, ((0, 0), (2, 6), (2, 2)))                  # (npad, 36, 32)
    # xg[b, s, yo, w] = xpad[b, 2*yo + s, w] -- the only gather glue, ~12 KB/img
    xg = jnp.stack([xpad[:, s:s + 31:2, :] for s in range(6)], axis=1)

    t1, b1row, t2, b2row, w3p, b3row = _prep_params(W1, b1, W2, b2, W3, b3)

    out = pl.pallas_call(
        fused_net_kernel,
        out_shape=jax.ShapeDtypeStruct((npad, 1, 10), jnp.float32),
        grid=(nblk,),
        in_specs=[
            pl.BlockSpec((tb, 6, 16, 32), lambda i: (i, 0, 0, 0)),
            pl.BlockSpec((5, 32, 1280), lambda i: (0, 0, 0)),
            pl.BlockSpec((1, 1280), lambda i: (0, 0)),
            pl.BlockSpec((5, 640, 64), lambda i: (0, 0, 0)),
            pl.BlockSpec((1, 64), lambda i: (0, 0)),
            pl.BlockSpec((14, 64, 10), lambda i: (0, 0, 0)),
            pl.BlockSpec((1, 10), lambda i: (0, 0)),
        ],
        out_specs=pl.BlockSpec((tb, 1, 10), lambda i: (i, 0, 0)),
        scratch_shapes=[pltpu.VMEM((tb, 24, 640), jnp.float32)],
        compiler_params=pltpu.CompilerParams(
            dimension_semantics=("parallel",)),
    )(xg, t1, b1row, t2, b2row, w3p, b3row)
    return out.reshape(npad, 10)[:n]


# ---------------------------------------------------------------------------
# Pure-JAX reference (true f32 path) for verification
# ---------------------------------------------------------------------------
def ref_forward(x, params):
    W1, b1, W2, b2, W3, b3 = params
    dn = ('NCHW', 'OIHW', 'NCHW')
    prec = lax.Precision.HIGHEST
    y = lax.conv_general_dilated(x, W1, (1, 1), ((2, 2), (2, 2)),
                                 dimension_numbers=dn, precision=prec)
    y = _leaky(y + b1[None, :, None, None])
    y = lax.reduce_window(y, -jnp.inf, lax.max,
                          (1, 1, 2, 2), (1, 1, 2, 2), 'VALID')
    y = lax.conv_general_dilated(y, W2, (1, 1), ((2, 2), (2, 2)),
                                 dimension_numbers=dn, precision=prec)
    y = _leaky(y + b2[None, :, None, None])
    flat = y.reshape(y.shape[0], -1)
    return jnp.dot(flat, W3.T, precision=prec) + b3


if __name__ == "__main__":
    key = jax.random.PRNGKey(0)
    ks = jax.random.split(key, 7)
    N = 2
    x = jax.random.normal(ks[0], (N, 1, 28, 28), jnp.float32)

    # deterministic synthetic parameters (PyTorch module shapes)
    W1 = 0.10 * jax.random.normal(ks[1], (32, 1, 5, 5), jnp.float32)
    b1 = 0.10 * jax.random.normal(ks[2], (32,), jnp.float32)
    W2 = 0.05 * jax.random.normal(ks[3], (4, 32, 5, 5), jnp.float32)
    b2 = 0.10 * jax.random.normal(ks[4], (4,), jnp.float32)
    W3 = 0.05 * jax.random.normal(ks[5], (10, 4 * 14 * 14), jnp.float32)
    b3 = 0.10 * jax.random.normal(ks[6], (10,), jnp.float32)
    params = (W1, b1, W2, b2, W3, b3)

    logits = jax.block_until_ready(jax.jit(net_forward)(x, params))
    ref = jax.block_until_ready(jax.jit(ref_forward)(x, params))

    assert logits.shape == (N, 10)
    # Kernel matmuls run at the TPU default (bf16 MXU) precision per the perf
    # review; the f32 HIGHEST-precision reference therefore differs by a few e-3.
    max_err = float(jnp.max(jnp.abs(logits - ref)))
    assert max_err < 5e-2, f"mismatch vs reference: {max_err}"
    print("KERNEL_OK")
</pallas_src>

<mosaic_0001>
module attributes {stable_mosaic.version = 11 : i64} {
  func.func @fused_net_kernel(%arg0: i32, %arg1: memref<1x6x16x32xf32, #tpu.memory_space<vmem>>, %arg2: memref<5x32x1280xf32, #tpu.memory_space<vmem>>, %arg3: memref<1x1280xf32, #tpu.memory_space<vmem>>, %arg4: memref<5x640x64xf32, #tpu.memory_space<vmem>>, %arg5: memref<1x64xf32, #tpu.memory_space<vmem>>, %arg6: memref<14x64x10xf32, #tpu.memory_space<vmem>>, %arg7: memref<1x10xf32, #tpu.memory_space<vmem>>, %arg8: memref<1x1x10xf32, #tpu.memory_space<vmem>>, %arg9: memref<1x24x640xf32, #tpu.memory_space<vmem>>) attributes {dimension_semantics = [#tpu.dimension_semantics<parallel>], iteration_bounds = array<i64: 2>, scalar_prefetch = 0 : i64, scratch_operands = 1 : i64, tpu.core_type = #tpu.core_type<tc>, window_params = [{transform_indices = @transform_0, window_bounds = array<i64: 1, 6, 16, 32>}, {pipeline_mode = #tpu.pipeline_mode<synchronous>, transform_indices = @transform_1, window_bounds = array<i64: 5, 32, 1280>}, {pipeline_mode = #tpu.pipeline_mode<synchronous>, transform_indices = @transform_2, window_bounds = array<i64: 1, 1280>}, {pipeline_mode = #tpu.pipeline_mode<synchronous>, transform_indices = @transform_3, window_bounds = array<i64: 5, 640, 64>}, {pipeline_mode = #tpu.pipeline_mode<synchronous>, transform_indices = @transform_4, window_bounds = array<i64: 1, 64>}, {pipeline_mode = #tpu.pipeline_mode<synchronous>, transform_indices = @transform_5, window_bounds = array<i64: 14, 64, 10>}, {pipeline_mode = #tpu.pipeline_mode<synchronous>, transform_indices = @transform_6, window_bounds = array<i64: 1, 10>}, {transform_indices = @transform_7, window_bounds = array<i64: 1, 1, 10>}]} {
    %c0 = arith.constant 0 : index
    %c0_0 = arith.constant 0 : index
    %0 = vector.load %arg3[%c0, %c0_0] : memref<1x1280xf32, #tpu.memory_space<vmem>>, vector<1x1280xf32>
    %cst = arith.constant 0.000000e+00 : f32
    %1 = vector.broadcast %cst : f32 to vector<16x1280xf32>
    %c0_1 = arith.constant 0 : index
    %c0_2 = arith.constant 0 : index
    %c0_3 = arith.constant 0 : index
    %c0_4 = arith.constant 0 : index
    %2 = vector.load %arg1[%c0_1, %c0_2, %c0_3, %c0_4] : memref<1x6x16x32xf32, #tpu.memory_space<vmem>>, vector<1x1x16x32xf32>
    %3 = vector.shape_cast %2 : vector<1x1x16x32xf32> to vector<16x32xf32>
    %c0_5 = arith.constant 0 : index
    %c0_6 = arith.constant 0 : index
    %c0_7 = arith.constant 0 : index
    %4 = vector.load %arg2[%c0_5, %c0_6, %c0_7] : memref<5x32x1280xf32, #tpu.memory_space<vmem>>, vector<1x32x1280xf32>
    %5 = vector.shape_cast %4 : vector<1x32x1280xf32> to vector<32x1280xf32>
    %cst_8 = arith.constant dense<0.000000e+00> : vector<16x1280xf32>
    %6 = tpu.matmul %3, %5, %cst_8 {dimension_numbers = #tpu.dot_dimension_numbers<[1], [0], [0], [1], [0, 0, 1, 1], [], []>} : vector<16x32xf32>, vector<32x1280xf32>, vector<16x1280xf32> -> vector<16x1280xf32>
    %7 = arith.addf %1, %6 : vector<16x1280xf32>
    %c0_9 = arith.constant 0 : index
    %c1 = arith.constant 1 : index
    %c0_10 = arith.constant 0 : index
    %c0_11 = arith.constant 0 : index
    %8 = vector.load %arg1[%c0_9, %c1, %c0_10, %c0_11] : memref<1x6x16x32xf32, #tpu.memory_space<vmem>>, vector<1x1x16x32xf32>
    %9 = vector.shape_cast %8 : vector<1x1x16x32xf32> to vector<16x32xf32>
    %c1_12 = arith.constant 1 : index
    %c0_13 = arith.constant 0 : index
    %c0_14 = arith.constant 0 : index
    %10 = vector.load %arg2[%c1_12, %c0_13, %c0_14] : memref<5x32x1280xf32, #tpu.memory_space<vmem>>, vector<1x32x1280xf32>
    %11 = vector.shape_cast %10 : vector<1x32x1280xf32> to vector<32x1280xf32>
    %cst_15 = arith.constant dense<0.000000e+00> : vector<16x1280xf32>
    %12 = tpu.matmul %9, %11, %cst_15 {dimension_numbers = #tpu.dot_dimension_numbers<[1], [0], [0], [1], [0, 0, 1, 1], [], []>} : vector<16x32xf32>, vector<32x1280xf32>, vector<16x1280xf32> -> vector<16x1280xf32>
    %13 = arith.addf %7, %12 : vector<16x1280xf32>
    %c0_16 = arith.constant 0 : index
    %c2 = arith.constant 2 : index
    %c0_17 = arith.constant 0 : index
    %c0_18 = arith.constant 0 : index
    %14 = vector.load %arg1[%c0_16, %c2, %c0_17, %c0_18] : memref<1x6x16x32xf32, #tpu.memory_space<vmem>>, vector<1x1x16x32xf32>
    %15 = vector.shape_cast %14 : vector<1x1x16x32xf32> to vector<16x32xf32>
    %c2_19 = arith.constant 2 : index
    %c0_20 = arith.constant 0 : index
    %c0_21 = arith.constant 0 : index
    %16 = vector.load %arg2[%c2_19, %c0_20, %c0_21] : memref<5x32x1280xf32, #tpu.memory_space<vmem>>, vector<1x32x1280xf32>
    %17 = vector.shape_cast %16 : vector<1x32x1280xf32> to vector<32x1280xf32>
    %cst_22 = arith.constant dense<0.000000e+00> : vector<16x1280xf32>
    %18 = tpu.matmul %15, %17, %cst_22 {dimension_numbers = #tpu.dot_dimension_numbers<[1], [0], [0], [1], [0, 0, 1, 1], [], []>} : vector<16x32xf32>, vector<32x1280xf32>, vector<16x1280xf32> -> vector<16x1280xf32>
    %19 = arith.addf %13, %18 : vector<16x1280xf32>
    %c0_23 = arith.constant 0 : index
    %c3 = arith.constant 3 : index
    %c0_24 = arith.constant 0 : index
    %c0_25 = arith.constant 0 : index
    %20 = vector.load %arg1[%c0_23, %c3, %c0_24, %c0_25] : memref<1x6x16x32xf32, #tpu.memory_space<vmem>>, vector<1x1x16x32xf32>
    %21 = vector.shape_cast %20 : vector<1x1x16x32xf32> to vector<16x32xf32>
    %c3_26 = arith.constant 3 : index
    %c0_27 = arith.constant 0 : index
    %c0_28 = arith.constant 0 : index
    %22 = vector.load %arg2[%c3_26, %c0_27, %c0_28] : memref<5x32x1280xf32, #tpu.memory_space<vmem>>, vector<1x32x1280xf32>
    %23 = vector.shape_cast %22 : vector<1x32x1280xf32> to vector<32x1280xf32>
    %cst_29 = arith.constant dense<0.000000e+00> : vector<16x1280xf32>
    %24 = tpu.matmul %21, %23, %cst_29 {dimension_numbers = #tpu.dot_dimension_numbers<[1], [0], [0], [1], [0, 0, 1, 1], [], []>} : vector<16x32xf32>, vector<32x1280xf32>, vector<16x1280xf32> -> vector<16x1280xf32>
    %25 = arith.addf %19, %24 : vector<16x1280xf32>
    %c0_30 = arith.constant 0 : index
    %c4 = arith.constant 4 : index
    %c0_31 = arith.constant 0 : index
    %c0_32 = arith.constant 0 : index
    %26 = vector.load %arg1[%c0_30, %c4, %c0_31, %c0_32] : memref<1x6x16x32xf32, #tpu.memory_space<vmem>>, vector<1x1x16x32xf32>
    %27 = vector.shape_cast %26 : vector<1x1x16x32xf32> to vector<16x32xf32>
    %c4_33 = arith.constant 4 : index
    %c0_34 = arith.constant 0 : index
    %c0_35 = arith.constant 0 : index
    %28 = vector.load %arg2[%c4_33, %c0_34, %c0_35] : memref<5x32x1280xf32, #tpu.memory_space<vmem>>, vector<1x32x1280xf32>
    %29 = vector.shape_cast %28 : vector<1x32x1280xf32> to vector<32x1280xf32>
    %cst_36 = arith.constant dense<0.000000e+00> : vector<16x1280xf32>
    %30 = tpu.matmul %27, %29, %cst_36 {dimension_numbers = #tpu.dot_dimension_numbers<[1], [0], [0], [1], [0, 0, 1, 1], [], []>} : vector<16x32xf32>, vector<32x1280xf32>, vector<16x1280xf32> -> vector<16x1280xf32>
    %31 = arith.addf %25, %30 : vector<16x1280xf32>
    %32 = vector.broadcast %0 : vector<1x1280xf32> to vector<16x1280xf32>
    %33 = arith.addf %31, %32 : vector<16x1280xf32>
    %cst_37 = arith.constant 0.000000e+00 : f32
    %34 = vector.broadcast %cst_37 : f32 to vector<16x1280xf32>
    %35 = arith.cmpf oge, %33, %34 : vector<16x1280xf32>
    %cst_38 = arith.constant 0.00999999977 : f32
    %36 = vector.broadcast %cst_38 : f32 to vector<16x1280xf32>
    %37 = arith.mulf %36, %33 : vector<16x1280xf32>
    %38 = arith.select %35, %33, %37 : vector<16x1280xi1>, vector<16x1280xf32>
    %39 = vector.extract_strided_slice %38 {offsets = [0, 0], sizes = [16, 640], strides = [1, 1]} : vector<16x1280xf32> to vector<16x640xf32>
    %40 = vector.extract_strided_slice %38 {offsets = [0, 640], sizes = [16, 640], strides = [1, 1]} : vector<16x1280xf32> to vector<16x640xf32>
    %41 = arith.maximumf %39, %40 : vector<16x640xf32>
    %cst_39 = arith.constant 0.000000e+00 : f32
    %42 = vector.broadcast %cst_39 : f32 to vector<16x1280xf32>
    %c0_40 = arith.constant 0 : index
    %c1_41 = arith.constant 1 : index
    %c0_42 = arith.constant 0 : index
    %c0_43 = arith.constant 0 : index
    %43 = vector.load %arg1[%c0_40, %c1_41, %c0_42, %c0_43] : memref<1x6x16x32xf32, #tpu.memory_space<vmem>>, vector<1x1x16x32xf32>
    %44 = vector.shape_cast %43 : vector<1x1x16x32xf32> to vector<16x32xf32>
    %c0_44 = arith.constant 0 : index
    %c0_45 = arith.constant 0 : index
    %c0_46 = arith.constant 0 : index
    %45 = vector.load %arg2[%c0_44, %c0_45, %c0_46] : memref<5x32x1280xf32, #tpu.memory_space<vmem>>, vector<1x32x1280xf32>
    %46 = vector.shape_cast %45 : vector<1x32x1280xf32> to vector<32x1280xf32>
    %cst_47 = arith.constant dense<0.000000e+00> : vector<16x1280xf32>
    %47 = tpu.matmul %44, %46, %cst_47 {dimension_numbers = #tpu.dot_dimension_numbers<[1], [0], [0], [1], [0, 0, 1, 1], [], []>} : vector<16x32xf32>, vector<32x1280xf32>, vector<16x1280xf32> -> vector<16x1280xf32>
    %48 = arith.addf %42, %47 : vector<16x1280xf32>
    %c0_48 = arith.constant 0 : index
    %c2_49 = arith.constant 2 : index
    %c0_50 = arith.constant 0 : index
    %c0_51 = arith.constant 0 : index
    %49 = vector.load %arg1[%c0_48, %c2_49, %c0_50, %c0_51] : memref<1x6x16x32xf32, #tpu.memory_space<vmem>>, vector<1x1x16x32xf32>
    %50 = vector.shape_cast %49 : vector<1x1x16x32xf32> to vector<16x32xf32>
    %c1_52 = arith.constant 1 : index
    %c0_53 = arith.constant 0 : index
    %c0_54 = arith.constant 0 : index
    %51 = vector.load %arg2[%c1_52, %c0_53, %c0_54] : memref<5x32x1280xf32, #tpu.memory_space<vmem>>, vector<1x32x1280xf32>
    %52 = vector.shape_cast %51 : vector<1x32x1280xf32> to vector<32x1280xf32>
    %cst_55 = arith.constant dense<0.000000e+00> : vector<16x1280xf32>
    %53 = tpu.matmul %50, %52, %cst_55 {dimension_numbers = #tpu.dot_dimension_numbers<[1], [0], [0], [1], [0, 0, 1, 1], [], []>} : vector<16x32xf32>, vector<32x1280xf32>, vector<16x1280xf32> -> vector<16x1280xf32>
    %54 = arith.addf %48, %53 : vector<16x1280xf32>
    %c0_56 = arith.constant 0 : index
    %c3_57 = arith.constant 3 : index
    %c0_58 = arith.constant 0 : index
    %c0_59 = arith.constant 0 : index
    %55 = vector.load %arg1[%c0_56, %c3_57, %c0_58, %c0_59] : memref<1x6x16x32xf32, #tpu.memory_space<vmem>>, vector<1x1x16x32xf32>
    %56 = vector.shape_cast %55 : vector<1x1x16x32xf32> to vector<16x32xf32>
    %c2_60 = arith.constant 2 : index
    %c0_61 = arith.constant 0 : index
    %c0_62 = arith.constant 0 : index
    %57 = vector.load %arg2[%c2_60, %c0_61, %c0_62] : memref<5x32x1280xf32, #tpu.memory_space<vmem>>, vector<1x32x1280xf32>
    %58 = vector.shape_cast %57 : vector<1x32x1280xf32> to vector<32x1280xf32>
    %cst_63 = arith.constant dense<0.000000e+00> : vector<16x1280xf32>
    %59 = tpu.matmul %56, %58, %cst_63 {dimension_numbers = #tpu.dot_dimension_numbers<[1], [0], [0], [1], [0, 0, 1, 1], [], []>} : vector<16x32xf32>, vector<32x1280xf32>, vector<16x1280xf32> -> vector<16x1280xf32>
    %60 = arith.addf %54, %59 : vector<16x1280xf32>
    %c0_64 = arith.constant 0 : index
    %c4_65 = arith.constant 4 : index
    %c0_66 = arith.constant 0 : index
    %c0_67 = arith.constant 0 : index
    %61 = vector.load %arg1[%c0_64, %c4_65, %c0_66, %c0_67] : memref<1x6x16x32xf32, #tpu.memory_space<vmem>>, vector<1x1x16x32xf32>
    %62 = vector.shape_cast %61 : vector<1x1x16x32xf32> to vector<16x32xf32>
    %c3_68 = arith.constant 3 : index
    %c0_69 = arith.constant 0 : index
    %c0_70 = arith.constant 0 : index
    %63 = vector.load %arg2[%c3_68, %c0_69, %c0_70] : memref<5x32x1280xf32, #tpu.memory_space<vmem>>, vector<1x32x1280xf32>
    %64 = vector.shape_cast %63 : vector<1x32x1280xf32> to vector<32x1280xf32>
    %cst_71 = arith.constant dense<0.000000e+00> : vector<16x1280xf32>
    %65 = tpu.matmul %62, %64, %cst_71 {dimension_numbers = #tpu.dot_dimension_numbers<[1], [0], [0], [1], [0, 0, 1, 1], [], []>} : vector<16x32xf32>, vector<32x1280xf32>, vector<16x1280xf32> -> vector<16x1280xf32>
    %66 = arith.addf %60, %65 : vector<16x1280xf32>
    %c0_72 = arith.constant 0 : index
    %c5 = arith.constant 5 : index
    %c0_73 = arith.constant 0 : index
    %c0_74 = arith.constant 0 : index
    %67 = vector.load %arg1[%c0_72, %c5, %c0_73, %c0_74] : memref<1x6x16x32xf32, #tpu.memory_space<vmem>>, vector<1x1x16x32xf32>
    %68 = vector.shape_cast %67 : vector<1x1x16x32xf32> to vector<16x32xf32>
    %c4_75 = arith.constant 4 : index
    %c0_76 = arith.constant 0 : index
    %c0_77 = arith.constant 0 : index
    %69 = vector.load %arg2[%c4_75, %c0_76, %c0_77] : memref<5x32x1280xf32, #tpu.memory_space<vmem>>, vector<1x32x1280xf32>
    %70 = vector.shape_cast %69 : vector<1x32x1280xf32> to vector<32x1280xf32>
    %cst_78 = arith.constant dense<0.000000e+00> : vector<16x1280xf32>
    %71 = tpu.matmul %68, %70, %cst_78 {dimension_numbers = #tpu.dot_dimension_numbers<[1], [0], [0], [1], [0, 0, 1, 1], [], []>} : vector<16x32xf32>, vector<32x1280xf32>, vector<16x1280xf32> -> vector<16x1280xf32>
    %72 = arith.addf %66, %71 : vector<16x1280xf32>
    %73 = vector.broadcast %0 : vector<1x1280xf32> to vector<16x1280xf32>
    %74 = arith.addf %72, %73 : vector<16x1280xf32>
    %cst_79 = arith.constant 0.000000e+00 : f32
    %75 = vector.broadcast %cst_79 : f32 to vector<16x1280xf32>
    %76 = arith.cmpf oge, %74, %75 : vector<16x1280xf32>
    %cst_80 = arith.constant 0.00999999977 : f32
    %77 = vector.broadcast %cst_80 : f32 to vector<16x1280xf32>
    %78 = arith.mulf %77, %74 : vector<16x1280xf32>
    %79 = arith.select %76, %74, %78 : vector<16x1280xi1>, vector<16x1280xf32>
    %80 = vector.extract_strided_slice %79 {offsets = [0, 0], sizes = [16, 640], strides = [1, 1]} : vector<16x1280xf32> to vector<16x640xf32>
    %81 = vector.extract_strided_slice %79 {offsets = [0, 640], sizes = [16, 640], strides = [1, 1]} : vector<16x1280xf32> to vector<16x640xf32>
    %82 = arith.maximumf %80, %81 : vector<16x640xf32>
    %83 = arith.maximumf %41, %82 : vector<16x640xf32>
    %84 = vector.shape_cast %83 : vector<16x640xf32> to vector<1x16x640xf32>
    %cst_81 = arith.constant 0.000000e+00 : f32
    %85 = vector.broadcast %cst_81 : f32 to vector<1x24x640xf32>
    %c0_82 = arith.constant 0 : index
    %c0_83 = arith.constant 0 : index
    %c0_84 = arith.constant 0 : index
    %86 = vector.load %arg9[%c0_82, %c0_83, %c0_84] : memref<1x24x640xf32, #tpu.memory_space<vmem>>, vector<1x24x640xf32>
    tpu.vector_store %arg9[%c0_82, %c0_83, %c0_84], %85 {strides = array<i32>} : memref<1x24x640xf32, #tpu.memory_space<vmem>>, vector<1x24x640xf32>,
    %87 = vector.extract_strided_slice %84 {offsets = [0, 0, 0], sizes = [1, 14, 640], strides = [1, 1, 1]} : vector<1x16x640xf32> to vector<1x14x640xf32>
    %c0_85 = arith.constant 0 : index
    %c2_86 = arith.constant 2 : index
    %c0_87 = arith.constant 0 : index
    %88 = vector.load %arg9[%c0_85, %c2_86, %c0_87] : memref<1x24x640xf32, #tpu.memory_space<vmem>>, vector<1x14x640xf32>
    tpu.vector_store %arg9[%c0_85, %c2_86, %c0_87], %87 {strides = array<i32>} : memref<1x24x640xf32, #tpu.memory_space<vmem>>, vector<1x14x640xf32>,
    %cst_88 = arith.constant 0.000000e+00 : f32
    %89 = vector.broadcast %cst_88 : f32 to vector<16x64xf32>
    %c0_89 = arith.constant 0 : index
    %c0_90 = arith.constant 0 : index
    %c0_91 = arith.constant 0 : index
    %90 = vector.load %arg9[%c0_89, %c0_90, %c0_91] : memref<1x24x640xf32, #tpu.memory_space<vmem>>, vector<1x16x640xf32>
    %91 = vector.shape_cast %90 : vector<1x16x640xf32> to vector<16x640xf32>
    %c0_92 = arith.constant 0 : index
    %c0_93 = arith.constant 0 : index
    %c0_94 = arith.constant 0 : index
    %92 = vector.load %arg4[%c0_92, %c0_93, %c0_94] : memref<5x640x64xf32, #tpu.memory_space<vmem>>, vector<1x640x64xf32>
    %93 = vector.shape_cast %92 : vector<1x640x64xf32> to vector<640x64xf32>
    %cst_95 = arith.constant dense<0.000000e+00> : vector<16x64xf32>
    %94 = tpu.matmul %91, %93, %cst_95 {dimension_numbers = #tpu.dot_dimension_numbers<[1], [0], [0], [1], [0, 0, 1, 1], [], []>} : vector<16x640xf32>, vector<640x64xf32>, vector<16x64xf32> -> vector<16x64xf32>
    %95 = arith.addf %89, %94 : vector<16x64xf32>
    %c0_96 = arith.constant 0 : index
    %c1_97 = arith.constant 1 : index
    %c0_98 = arith.constant 0 : index
    %96 = vector.load %arg9[%c0_96, %c1_97, %c0_98] : memref<1x24x640xf32, #tpu.memory_space<vmem>>, vector<1x16x640xf32>
    %97 = vector.shape_cast %96 : vector<1x16x640xf32> to vector<16x640xf32>
    %c1_99 = arith.constant 1 : index
    %c0_100 = arith.constant 0 : index
    %c0_101 = arith.constant 0 : index
    %98 = vector.load %arg4[%c1_99, %c0_100, %c0_101] : memref<5x640x64xf32, #tpu.memory_space<vmem>>, vector<1x640x64xf32>
    %99 = vector.shape_cast %98 : vector<1x640x64xf32> to vector<640x64xf32>
    %cst_102 = arith.constant dense<0.000000e+00> : vector<16x64xf32>
    %100 = tpu.matmul %97, %99, %cst_102 {dimension_numbers = #tpu.dot_dimension_numbers<[1], [0], [0], [1], [0, 0, 1, 1], [], []>} : vector<16x640xf32>, vector<640x64xf32>, vector<16x64xf32> -> vector<16x64xf32>
    %101 = arith.addf %95, %100 : vector<16x64xf32>
    %c0_103 = arith.constant 0 : index
    %c2_104 = arith.constant 2 : index
    %c0_105 = arith.constant 0 : index
    %102 = vector.load %arg9[%c0_103, %c2_104, %c0_105] : memref<1x24x640xf32, #tpu.memory_space<vmem>>, vector<1x16x640xf32>
    %103 = vector.shape_cast %102 : vector<1x16x640xf32> to vector<16x640xf32>
    %c2_106 = arith.constant 2 : index
    %c0_107 = arith.constant 0 : index
    %c0_108 = arith.constant 0 : index
    %104 = vector.load %arg4[%c2_106, %c0_107, %c0_108] : memref<5x640x64xf32, #tpu.memory_space<vmem>>, vector<1x640x64xf32>
    %105 = vector.shape_cast %104 : vector<1x640x64xf32> to vector<640x64xf32>
    %cst_109 = arith.constant dense<0.000000e+00> : vector<16x64xf32>
    %106 = tpu.matmul %103, %105, %cst_109 {dimension_numbers = #tpu.dot_dimension_numbers<[1], [0], [0], [1], [0, 0, 1, 1], [], []>} : vector<16x640xf32>, vector<640x64xf32>, vector<16x64xf32> -> vector<16x64xf32>
    %107 = arith.addf %101, %106 : vector<16x64xf32>
    %c0_110 = arith.constant 0 : index
    %c3_111 = arith.constant 3 : index
    %c0_112 = arith.constant 0 : index
    %108 = vector.load %arg9[%c0_110, %c3_111, %c0_112] : memref<1x24x640xf32, #tpu.memory_space<vmem>>, vector<1x16x640xf32>
    %109 = vector.shape_cast %108 : vector<1x16x640xf32> to vector<16x640xf32>
    %c3_113 = arith.constant 3 : index
    %c0_114 = arith.constant 0 : index
    %c0_115 = arith.constant 0 : index
    %110 = vector.load %arg4[%c3_113, %c0_114, %c0_115] : memref<5x640x64xf32, #tpu.memory_space<vmem>>, vector<1x640x64xf32>
    %111 = vector.shape_cast %110 : vector<1x640x64xf32> to vector<640x64xf32>
    %cst_116 = arith.constant dense<0.000000e+00> : vector<16x64xf32>
    %112 = tpu.matmul %109, %111, %cst_116 {dimension_numbers = #tpu.dot_dimension_numbers<[1], [0], [0], [1], [0, 0, 1, 1], [], []>} : vector<16x640xf32>, vector<640x64xf32>, vector<16x64xf32> -> vector<16x64xf32>
    %113 = arith.addf %107, %112 : vector<16x64xf32>
    %c0_117 = arith.constant 0 : index
    %c4_118 = arith.constant 4 : index
    %c0_119 = arith.constant 0 : index
    %114 = vector.load %arg9[%c0_117, %c4_118, %c0_119] : memref<1x24x640xf32, #tpu.memory_space<vmem>>, vector<1x16x640xf32>
    %115 = vector.shape_cast %114 : vector<1x16x640xf32> to vector<16x640xf32>
    %c4_120 = arith.constant 4 : index
    %c0_121 = arith.constant 0 : index
    %c0_122 = arith.constant 0 : index
    %116 = vector.load %arg4[%c4_120, %c0_121, %c0_122] : memref<5x640x64xf32, #tpu.memory_space<vmem>>, vector<1x640x64xf32>
    %117 = vector.shape_cast %116 : vector<1x640x64xf32> to vector<640x64xf32>
    %cst_123 = arith.constant dense<0.000000e+00> : vector<16x64xf32>
    %118 = tpu.matmul %115, %117, %cst_123 {dimension_numbers = #tpu.dot_dimension_numbers<[1], [0], [0], [1], [0, 0, 1, 1], [], []>} : vector<16x640xf32>, vector<640x64xf32>, vector<16x64xf32> -> vector<16x64xf32>
    %119 = arith.addf %113, %118 : vector<16x64xf32>
    %c0_124 = arith.constant 0 : index
    %c0_125 = arith.constant 0 : index
    %120 = vector.load %arg5[%c0_124, %c0_125] : memref<1x64xf32, #tpu.memory_space<vmem>>, vector<1x64xf32>
    %121 = vector.broadcast %120 : vector<1x64xf32> to vector<16x64xf32>
    %122 = arith.addf %119, %121 : vector<16x64xf32>
    %cst_126 = arith.constant 0.000000e+00 : f32
    %123 = vector.broadcast %cst_126 : f32 to vector<16x64xf32>
    %124 = arith.cmpf oge, %122, %123 : vector<16x64xf32>
    %cst_127 = arith.constant 0.00999999977 : f32
    %125 = vector.broadcast %cst_127 : f32 to vector<16x64xf32>
    %126 = arith.mulf %125, %122 : vector<16x64xf32>
    %127 = arith.select %124, %122, %126 : vector<16x64xi1>, vector<16x64xf32>
    %128 = vector.shape_cast %127 : vector<16x64xf32> to vector<1x16x64xf32>
    %cst_128 = arith.constant 0.000000e+00 : f32
    %129 = vector.broadcast %cst_128 : f32 to vector<1x10xf32>
    %130 = vector.extract_strided_slice %128 {offsets = [0, 0, 0], sizes = [1, 1, 64], strides = [1, 1, 1]} : vector<1x16x64xf32> to vector<1x1x64xf32>
    %131 = vector.shape_cast %130 : vector<1x1x64xf32> to vector<1x64xf32>
    %c0_129 = arith.constant 0 : index
    %c0_130 = arith.constant 0 : index
    %c0_131 = arith.constant 0 : index
    %132 = vector.load %arg6[%c0_129, %c0_130, %c0_131] : memref<14x64x10xf32, #tpu.memory_space<vmem>>, vector<1x64x10xf32>
    %133 = vector.shape_cast %132 : vector<1x64x10xf32> to vector<64x10xf32>
    %cst_132 = arith.constant dense<0.000000e+00> : vector<1x10xf32>
    %134 = tpu.matmul %131, %133, %cst_132 {dimension_numbers = #tpu.dot_dimension_numbers<[1], [0], [0], [1], [0, 0, 1, 1], [], []>} : vector<1x64xf32>, vector<64x10xf32>, vector<1x10xf32> -> vector<1x10xf32>
    %135 = arith.addf %129, %134 : vector<1x10xf32>
    %136 = vector.extract_strided_slice %128 {offsets = [0, 1, 0], sizes = [1, 1, 64], strides = [1, 1, 1]} : vector<1x16x64xf32> to vector<1x1x64xf32>
    %137 = vector.shape_cast %136 : vector<1x1x64xf32> to vector<1x64xf32>
    %c1_133 = arith.constant 1 : index
    %c0_134 = arith.constant 0 : index
    %c0_135 = arith.constant 0 : index
    %138 = vector.load %arg6[%c1_133, %c0_134, %c0_135] : memref<14x64x10xf32, #tpu.memory_space<vmem>>, vector<1x64x10xf32>
    %139 = vector.shape_cast %138 : vector<1x64x10xf32> to vector<64x10xf32>
    %cst_136 = arith.constant dense<0.000000e+00> : vector<1x10xf32>
    %140 = tpu.matmul %137, %139, %cst_136 {dimension_numbers = #tpu.dot_dimension_numbers<[1], [0], [0], [1], [0, 0, 1, 1], [], []>} : vector<1x64xf32>, vector<64x10xf32>, vector<1x10xf32> -> vector<1x10xf32>
    %141 = arith.addf %135, %140 : vector<1x10xf32>
    %142 = vector.extract_strided_slice %128 {offsets = [0, 2, 0], sizes = [1, 1, 64], strides = [1, 1, 1]} : vector<1x16x64xf32> to vector<1x1x64xf32>
    %143 = vector.shape_cast %142 : vector<1x1x64xf32> to vector<1x64xf32>
    %c2_137 = arith.constant 2 : index
    %c0_138 = arith.constant 0 : index
    %c0_139 = arith.constant 0 : index
    %144 = vector.load %arg6[%c2_137, %c0_138, %c0_139] : memref<14x64x10xf32, #tpu.memory_space<vmem>>, vector<1x64x10xf32>
    %145 = vector.shape_cast %144 : vector<1x64x10xf32> to vector<64x10xf32>
    %cst_140 = arith.constant dense<0.000000e+00> : vector<1x10xf32>
    %146 = tpu.matmul %143, %145, %cst_140 {dimension_numbers = #tpu.dot_dimension_numbers<[1], [0], [0], [1], [0, 0, 1, 1], [], []>} : vector<1x64xf32>, vector<64x10xf32>, vector<1x10xf32> -> vector<1x10xf32>
    %147 = arith.addf %141, %146 : vector<1x10xf32>
    %148 = vector.extract_strided_slice %128 {offsets = [0, 3, 0], sizes = [1, 1, 64], strides = [1, 1, 1]} : vector<1x16x64xf32> to vector<1x1x64xf32>
    %149 = vector.shape_cast %148 : vector<1x1x64xf32> to vector<1x64xf32>
    %c3_141 = arith.constant 3 : index
    %c0_142 = arith.constant 0 : index
    %c0_143 = arith.constant 0 : index
    %150 = vector.load %arg6[%c3_141, %c0_142, %c0_143] : memref<14x64x10xf32, #tpu.memory_space<vmem>>, vector<1x64x10xf32>
    %151 = vector.shape_cast %150 : vector<1x64x10xf32> to vector<64x10xf32>
    %cst_144 = arith.constant dense<0.000000e+00> : vector<1x10xf32>
    %152 = tpu.matmul %149, %151, %cst_144 {dimension_numbers = #tpu.dot_dimension_numbers<[1], [0], [0], [1], [0, 0, 1, 1], [], []>} : vector<1x64xf32>, vector<64x10xf32>, vector<1x10xf32> -> vector<1x10xf32>
    %153 = arith.addf %147, %152 : vector<1x10xf32>
    %154 = vector.extract_strided_slice %128 {offsets = [0, 4, 0], sizes = [1, 1, 64], strides = [1, 1, 1]} : vector<1x16x64xf32> to vector<1x1x64xf32>
    %155 = vector.shape_cast %154 : vector<1x1x64xf32> to vector<1x64xf32>
    %c4_145 = arith.constant 4 : index
    %c0_146 = arith.constant 0 : index
    %c0_147 = arith.constant 0 : index
    %156 = vector.load %arg6[%c4_145, %c0_146, %c0_147] : memref<14x64x10xf32, #tpu.memory_space<vmem>>, vector<1x64x10xf32>
    %157 = vector.shape_cast %156 : vector<1x64x10xf32> to vector<64x10xf32>
    %cst_148 = arith.constant dense<0.000000e+00> : vector<1x10xf32>
    %158 = tpu.matmul %155, %157, %cst_148 {dimension_numbers = #tpu.dot_dimension_numbers<[1], [0], [0], [1], [0, 0, 1, 1], [], []>} : vector<1x64xf32>, vector<64x10xf32>, vector<1x10xf32> -> vector<1x10xf32>
    %159 = arith.addf %153, %158 : vector<1x10xf32>
    %160 = vector.extract_strided_slice %128 {offsets = [0, 5, 0], sizes = [1, 1, 64], strides = [1, 1, 1]} : vector<1x16x64xf32> to vector<1x1x64xf32>
    %161 = vector.shape_cast %160 : vector<1x1x64xf32> to vector<1x64xf32>
    %c5_149 = arith.constant 5 : index
    %c0_150 = arith.constant 0 : index
    %c0_151 = arith.constant 0 : index
    %162 = vector.load %arg6[%c5_149, %c0_150, %c0_151] : memref<14x64x10xf32, #tpu.memory_space<vmem>>, vector<1x64x10xf32>
    %163 = vector.shape_cast %162 : vector<1x64x10xf32> to vector<64x10xf32>
    %cst_152 = arith.constant dense<0.000000e+00> : vector<1x10xf32>
    %164 = tpu.matmul %161, %163, %cst_152 {dimension_numbers = #tpu.dot_dimension_numbers<[1], [0], [0], [1], [0, 0, 1, 1], [], []>} : vector<1x64xf32>, vector<64x10xf32>, vector<1x10xf32> -> vector<1x10xf32>
    %165 = arith.addf %159, %164 : vector<1x10xf32>
    %166 = vector.extract_strided_slice %128 {offsets = [0, 6, 0], sizes = [1, 1, 64], strides = [1, 1, 1]} : vector<1x16x64xf32> to vector<1x1x64xf32>
    %167 = vector.shape_cast %166 : vector<1x1x64xf32> to vector<1x64xf32>
    %c6 = arith.constant 6 : index
    %c0_153 = arith.constant 0 : index
    %c0_154 = arith.constant 0 : index
    %168 = vector.load %arg6[%c6, %c0_153, %c0_154] : memref<14x64x10xf32, #tpu.memory_space<vmem>>, vector<1x64x10xf32>
    %169 = vector.shape_cast %168 : vector<1x64x10xf32> to vector<64x10xf32>
    %cst_155 = arith.constant dense<0.000000e+00> : vector<1x10xf32>
    %170 = tpu.matmul %167, %169, %cst_155 {dimension_numbers = #tpu.dot_dimension_numbers<[1], [0], [0], [1], [0, 0, 1, 1], [], []>} : vector<1x64xf32>, vector<64x10xf32>, vector<1x10xf32> -> vector<1x10xf32>
    %171 = arith.addf %165, %170 : vector<1x10xf32>
    %172 = vector.extract_strided_slice %128 {offsets = [0, 7, 0], sizes = [1, 1, 64], strides = [1, 1, 1]} : vector<1x16x64xf32> to vector<1x1x64xf32>
    %173 = vector.shape_cast %172 : vector<1x1x64xf32> to vector<1x64xf32>
    %c7 = arith.constant 7 : index
    %c0_156 = arith.constant 0 : index
    %c0_157 = arith.constant 0 : index
    %174 = vector.load %arg6[%c7, %c0_156, %c0_157] : memref<14x64x10xf32, #tpu.memory_space<vmem>>, vector<1x64x10xf32>
    %175 = vector.shape_cast %174 : vector<1x64x10xf32> to vector<64x10xf32>
    %cst_158 = arith.constant dense<0.000000e+00> : vector<1x10xf32>
    %176 = tpu.matmul %173, %175, %cst_158 {dimension_numbers = #tpu.dot_dimension_numbers<[1], [0], [0], [1], [0, 0, 1, 1], [], []>} : vector<1x64xf32>, vector<64x10xf32>, vector<1x10xf32> -> vector<1x10xf32>
    %177 = arith.addf %171, %176 : vector<1x10xf32>
    %178 = vector.extract_strided_slice %128 {offsets = [0, 8, 0], sizes = [1, 1, 64], strides = [1, 1, 1]} : vector<1x16x64xf32> to vector<1x1x64xf32>
    %179 = vector.shape_cast %178 : vector<1x1x64xf32> to vector<1x64xf32>
    %c8 = arith.constant 8 : index
    %c0_159 = arith.constant 0 : index
    %c0_160 = arith.constant 0 : index
    %180 = vector.load %arg6[%c8, %c0_159, %c0_160] : memref<14x64x10xf32, #tpu.memory_space<vmem>>, vector<1x64x10xf32>
    %181 = vector.shape_cast %180 : vector<1x64x10xf32> to vector<64x10xf32>
    %cst_161 = arith.constant dense<0.000000e+00> : vector<1x10xf32>
    %182 = tpu.matmul %179, %181, %cst_161 {dimension_numbers = #tpu.dot_dimension_numbers<[1], [0], [0], [1], [0, 0, 1, 1], [], []>} : vector<1x64xf32>, vector<64x10xf32>, vector<1x10xf32> -> vector<1x10xf32>
    %183 = arith.addf %177, %182 : vector<1x10xf32>
    %184 = vector.extract_strided_slice %128 {offsets = [0, 9, 0], sizes = [1, 1, 64], strides = [1, 1, 1]} : vector<1x16x64xf32> to vector<1x1x64xf32>
    %185 = vector.shape_cast %184 : vector<1x1x64xf32> to vector<1x64xf32>
    %c9 = arith.constant 9 : index
    %c0_162 = arith.constant 0 : index
    %c0_163 = arith.constant 0 : index
    %186 = vector.load %arg6[%c9, %c0_162, %c0_163] : memref<14x64x10xf32, #tpu.memory_space<vmem>>, vector<1x64x10xf32>
    %187 = vector.shape_cast %186 : vector<1x64x10xf32> to vector<64x10xf32>
    %cst_164 = arith.constant dense<0.000000e+00> : vector<1x10xf32>
    %188 = tpu.matmul %185, %187, %cst_164 {dimension_numbers = #tpu.dot_dimension_numbers<[1], [0], [0], [1], [0, 0, 1, 1], [], []>} : vector<1x64xf32>, vector<64x10xf32>, vector<1x10xf32> -> vector<1x10xf32>
    %189 = arith.addf %183, %188 : vector<1x10xf32>
    %190 = vector.extract_strided_slice %128 {offsets = [0, 10, 0], sizes = [1, 1, 64], strides = [1, 1, 1]} : vector<1x16x64xf32> to vector<1x1x64xf32>
    %191 = vector.shape_cast %190 : vector<1x1x64xf32> to vector<1x64xf32>
    %c10 = arith.constant 10 : index
    %c0_165 = arith.constant 0 : index
    %c0_166 = arith.constant 0 : index
    %192 = vector.load %arg6[%c10, %c0_165, %c0_166] : memref<14x64x10xf32, #tpu.memory_space<vmem>>, vector<1x64x10xf32>
    %193 = vector.shape_cast %192 : vector<1x64x10xf32> to vector<64x10xf32>
    %cst_167 = arith.constant dense<0.000000e+00> : vector<1x10xf32>
    %194 = tpu.matmul %191, %193, %cst_167 {dimension_numbers = #tpu.dot_dimension_numbers<[1], [0], [0], [1], [0, 0, 1, 1], [], []>} : vector<1x64xf32>, vector<64x10xf32>, vector<1x10xf32> -> vector<1x10xf32>
    %195 = arith.addf %189, %194 : vector<1x10xf32>
    %196 = vector.extract_strided_slice %128 {offsets = [0, 11, 0], sizes = [1, 1, 64], strides = [1, 1, 1]} : vector<1x16x64xf32> to vector<1x1x64xf32>
    %197 = vector.shape_cast %196 : vector<1x1x64xf32> to vector<1x64xf32>
    %c11 = arith.constant 11 : index
    %c0_168 = arith.constant 0 : index
    %c0_169 = arith.constant 0 : index
    %198 = vector.load %arg6[%c11, %c0_168, %c0_169] : memref<14x64x10xf32, #tpu.memory_space<vmem>>, vector<1x64x10xf32>
    %199 = vector.shape_cast %198 : vector<1x64x10xf32> to vector<64x10xf32>
    %cst_170 = arith.constant dense<0.000000e+00> : vector<1x10xf32>
    %200 = tpu.matmul %197, %199, %cst_170 {dimension_numbers = #tpu.dot_dimension_numbers<[1], [0], [0], [1], [0, 0, 1, 1], [], []>} : vector<1x64xf32>, vector<64x10xf32>, vector<1x10xf32> -> vector<1x10xf32>
    %201 = arith.addf %195, %200 : vector<1x10xf32>
    %202 = vector.extract_strided_slice %128 {offsets = [0, 12, 0], sizes = [1, 1, 64], strides = [1, 1, 1]} : vector<1x16x64xf32> to vector<1x1x64xf32>
    %203 = vector.shape_cast %202 : vector<1x1x64xf32> to vector<1x64xf32>
    %c12 = arith.constant 12 : index
    %c0_171 = arith.constant 0 : index
    %c0_172 = arith.constant 0 : index
    %204 = vector.load %arg6[%c12, %c0_171, %c0_172] : memref<14x64x10xf32, #tpu.memory_space<vmem>>, vector<1x64x10xf32>
    %205 = vector.shape_cast %204 : vector<1x64x10xf32> to vector<64x10xf32>
    %cst_173 = arith.constant dense<0.000000e+00> : vector<1x10xf32>
    %206 = tpu.matmul %203, %205, %cst_173 {dimension_numbers = #tpu.dot_dimension_numbers<[1], [0], [0], [1], [0, 0, 1, 1], [], []>} : vector<1x64xf32>, vector<64x10xf32>, vector<1x10xf32> -> vector<1x10xf32>
    %207 = arith.addf %201, %206 : vector<1x10xf32>
    %208 = vector.extract_strided_slice %128 {offsets = [0, 13, 0], sizes = [1, 1, 64], strides = [1, 1, 1]} : vector<1x16x64xf32> to vector<1x1x64xf32>
    %209 = vector.shape_cast %208 : vector<1x1x64xf32> to vector<1x64xf32>
    %c13 = arith.constant 13 : index
    %c0_174 = arith.constant 0 : index
    %c0_175 = arith.constant 0 : index
    %210 = vector.load %arg6[%c13, %c0_174, %c0_175] : memref<14x64x10xf32, #tpu.memory_space<vmem>>, vector<1x64x10xf32>
    %211 = vector.shape_cast %210 : vector<1x64x10xf32> to vector<64x10xf32>
    %cst_176 = arith.constant dense<0.000000e+00> : vector<1x10xf32>
    %212 = tpu.matmul %209, %211, %cst_176 {dimension_numbers = #tpu.dot_dimension_numbers<[1], [0], [0], [1], [0, 0, 1, 1], [], []>} : vector<1x64xf32>, vector<64x10xf32>, vector<1x10xf32> -> vector<1x10xf32>
    %213 = arith.addf %207, %212 : vector<1x10xf32>
    %c0_177 = arith.constant 0 : index
    %c0_178 = arith.constant 0 : index
    %214 = vector.load %arg7[%c0_177, %c0_178] : memref<1x10xf32, #tpu.memory_space<vmem>>, vector<1x10xf32>
    %215 = arith.addf %213, %214 : vector<1x10xf32>
    %216 = vector.shape_cast %215 : vector<1x10xf32> to vector<1x1x10xf32>
    %c0_179 = arith.constant 0 : index
    %c0_180 = arith.constant 0 : index
    %c0_181 = arith.constant 0 : index
    %217 = vector.load %arg8[%c0_179, %c0_180, %c0_181] : memref<1x1x10xf32, #tpu.memory_space<vmem>>, vector<1x1x10xf32>
    tpu.vector_store %arg8[%c0_179, %c0_180, %c0_181], %216 {strides = array<i32>} : memref<1x1x10xf32, #tpu.memory_space<vmem>>, vector<1x1x10xf32>,
    return
  }
  func.func @transform_0(%arg0: i32) -> (i32, i32, i32, i32) {
    %c0_i32 = arith.constant 0 : i32
    %c0_i32_0 = arith.constant 0 : i32
    %c0_i32_1 = arith.constant 0 : i32
    %c0_i32_2 = arith.constant 0 : i32
    return %arg0, %c0_i32, %c0_i32_0, %c0_i32_1 : i32, i32, i32, i32
  }
  func.func @transform_1(%arg0: i32) -> (i32, i32, i32) {
    %c0_i32 = arith.constant 0 : i32
    %c0_i32_0 = arith.constant 0 : i32
    %c0_i32_1 = arith.constant 0 : i32
    %c0_i32_2 = arith.constant 0 : i32
    return %c0_i32, %c0_i32_0, %c0_i32_1 : i32, i32, i32
  }
  func.func @transform_2(%arg0: i32) -> (i32, i32) {
    %c0_i32 = arith.constant 0 : i32
    %c0_i32_0 = arith.constant 0 : i32
    %c0_i32_1 = arith.constant 0 : i32
    return %c0_i32, %c0_i32_0 : i32, i32
  }
  func.func @transform_3(%arg0: i32) -> (i32, i32, i32) {
    %c0_i32 = arith.constant 0 : i32
    %c0_i32_0 = arith.constant 0 : i32
    %c0_i32_1 = arith.constant 0 : i32
    %c0_i32_2 = arith.constant 0 : i32
    return %c0_i32, %c0_i32_0, %c0_i32_1 : i32, i32, i32
  }
  func.func @transform_4(%arg0: i32) -> (i32, i32) {
    %c0_i32 = arith.constant 0 : i32
    %c0_i32_0 = arith.constant 0 : i32
    %c0_i32_1 = arith.constant 0 : i32
    return %c0_i32, %c0_i32_0 : i32, i32
  }
  func.func @transform_5(%arg0: i32) -> (i32, i32, i32) {
    %c0_i32 = arith.constant 0 : i32
    %c0_i32_0 = arith.constant 0 : i32
    %c0_i32_1 = arith.constant 0 : i32
    %c0_i32_2 = arith.constant 0 : i32
    return %c0_i32, %c0_i32_0, %c0_i32_1 : i32, i32, i32
  }
  func.func @transform_6(%arg0: i32) -> (i32, i32) {
    %c0_i32 = arith.constant 0 : i32
    %c0_i32_0 = arith.constant 0 : i32
    %c0_i32_1 = arith.constant 0 : i32
    return %c0_i32, %c0_i32_0 : i32, i32
  }
  func.func @transform_7(%arg0: i32) -> (i32, i32, i32) {
    %c0_i32 = arith.constant 0 : i32
    %c0_i32_0 = arith.constant 0 : i32
    %c0_i32_1 = arith.constant 0 : i32
    return %arg0, %c0_i32, %c0_i32_0 : i32, i32, i32
  }
}

</mosaic_0001>

<bundles_post_ra>
// kernel: net_forward.1
= control target key start
LH: loop header
LB: loop body
LE: loop exit
PB: predicated region body
PF: predicated region fallthrough
CT: control target
= control target key end

     0   :  { %12 = vsyncpa [#allocation4], 0  ;;  %s14578_s0 = inlined_call_operand.vmem [shape: f32[2,6,16,32], index: 0, kind: input, shape index: {}]   ;;  %s14579_s1 = inlined_call_operand.vmem [shape: f32[5,32,1280], index: 1, kind: input, shape index: {}]   ;;  %s14580_s2 = inlined_call_operand.vmem [shape: f32[1,1280], index: 2, kind: input, shape index: {}]   ;;  %s14581_s3 = inlined_call_operand.vmem [shape: f32[5,640,64], index: 3, kind: input, shape index: {}]   ;;  %s14582_s4 = inlined_call_operand.vmem [shape: f32[1,64], index: 4, kind: input, shape index: {}]   ;;  %s14583_s5 = inlined_call_operand.vmem [shape: f32[14,64,10], index: 5, kind: input, shape index: {}]   ;;  %s14584_s6 = inlined_call_operand.vmem [shape: f32[1,10], index: 6, kind: input, shape index: {}]   ;;  %s14585_s7 = inlined_call_operand.hbm [shape: f32[2,1,10], index: 7, kind: output, shape index: {}]  }
   0x1   :  { %14 = vsyncpa [#allocation4 + $0x1], 0  ;;  %s10973_s24 = smov 0   ;;  %s10975_s25 = smov 0  }
   0x2   :  { %s10977_s26 = smov 0   ;;  %s10979_s27 = smov 0  }
   0x3 LB: > { %s10994_s28 = sadd.s32 4294967295, %s10927_s27   ;;  %s7835_s29 = sadd.s32 4294967294, %s10927_s27   ;;  %s10927_s27 = sphi %s10979_s27, %s14705_s27   ;;  %s10923_s26 = sphi %s10977_s26, %s14704_s26   ;;  %s10919_s25 = sphi %s10975_s25, %s14703_s25   ;;  %s10915_s24 = sphi %s10973_s24, %s14702_s24  }
   0x4   : > { %s10998_s30 = sadd.s32 1, %s10927_s27   ;;  %s179_s8 = sadd.s32 1, %s10923_s26 }
   0x5   : > { %s176_s9 = ssub.s32 %s10927_s27, %s10998_s30  ;;  %p189_p0 = scmp.ne.s32.totalorder %s10923_s26, %s10919_s25 }
   0x6   : > { %p177_p1 = scmp.eq.s32.totalorder %s176_s9, 0  ;;  %p190_p2 = scmp.eq.s32.totalorder %s10994_s28, 1 }
   0x7   : > { %p195_p3 = scmp.ne.s32.totalorder %s10919_s25, %s10915_s24  ;;  %p196_p4 = scmp.eq.s32.totalorder %s7835_s29, 1 }
   0x8   : > { %s11009_s10 = scalar_select %p177_p1, %s10923_s26, %s179_s8  }
   0x9   : > { %p11011_p5 = por %p190_p2, %p189_p0  ;;  %p11015_p6 = por %p196_p4, %p195_p3 }
   0xa   : > { %p7838_p7 = scmp.ge.s32.totalorder %s10927_s27, 1  ;;  %p240_p8 = scmp.lt.s32.totalorder %s10927_s27, 3 }
   0xc   : > { %p241_p9 = pnand %p7838_p7, %p240_p8 }
   0xe   : > { %244 = sbr.rel (%p241_p9) target bundleno = 1433 (0x599), region = 48 }
  0x15   : > { %v7843_v0 = vld [vmem:[%s14579_s1 + $0x148] sm:$0xff]  ;;  %v7853_v1 = vld [vmem:[%s14579_s1 + $0x198] sm:$0xff]  ;;  %p271_p10 = scmp.lt.s32.totalorder %s10994_s28, 1  ;;  %v7842_v5 = vld [vmem:[%s14579_s1 + $0x140] sm:$0xff]  ;;  %v14586_v7 = vmov 0.0   ;;  %vm364_vm0 = vcmask 261120  }
  0x16   : > { %v7845_v2 = vld [vmem:[%s14579_s1 + $0x158] sm:$0xff]  ;;  %v11031_v3 = vpack.c.bf16 %v7853_v1, %v7843_v0  ;;  %v7855_v4 = vld [vmem:[%s14579_s1 + $0x1a8] sm:$0xff]  ;;  %v7852_v6 = vld [vmem:[%s14579_s1 + $0x190] sm:$0xff]  ;;  %435 = vmatprep.mubr.f32.mxu0 %v14586_v7  ;;  %4748 = vst [vmem:[#allocation2] sm:$0xff] %v14586_v7  ;;  %512 = vmatprep.mubr.f32.mxu1 %v14586_v7  ;;  %s8549_s23 = sshll.u32 %s10994_s28, 4 }
  0x17   : > { %4749 = vst [vmem:[#allocation2 + $0x8] sm:$0xff] %v14586_v7  ;;  %4750 = vst [vmem:[#allocation2 + $0x10] sm:$0xff] %v14586_v7  ;;  %v11054_v8 = vpack.c.bf16 %v7855_v4, %v7845_v2  ;;  %v11056_v9 = vpack.c.bf16 %v7852_v6, %v7842_v5  ;;  %v7844_v10 = vld [vmem:[%s14579_s1 + $0x150] sm:$0xff]  ;;  %v7854_v11 = vld [vmem:[%s14579_s1 + $0x1a0] sm:$0xff]  ;;  %s272_s17 = scalar_select %p271_p10, %s10994_s28, 1 }
  0x18   : > { %4751 = vst [vmem:[#allocation2 + $0x18] sm:$0xff] %v14586_v7  ;;  %4752 = vst [vmem:[#allocation2 + $0x20] sm:$0xff] %v14586_v7  ;;  %v7863_v12 = vld [vmem:[%s14579_s1 + $0x1e8] sm:$0xff]  ;;  %9590 = vmatprep.subr.bf16.mxu0 %v11031_v3  ;;  %v11071_v13 = vpack.c.bf16 %v7854_v11, %v7844_v10  ;;  %v7873_v14 = vld [vmem:[%s14579_s1 + $0x238] sm:$0xff]  ;;  %s14536_s13 = scalar_lea.hbm %s14585_s7, %s8549_s23  ;;  %s10932_s28 = smov [#allocation3]  }
  0x19   : > { %4758 = vst [vmem:[#allocation2 + $0x50] sm:$0xff] %v14586_v7  ;;  %4759 = vst [vmem:[#allocation2 + $0x58] sm:$0xff] %v14586_v7  ;;  %v7865_v15 = vld [vmem:[%s14579_s1 + $0x1f8] sm:$0xff]  ;;  %v7875_v16 = vld [vmem:[%s14579_s1 + $0x248] sm:$0xff]  ;;  %9598 = vmatprep.subr.bf16.mxu1 %v11054_v8  ;;  %9592 = vmatpush1.bf16.msra.mxu0 %v11056_v9  ;;  %v11084_v17 = vpack.c.bf16 %v7873_v14, %v7863_v12  ;;  %s10817_s16 = smul.u32 96, %s272_s17  ;;  %s10869_s18 = sshll.u32 %s10932_s28, 4  ;;  %s10870_s18 = int_to_ptr.vmem [resolvable:$false] %s10869_s18 }
  0x1a   : > { %4760 = vst [vmem:[#allocation2 + $0x60] sm:$0xff] %v14586_v7  ;;  %4761 = vst [vmem:[#allocation2 + $0x68] sm:$0xff] %v14586_v7  ;;  %v11086_v18 = vpack.c.bf16 %v7875_v16, %v7865_v15  ;;  %v7862_v19 = vld [vmem:[%s14579_s1 + $0x1e0] sm:$0xff]  ;;  %v7872_v20 = vld [vmem:[%s14579_s1 + $0x230] sm:$0xff]  ;;  %9600 = vmatpush1.bf16.msra.mxu1 %v11071_v13  ;;  %s10871_s19 = scalar_lea.vmem %s10870_s18, 32 }
  0x1b   : > { %4762 = vst [vmem:[#allocation2 + $0x70] sm:$0xff] %v14586_v7  ;;  %v7864_v21 = vld [vmem:[%s14579_s1 + $0x1f0] sm:$0xff]  ;;  %v11098_v22 = vpack.c.bf16 %v7872_v20, %v7862_v19  ;;  %v7874_v23 = vld [vmem:[%s14579_s1 + $0x240] sm:$0xff]  ;;  %v7847_v24 = vld [vmem:[%s14579_s1 + $0x168] sm:$0xff]  ;;  %9594 = vmatprep.subr.bf16.mxu0 %v11084_v17  ;;  %s11116_s8 = scalar_lea.vmem %s14578_s0, %s10817_s16  ;;  %s269_s16 = sand.u32 1, %s10919_s25  }
  0x1c   : > { %v7857_v25 = vld [vmem:[%s14579_s1 + $0x1b8] sm:$0xff]  ;;  %9602 = vmatprep.subr.bf16.mxu1 %v11086_v18  ;;  %v11111_v26 = vpack.c.bf16 %v7874_v23, %v7864_v21  ;;  %v7859_v29 = vld [vmem:[%s14579_s1 + $0x1c8] sm:$0xff]  ;;  %v7846_v30 = vld [vmem:[%s14579_s1 + $0x160] sm:$0xff]  ;;  %s270_s17 = scalar_lea.vmem [#allocation3], %s269_s16  ;;  %s7768_s14 = scalar_lea.sflag [#allocation4], %s269_s16 }
  0x1d   : > { %v11118_v27 = vpack.c.bf16 %v7857_v25, %v7847_v24  ;;  %v7849_v28 = vld [vmem:[%s14579_s1 + $0x178] sm:$0xff]  ;;  %v7856_v32 = vld [vmem:[%s14579_s1 + $0x1b0] sm:$0xff]  ;;  %9596 = vmatpush1.bf16.msra.mxu0 %v11098_v22  ;;  %v7858_v36 = vld [vmem:[%s14579_s1 + $0x1c0] sm:$0xff]  ;;  %s7780_s29 = sshll.u32 %s270_s17, 4  ;;  %s14538_s29 = int_to_ptr.vmem [resolvable:$true] %s7780_s29 }
  0x1e   : > { %v11129_v31 = vpack.c.bf16 %v7859_v29, %v7849_v28  ;;  %v7848_v33 = vld [vmem:[%s14579_s1 + $0x170] sm:$0xff]  ;;  %v11141_v35 = vpack.c.bf16 %v7856_v32, %v7846_v30  ;;  %v7867_v37 = vld [vmem:[%s14579_s1 + $0x208] sm:$0xff]  ;;  %9604 = vmatpush1.bf16.msra.mxu1 %v11111_v26  ;;  %v7877_v39 = vld [vmem:[%s14579_s1 + $0x258] sm:$0xff]  ;;  %s10865_s15 = scalar_lea.vmem %s14538_s29, 16  ;;  %p10872_p0 = scmp.lt.s32.totalorder %s14538_s29, %s10870_s18 }
  0x1f   : > { %v11139_v34 = vld [vmem:[%s11116_s8 + $0x10] sm:$0xff]  ;;  %9606 = vmatprep.subr.bf16.mxu0 %v11118_v27  ;;  %v11151_v38 = vpack.c.bf16 %v7858_v36, %v7848_v33  ;;  %v7869_v40 = vld [vmem:[%s14579_s1 + $0x218] sm:$0xff]  ;;  %v7879_v41 = vld [vmem:[%s14579_s1 + $0x268] sm:$0xff]  ;;  %v11163_v42 = vpack.c.bf16 %v7877_v39, %v7867_v37  ;;  %p10866_p11 = scmp.ne.s32.totalorder %s14538_s29, %s10865_s15  ;;  %p10873_p1 = scmp.lt.s32.totalorder %s10871_s19, %s10865_s15 }
  0x20   : > { %9614 = vmatprep.subr.bf16.mxu1 %v11129_v31  ;;  %v7866_v43 = vld [vmem:[%s14579_s1 + $0x200] sm:$0xff]  ;;  %v7876_v44 = vld [vmem:[%s14579_s1 + $0x250] sm:$0xff]  ;;  %7882 = vmatmul.mubr.msk.f32.vlgmr.msra.gmra.mrb[0].mxu0 %vm364_vm0, %v11139_v34  ;;  %v11176_v46 = vpack.c.bf16 %v7879_v41, %v7869_v40  ;;  %v7851_v48 = vld [vmem:[%s14579_s1 + $0x188] sm:$0xff] }
  0x21   : > { %v7868_v45 = vld [vmem:[%s14579_s1 + $0x210] sm:$0xff]  ;;  %v7878_v47 = vld [vmem:[%s14579_s1 + $0x260] sm:$0xff]  ;;  %v7861_v49 = vld [vmem:[%s14579_s1 + $0x1d8] sm:$0xff]  ;;  %7884 = vmatmul.mubr.msk.f32.vlgmr.msra.gmra.mrb[0].mxu1 %vm364_vm0, %v11139_v34  ;;  %9608 = vmatpush1.bf16.msra.mxu0 %v11141_v35  ;;  %v11193_v51 = vpack.c.bf16 %v7876_v44, %v7866_v43  ;;  %p10867_p12 = pnand %p10866_p11, %p11011_p5  ;;  %p10874_p2 = por %p10873_p1, %p10872_p0 }
  0x22   : > { %v11191_v50 = vld [vmem:[%s11116_s8 + $0x18] sm:$0xff]  ;;  %v293_v53 = vld [vmem:[%s14579_s1 + $0x68] sm:$0xff]  ;;  %9616 = vmatpush1.bf16.msra.mxu1 %v11151_v38  ;;  %441 = vmatprep.mubr.f32.mxu0 %v14586_v7  ;;  %v11203_v54 = vpack.c.bf16 %v7878_v47, %v7868_v45  ;;  %v7850_v55 = vld [vmem:[%s14579_s1 + $0x180] sm:$0xff]  ;;  %v11213_v57 = vpack.c.bf16 %v7861_v49, %v7851_v48 }
  0x23   : > { %v283_v52 = vld [vmem:[%s14579_s1 + $0x18] sm:$0xff]  ;;  %v7860_v56 = vld [vmem:[%s14579_s1 + $0x1d0] sm:$0xff]  ;;  %518 = vmatprep.mubr.f32.mxu1 %v14586_v7  ;;  %9610 = vmatprep.subr.bf16.mxu0 %v11163_v42  ;;  %v292_v59 = vld [vmem:[%s14579_s1 + $0x60] sm:$0xff]  ;;  %p10868_p13 = pneg %p10867_p12 }
  0x24   : > { %v282_v58 = vld [vmem:[%s14579_s1 + $0x10] sm:$0xff]  ;;  %7883 = vmatmul.mubr.msk.f32.gmra.mrb[2].mxu0 %vm364_vm0, %v11191_v50  ;;  %9618 = vmatprep.subr.bf16.mxu1 %v11176_v46  ;;  %v11224_v60 = vpack.c.bf16 %v293_v53, %v283_v52  ;;  %v7871_v61 = vld [vmem:[%s14579_s1 + $0x228] sm:$0xff]  ;;  %v7881_v62 = vld [vmem:[%s14579_s1 + $0x278] sm:$0xff]  ;;  %v11235_v63 = vpack.c.bf16 %v7860_v56, %v7850_v55 }
  0x25   : > { %7885 = vmatmul.mubr.msk.f32.gmra.mrb[2].mxu1 %vm364_vm0, %v11191_v50  ;;  %9612 = vmatpush1.bf16.msra.mxu0 %v11193_v51  ;;  %v303_v0 = vld [vmem:[%s14579_s1 + $0xb8] sm:$0xff]  ;;  %v313_v1 = vld [vmem:[%s14579_s1 + $0x108] sm:$0xff]  ;;  %v11245_v2 = vpack.c.bf16 %v292_v59, %v282_v58  ;;  %v7870_v4 = vld [vmem:[%s14579_s1 + $0x220] sm:$0xff]  ;;  %v11255_v6 = vpack.c.bf16 %v7881_v62, %v7871_v61  ;;  %p10875_p3 = pnand %p10874_p2, %p10868_p13 }
  0x26   : > { %9620 = vmatpush1.bf16.msra.mxu1 %v11203_v54  ;;  %589 = vmatprep.mubr.f32.mxu0 %v14586_v7  ;;  %v7880_v5 = vld [vmem:[%s14579_s1 + $0x270] sm:$0xff]  ;;  %v312_v11 = vld [vmem:[%s14579_s1 + $0x100] sm:$0xff]  ;;  %v11266_v12 = vpack.c.bf16 %v313_v1, %v303_v0  ;;  %v281_v14 = vld [vmem:[%s14579_s1 + $0x8] sm:$0xff] }
  0x27   : > { %666 = vmatprep.mubr.f32.mxu1 %v14586_v7  ;;  %9622 = vmatprep.subr.bf16.mxu0 %v11213_v57  ;;  %v302_v10 = vld [vmem:[%s14579_s1 + $0xb0] sm:$0xff]  ;;  %v291_v15 = vld [vmem:[%s14579_s1 + $0x58] sm:$0xff]  ;;  %v11277_v16 = vpack.c.bf16 %v7880_v5, %v7870_v4  ;;  %v297_v20 = vld [vmem:[%s14579_s1 + $0x88] sm:$0xff] }
  0x28   : > { %7886 = vmatmul.mubr.msk.f32.vlgmr.msra.gmra.mrb[4].mxu0 %vm364_vm0, %v11139_v34  ;;  %9638 = vmatprep.subr.bf16.mxu1 %v11224_v60  ;;  %v287_v19 = vld [vmem:[%s14579_s1 + $0x38] sm:$0xff]  ;;  %v11287_v21 = vpack.c.bf16 %v312_v11, %v302_v10  ;;  %v280_v23 = vld [vmem:[%s14579_s1] sm:$0xff]  ;;  %v290_v24 = vld [vmem:[%s14579_s1 + $0x50] sm:$0xff]  ;;  %v11297_v25 = vpack.c.bf16 %v291_v15, %v281_v14 }
  0x29   : > { %7888 = vmatmul.mubr.msk.f32.vlgmr.msra.gmra.mrb[4].mxu1 %vm364_vm0, %v11139_v34  ;;  %9624 = vmatpush1.bf16.msra.mxu0 %v11235_v63  ;;  %v286_v28 = vld [vmem:[%s14579_s1 + $0x30] sm:$0xff]  ;;  %v296_v29 = vld [vmem:[%s14579_s1 + $0x80] sm:$0xff]  ;;  %v11308_v30 = vpack.c.bf16 %v297_v20, %v287_v19  ;;  %v301_v32 = vld [vmem:[%s14579_s1 + $0xa8] sm:$0xff]  ;;  %v11319_v36 = vpack.c.bf16 %v290_v24, %v280_v23 }
  0x2a   : > { %9640 = vmatpush1.bf16.msra.mxu1 %v11245_v2  ;;  %595 = vmatprep.mubr.f32.mxu0 %v14586_v7  ;;  %v311_v33 = vld [vmem:[%s14579_s1 + $0xf8] sm:$0xff]  ;;  %v317_v39 = vld [vmem:[%s14579_s1 + $0x128] sm:$0xff]  ;;  %v11330_v40 = vld [vmem:[%s11116_s8] sm:$0xff]  ;;  %v11332_v41 = vpack.c.bf16 %v296_v29, %v286_v28 }
  0x2b   : > { %672 = vmatprep.mubr.f32.mxu1 %v14586_v7  ;;  %9626 = vmatprep.subr.bf16.mxu0 %v11255_v6  ;;  %v307_v37 = vld [vmem:[%s14579_s1 + $0xd8] sm:$0xff]  ;;  %v300_v43 = vld [vmem:[%s14579_s1 + $0xa0] sm:$0xff]  ;;  %v310_v44 = vld [vmem:[%s14579_s1 + $0xf0] sm:$0xff]  ;;  %v11342_v45 = vpack.c.bf16 %v311_v33, %v301_v32 }
  0x2c   : > { %7887 = vmatmul.mubr.msk.f32.gmra.mrb[6].mxu0 %vm364_vm0, %v11191_v50  ;;  %9642 = vmatprep.subr.bf16.mxu1 %v11266_v12  ;;  %v306_v47 = vld [vmem:[%s14579_s1 + $0xd0] sm:$0xff]  ;;  %v316_v48 = vld [vmem:[%s14579_s1 + $0x120] sm:$0xff]  ;;  %v11353_v49 = vpack.c.bf16 %v317_v39, %v307_v37  ;;  %v285_v52 = vld [vmem:[%s14579_s1 + $0x28] sm:$0xff]  ;;  %v11364_v55 = vpack.c.bf16 %v310_v44, %v300_v43 }
  0x2d   : > { %7889 = vmatmul.mubr.msk.f32.gmra.mrb[6].mxu1 %vm364_vm0, %v11191_v50  ;;  %9628 = vmatpush1.bf16.msra.mxu0 %v11277_v16  ;;  %v295_v53 = vld [vmem:[%s14579_s1 + $0x78] sm:$0xff]  ;;  %v7917_v56 = vld [vmem:[%s14579_s1 + $0x2e8] sm:$0xff]  ;;  %v11377_v59 = vpack.c.bf16 %v316_v48, %v306_v47  ;;  %v284_v61 = vld [vmem:[%s14579_s1 + $0x20] sm:$0xff] }
  0x2e   : > { %9644 = vmatpush1.bf16.msra.mxu1 %v11287_v21  ;;  %743 = vmatprep.mubr.f32.mxu0 %v14586_v7  ;;  %v11375_v58 = vld [vmem:[%s11116_s8 + $0x8] sm:$0xff]  ;;  %v294_v62 = vld [vmem:[%s14579_s1 + $0x70] sm:$0xff]  ;;  %v11387_v0 = vpack.c.bf16 %v295_v53, %v285_v52  ;;  %v7916_v4 = vld [vmem:[%s14579_s1 + $0x2e0] sm:$0xff] }
  0x2f   : > { %903 = vmatprep.mubr.f32.mxu1 %v14586_v7  ;;  %9630 = vmatprep.subr.bf16.mxu0 %v11297_v25  ;;  %v7906_v1 = vld [vmem:[%s14579_s1 + $0x290] sm:$0xff]  ;;  %v305_v10 = vld [vmem:[%s14579_s1 + $0xc8] sm:$0xff]  ;;  %v315_v11 = vld [vmem:[%s14579_s1 + $0x118] sm:$0xff]  ;;  %v11409_v14 = vpack.c.bf16 %v294_v62, %v284_v61 }
  0x30   : > { %7890 = vmatmul.mubr.msk.f32.vlgmr.msra.gmra.mrb[8].mxu0 %vm364_vm0, %v11139_v34  ;;  %9654 = vmatprep.subr.bf16.mxu1 %v11308_v30  ;;  %v7907_v34 = vld [vmem:[%s14579_s1 + $0x298] sm:$0xff]  ;;  %v7937_v19 = vld [vmem:[%s14579_s1 + $0x388] sm:$0xff]  ;;  %v11419_v20 = vpack.c.bf16 %v7916_v4, %v7906_v1  ;;  %v304_v23 = vld [vmem:[%s14579_s1 + $0xc0] sm:$0xff]  ;;  %v11429_v28 = vpack.c.bf16 %v315_v11, %v305_v10 }
  0x31   : > { %7894 = vmatmul.mubr.msk.f32.vlgmr.msra.gmra.mrb[0].mxu1 %vm364_vm0, %v11330_v40  ;;  %9632 = vmatpush1.bf16.msra.mxu0 %v11319_v36  ;;  %v11398_v5 = vpack.c.bf16 %v7917_v56, %v7907_v34  ;;  %v7927_v15 = vld [vmem:[%s14579_s1 + $0x338] sm:$0xff]  ;;  %v314_v24 = vld [vmem:[%s14579_s1 + $0x110] sm:$0xff]  ;;  %v7936_v32 = vld [vmem:[%s14579_s1 + $0x380] sm:$0xff] }
  0x32   : > { %9656 = vmatpush1.bf16.msra.mxu1 %v11332_v41  ;;  %749 = vmatprep.mubr.f32.mxu0 %v14586_v7  ;;  %14625 = vst [vmem:[#allocation7_spill] sm:$0xff] %v11419_v20  ;;  %v7926_v29 = vld [vmem:[%s14579_s1 + $0x330] sm:$0xff]  ;;  %v11440_v33 = vpack.c.bf16 %v7937_v19, %v7927_v15  ;;  %v289_v37 = vld [vmem:[%s14579_s1 + $0x48] sm:$0xff]  ;;  %v299_v39 = vld [vmem:[%s14579_s1 + $0x98] sm:$0xff]  ;;  %v11451_v43 = vpack.c.bf16 %v314_v24, %v304_v23 }
  0x33   : > { %909 = vmatprep.mubr.f32.mxu1 %v14586_v7  ;;  %9634 = vmatprep.subr.bf16.mxu0 %v11342_v45  ;;  %14624 = vst [vmem:[#allocation6_spill] sm:$0xff] %v11398_v5  ;;  %v7911_v44 = vld [vmem:[%s14579_s1 + $0x2b8] sm:$0xff]  ;;  %v7921_v47 = vld [vmem:[%s14579_s1 + $0x308] sm:$0xff]  ;;  %v11461_v48 = vpack.c.bf16 %v7936_v32, %v7926_v29  ;;  %v288_v52 = vld [vmem:[%s14579_s1 + $0x40] sm:$0xff]  ;;  %v11471_v34 = vpack.c.bf16 %v299_v39, %v289_v37 }
  0x34   : > { %7891 = vmatmul.mubr.msk.f32.gmra.mrb[10].mxu0 %vm364_vm0, %v11191_v50  ;;  %9658 = vmatprep.subr.bf16.mxu1 %v11353_v49  ;;  %14626 = vst [vmem:[#allocation8_spill] sm:$0xff] %v11440_v33  ;;  %v298_v53 = vld [vmem:[%s14579_s1 + $0x90] sm:$0xff]  ;;  %v7920_v61 = vld [vmem:[%s14579_s1 + $0x300] sm:$0xff]  ;;  %v11482_v62 = vpack.c.bf16 %v7921_v47, %v7911_v44  ;;  %v309_v1 = vld [vmem:[%s14579_s1 + $0xe8] sm:$0xff] }
  0x35   : > { %7895 = vmatmul.mubr.msk.f32.gmra.mrb[2].mxu1 %vm364_vm0, %v11375_v58  ;;  %9636 = vmatpush1.bf16.msra.mxu0 %v11364_v55  ;;  %14627 = vst [vmem:[#allocation9_spill] sm:$0xff] %v11461_v48  ;;  %v7910_v56 = vld [vmem:[%s14579_s1 + $0x2b0] sm:$0xff]  ;;  %v319_v4 = vld [vmem:[%s14579_s1 + $0x138] sm:$0xff]  ;;  %v11493_v10 = vpack.c.bf16 %v298_v53, %v288_v52  ;;  %v7941_v15 = vld [vmem:[%s14579_s1 + $0x3a8] sm:$0xff] }
  0x36   : > { %9660 = vmatpush1.bf16.msra.mxu1 %v11377_v59  ;;  %826 = vmatprep.mubr.f32.mxu0 %v14586_v7  ;;  %14628 = vst [vmem:[#allocation10_spill] sm:$0xff] %v11482_v62  ;;  %v7931_v11 = vld [vmem:[%s14579_s1 + $0x358] sm:$0xff]  ;;  %v11504_v19 = vld [vmem:[%s11116_s8 + $0x20] sm:$0xff]  ;;  %v11506_v23 = vpack.c.bf16 %v7920_v61, %v7910_v56  ;;  %v318_v29 = vld [vmem:[%s14579_s1 + $0x130] sm:$0xff]  ;;  %v11516_v32 = vpack.c.bf16 %v319_v4, %v309_v1 }
  0x37   : > { %1057 = vmatprep.mubr.f32.mxu1 %v14586_v7  ;;  %9646 = vmatprep.subr.bf16.mxu0 %v11387_v0  ;;  %v308_v24 = vld [vmem:[%s14579_s1 + $0xe0] sm:$0xff]  ;;  %v7930_v37 = vld [vmem:[%s14579_s1 + $0x350] sm:$0xff]  ;;  %v11527_v44 = vpack.c.bf16 %v7941_v15, %v7931_v11  ;;  %v7905_v47 = vld [vmem:[%s14579_s1 + $0x288] sm:$0xff] }
  0x38   : > { %7892 = vmatmul.mubr.msk.f32.vlgmr.msra.gmra.mrb[0].mxu0 %vm364_vm0, %v11330_v40  ;;  %9678 = vmatprep.subr.bf16.mxu1 %v11398_v5  ;;  %14629 = vst [vmem:[#allocation11_spill] sm:$0xff] %v11506_v23  ;;  %v7940_v39 = vld [vmem:[%s14579_s1 + $0x3a0] sm:$0xff]  ;;  %v7915_v52 = vld [vmem:[%s14579_s1 + $0x2d8] sm:$0xff]  ;;  %v11538_v53 = vpack.c.bf16 %v318_v29, %v308_v24  ;;  %v7969_v61 = vld [vmem:[%s14579_s1 + $0x428] sm:$0xff] }
  0x39   : > { %7898 = vmatmul.mubr.msk.f32.vlgmr.msra.gmra.mrb[4].mxu1 %vm364_vm0, %v11330_v40  ;;  %9648 = vmatpush1.bf16.msra.mxu0 %v11409_v14  ;;  %14630 = vst [vmem:[#allocation12_spill] sm:$0xff] %v11527_v44  ;;  %v7959_v56 = vld [vmem:[%s14579_s1 + $0x3d8] sm:$0xff]  ;;  %v11549_v1 = vld [vmem:[%s11116_s8 + $0x28] sm:$0xff]  ;;  %v11551_v4 = vpack.c.bf16 %v7940_v39, %v7930_v37  ;;  %v7904_v11 = vld [vmem:[%s14579_s1 + $0x280] sm:$0xff]  ;;  %v11561_v24 = vpack.c.bf16 %v7915_v52, %v7905_v47 }
  0x3a   : > { %9680 = vmatpush1.bf16.msra.mxu1 %v11419_v20  ;;  %832 = vmatprep.mubr.f32.mxu0 %v14586_v7  ;;  %v7914_v15 = vld [vmem:[%s14579_s1 + $0x2d0] sm:$0xff]  ;;  %v7968_v37 = vld [vmem:[%s14579_s1 + $0x420] sm:$0xff]  ;;  %v11572_v39 = vpack.c.bf16 %v7969_v61, %v7959_v56  ;;  %v7925_v47 = vld [vmem:[%s14579_s1 + $0x328] sm:$0xff] }
  0x3b   : > { %1063 = vmatprep.mubr.f32.mxu1 %v14586_v7  ;;  %9650 = vmatprep.subr.bf16.mxu0 %v11429_v28  ;;  %14631 = vst [vmem:[#allocation13_spill] sm:$0xff] %v11551_v4  ;;  %v7958_v29 = vld [vmem:[%s14579_s1 + $0x3d0] sm:$0xff]  ;;  %v7935_v52 = vld [vmem:[%s14579_s1 + $0x378] sm:$0xff]  ;;  %v7989_v61 = vld [vmem:[%s14579_s1 + $0x4c8] sm:$0xff] }
  0x3c   : > { %7893 = vmatmul.mubr.msk.f32.gmra.mrb[2].mxu0 %vm364_vm0, %v11375_v58  ;;  %9682 = vmatprep.subr.bf16.mxu1 %v11440_v33  ;;  %14632 = vst [vmem:[#allocation14_spill] sm:$0xff] %v11572_v39  ;;  %v7979_v56 = vld [vmem:[%s14579_s1 + $0x478] sm:$0xff] }
  0x3d   : > { %7899 = vmatmul.mubr.msk.f32.gmra.mrb[6].mxu1 %vm364_vm0, %v11375_v58  ;;  %9652 = vmatpush1.bf16.msra.mxu0 %v11451_v43 }
  0x3e   : > { %9684 = vmatpush1.bf16.msra.mxu1 %v11461_v48  ;;  %980 = vmatprep.mubr.f32.mxu0 %v14586_v7 }
  0x3f   : > { %1338 = vmatprep.mubr.f32.mxu1 %v14586_v7  ;;  %9662 = vmatprep.subr.bf16.mxu0 %v11471_v34 }
  0x40   : > { %7896 = vmatmul.mubr.msk.f32.vlgmr.msra.gmra.mrb[4].mxu0 %vm364_vm0, %v11330_v40  ;;  %9694 = vmatprep.subr.bf16.mxu1 %v11482_v62  ;;  %v7924_v62 = vld [vmem:[%s14579_s1 + $0x320] sm:$0xff] }
  0x41   : > { %7946 = vmatmul.mubr.msk.f32.vlgmr.msra.gmra.mrb[0].mxu1 %vm364_vm0, %v11504_v19  ;;  %9664 = vmatpush1.bf16.msra.mxu0 %v11493_v10 }
  0x42   : > { %9696 = vmatpush1.bf16.msra.mxu1 %v11506_v23  ;;  %986 = vmatprep.mubr.f32.mxu0 %v14586_v7  ;;  %v11593_v23 = vpack.c.bf16 %v7968_v37, %v7958_v29  ;;  %v7988_v29 = vld [vmem:[%s14579_s1 + $0x4c0] sm:$0xff]  ;;  %v11614_v37 = vpack.c.bf16 %v7989_v61, %v7979_v56  ;;  %v7973_v56 = vld [vmem:[%s14579_s1 + $0x448] sm:$0xff] }
  0x43   : > { %1344 = vmatprep.mubr.f32.mxu1 %v14586_v7  ;;  %9666 = vmatprep.subr.bf16.mxu0 %v11516_v32  ;;  %v11583_v7 = vpack.c.bf16 %v7914_v15, %v7904_v11  ;;  %v7934_v11 = vld [vmem:[%s14579_s1 + $0x370] sm:$0xff]  ;;  %v11603_v15 = vpack.c.bf16 %v7935_v52, %v7925_v47  ;;  %v7909_v47 = vld [vmem:[%s14579_s1 + $0x2a8] sm:$0xff]  ;;  %v7919_v52 = vld [vmem:[%s14579_s1 + $0x2f8] sm:$0xff] }
  0x44   : > { %7897 = vmatmul.mubr.msk.f32.gmra.mrb[6].mxu0 %vm364_vm0, %v11375_v58  ;;  %9698 = vmatprep.subr.bf16.mxu1 %v11527_v44  ;;  %v14633_v44 = vmov 0.0   ;;  %14634 = vst [vmem:[#allocation15_spill] sm:$0xff] %v11593_v23  ;;  %14636 = vst [vmem:[#allocation17_spill] sm:$0xff] %v11614_v37  ;;  %v11625_v48 = vpack.c.bf16 %v7934_v11, %v7924_v62  ;;  %v7918_v62 = vld [vmem:[%s14579_s1 + $0x2f0] sm:$0xff]  ;;  %v11645_v11 = vpack.c.bf16 %v7919_v52, %v7909_v47  ;;  %v7929_v47 = vld [vmem:[%s14579_s1 + $0x348] sm:$0xff] }
  0x45   : > { %7947 = vmatmul.mubr.msk.f32.gmra.mrb[2].mxu1 %vm364_vm0, %v11549_v1  ;;  %9668 = vmatpush1.bf16.msra.mxu0 %v11538_v53  ;;  %14635 = vst [vmem:[#allocation16_spill] sm:$0xff] %v11603_v15  ;;  %v7939_v52 = vld [vmem:[%s14579_s1 + $0x398] sm:$0xff] }
  0x46   : > { %9700 = vmatpush1.bf16.msra.mxu1 %v11551_v4  ;;  %1134 = vmatprep.mubr.f32.mxu0 %v14633_v44  ;;  %v7978_v4 = vld [vmem:[%s14579_s1 + $0x470] sm:$0xff]  ;;  %14637 = vst [vmem:[#allocation18_spill] sm:$0xff] %v11625_v48  ;;  %14639 = vst [vmem:[#allocation20_spill] sm:$0xff] %v11645_v11 }
  0x47   : > { %1492 = vmatprep.mubr.f32.mxu1 %v14633_v44  ;;  %9670 = vmatprep.subr.bf16.mxu0 %v11561_v24  ;;  %v11635_v61 = vpack.c.bf16 %v7988_v29, %v7978_v4  ;;  %v7962_v4 = vld [vmem:[%s14579_s1 + $0x3f0] sm:$0xff]  ;;  %v7972_v29 = vld [vmem:[%s14579_s1 + $0x440] sm:$0xff] }
  0x48   : > { %7900 = vmatmul.mubr.msk.f32.vlgmr.msra.gmra.mrb[8].mxu0 %vm364_vm0, %v11330_v40  ;;  %9718 = vmatprep.subr.bf16.mxu1 %v11572_v39  ;;  %v7963_v40 = vld [vmem:[%s14579_s1 + $0x3f8] sm:$0xff]  ;;  %v7908_v39 = vld [vmem:[%s14579_s1 + $0x2a0] sm:$0xff] }
  0x49   : > { %7950 = vmatmul.mubr.msk.f32.vlgmr.msra.gmra.mrb[4].mxu1 %vm364_vm0, %v11504_v19  ;;  %9672 = vmatpush1.bf16.msra.mxu0 %v11583_v7  ;;  %14638 = vst [vmem:[#allocation19_spill] sm:$0xff] %v11635_v61  ;;  %v11667_v33 = vpack.c.bf16 %v7918_v62, %v7908_v39  ;;  %v7928_v39 = vld [vmem:[%s14579_s1 + $0x340] sm:$0xff]  ;;  %v7938_v62 = vld [vmem:[%s14579_s1 + $0x390] sm:$0xff] }
  0x4a   : > { %9720 = vmatpush1.bf16.msra.mxu1 %v11593_v23  ;;  %1140 = vmatprep.mubr.f32.mxu0 %v14633_v44  ;;  %v11656_v23 = vpack.c.bf16 %v7973_v56, %v7963_v40  ;;  %v7993_v40 = vld [vmem:[%s14579_s1 + $0x4e8] sm:$0xff]  ;;  %v11678_v56 = vld [vmem:[%s11116_s8 + $0x30] sm:$0xff] }
  0x4b   : > { %1498 = vmatprep.mubr.f32.mxu1 %v14633_v44  ;;  %9674 = vmatprep.subr.bf16.mxu0 %v11603_v15  ;;  %14641 = vst [vmem:[#allocation22_spill] sm:$0xff] %v11667_v33  ;;  %v7970_v15 = vld [vmem:[%s14579_s1 + $0x430] sm:$0xff] }
  0x4c   : > { %7901 = vmatmul.mubr.msk.f32.gmra.mrb[10].mxu0 %vm364_vm0, %v11375_v58  ;;  %9722 = vmatprep.subr.bf16.mxu1 %v11614_v37  ;;  %14640 = vst [vmem:[#allocation21_spill] sm:$0xff] %v11656_v23  ;;  %v7983_v58 = vld [vmem:[%s14579_s1 + $0x498] sm:$0xff]  ;;  %v11680_v37 = vpack.c.bf16 %v7972_v29, %v7962_v4  ;;  %v7982_v4 = vld [vmem:[%s14579_s1 + $0x490] sm:$0xff]  ;;  %v7992_v29 = vld [vmem:[%s14579_s1 + $0x4e0] sm:$0xff] }
  0x4d   : > { %7951 = vmatmul.mubr.msk.f32.gmra.mrb[6].mxu1 %vm364_vm0, %v11549_v1  ;;  %9676 = vmatpush1.bf16.msra.mxu0 %v11625_v48  ;;  %v11701_v20 = vpack.c.bf16 %v7993_v40, %v7983_v58  ;;  %v8011_v58 = vld [vmem:[%s14579_s1 + $0x518] sm:$0xff]  ;;  %v8021_v40 = vld [vmem:[%s14579_s1 + $0x568] sm:$0xff]  ;;  %v11725_v5 = vpack.c.bf16 %v7992_v29, %v7982_v4  ;;  %v8020_v4 = vld [vmem:[%s14579_s1 + $0x560] sm:$0xff] }
  0x4e   : > { %9724 = vmatpush1.bf16.msra.mxu1 %v11635_v61  ;;  %1261 = vmatprep.mubr.f32.mxu0 %v14633_v44  ;;  %14642 = vst [vmem:[#allocation23_spill] sm:$0xff] %v11680_v37  ;;  %v11690_v61 = vpack.c.bf16 %v7939_v52, %v7929_v47  ;;  %v7913_v47 = vld [vmem:[%s14579_s1 + $0x2c8] sm:$0xff]  ;;  %v7923_v52 = vld [vmem:[%s14579_s1 + $0x318] sm:$0xff]  ;;  %v11746_v29 = vpack.c.bf16 %v8021_v40, %v8011_v58 }
  0x4f   : > { %1793 = vmatprep.mubr.f32.mxu1 %v14633_v44  ;;  %9686 = vmatprep.subr.bf16.mxu0 %v11645_v11  ;;  %14644 = vst [vmem:[#allocation25_spill] sm:$0xff] %v11701_v20  ;;  %v11712_v11 = vpack.c.bf16 %v7938_v62, %v7928_v39  ;;  %14646 = vst [vmem:[#allocation27_spill] sm:$0xff] %v11725_v5  ;;  %v7912_v39 = vld [vmem:[%s14579_s1 + $0x2c0] sm:$0xff]  ;;  %v7922_v62 = vld [vmem:[%s14579_s1 + $0x310] sm:$0xff] }
  0x50   : > { %14643 = vst [vmem:[#allocation24_spill] sm:$0xff] %v11690_v61  ;;  %7944 = vmatmul.mubr.msk.f32.vlgmr.msra.gmra.mrb[0].mxu0 %vm364_vm0, %v11504_v19  ;;  %9734 = vmatprep.subr.bf16.mxu1 %v11656_v23  ;;  %v11723_v23 = vld [vmem:[%s11116_s8 + $0x38] sm:$0xff]  ;;  %14648 = vst [vmem:[#allocation29_spill] sm:$0xff] %v11746_v29  ;;  %v8041_v40 = vld [vmem:[%s14579_s1 + $0x608] sm:$0xff] }
  0x51   : > { %7998 = vmatmul.mubr.msk.f32.vlgmr.msra.gmra.mrb[0].mxu1 %vm364_vm0, %v11678_v56  ;;  %9688 = vmatpush1.bf16.msra.mxu0 %v11667_v33  ;;  %14645 = vst [vmem:[#allocation26_spill] sm:$0xff] %v11712_v11  ;;  %v11735_v33 = vpack.c.bf16 %v7923_v52, %v7913_v47  ;;  %v7933_v47 = vld [vmem:[%s14579_s1 + $0x368] sm:$0xff]  ;;  %v7943_v52 = vld [vmem:[%s14579_s1 + $0x3b8] sm:$0xff] }
  0x52   : > { %9736 = vmatpush1.bf16.msra.mxu1 %v11680_v37  ;;  %1267 = vmatprep.mubr.f32.mxu0 %v14633_v44  ;;  %v8010_v37 = vld [vmem:[%s14579_s1 + $0x510] sm:$0xff]  ;;  %v8031_v58 = vld [vmem:[%s14579_s1 + $0x5b8] sm:$0xff] }
  0x53   : > { %1799 = vmatprep.mubr.f32.mxu1 %v14633_v44  ;;  %9690 = vmatprep.subr.bf16.mxu0 %v11690_v61  ;;  %14647 = vst [vmem:[#allocation28_spill] sm:$0xff] %v11735_v33  ;;  %v11757_v61 = vpack.c.bf16 %v7922_v62, %v7912_v39  ;;  %v7942_v39 = vld [vmem:[%s14579_s1 + $0x3b0] sm:$0xff]  ;;  %v11777_v62 = vpack.c.bf16 %v7943_v52, %v7933_v47  ;;  %v7957_v47 = vld [vmem:[%s14579_s1 + $0x3c8] sm:$0xff]  ;;  %v7967_v52 = vld [vmem:[%s14579_s1 + $0x418] sm:$0xff] }
  0x54   : > { %7945 = vmatmul.mubr.msk.f32.gmra.mrb[2].mxu0 %vm364_vm0, %v11549_v1  ;;  %9738 = vmatprep.subr.bf16.mxu1 %v11701_v20  ;;  %v11767_v20 = vpack.c.bf16 %v8020_v4, %v8010_v37  ;;  %v8040_v37 = vld [vmem:[%s14579_s1 + $0x600] sm:$0xff]  ;;  %v11788_v4 = vpack.c.bf16 %v8041_v40, %v8031_v58  ;;  %v8015_v58 = vld [vmem:[%s14579_s1 + $0x538] sm:$0xff]  ;;  %v8025_v40 = vld [vmem:[%s14579_s1 + $0x588] sm:$0xff] }
  0x55   : > { %7999 = vmatmul.mubr.msk.f32.gmra.mrb[2].mxu1 %vm364_vm0, %v11723_v23  ;;  %9692 = vmatpush1.bf16.msra.mxu0 %v11712_v11  ;;  %14649 = vst [vmem:[#allocation30_spill] sm:$0xff] %v11757_v61  ;;  %v7932_v11 = vld [vmem:[%s14579_s1 + $0x360] sm:$0xff]  ;;  %14651 = vst [vmem:[#allocation32_spill] sm:$0xff] %v11777_v62 }
  0x56   : > { %9740 = vmatpush1.bf16.msra.mxu1 %v11725_v5  ;;  %1415 = vmatprep.mubr.f32.mxu0 %v14633_v44  ;;  %14650 = vst [vmem:[#allocation31_spill] sm:$0xff] %v11767_v20  ;;  %v8030_v5 = vld [vmem:[%s14579_s1 + $0x5b0] sm:$0xff]  ;;  %14652 = vst [vmem:[#allocation33_spill] sm:$0xff] %v11788_v4 }
  0x57   : > { %1947 = vmatprep.mubr.f32.mxu1 %v14633_v44  ;;  %9702 = vmatprep.subr.bf16.mxu0 %v11735_v33  ;;  %v11799_v33 = vpack.c.bf16 %v7942_v39, %v7932_v11  ;;  %v7966_v11 = vld [vmem:[%s14579_s1 + $0x410] sm:$0xff]  ;;  %v11819_v39 = vpack.c.bf16 %v7967_v52, %v7957_v47  ;;  %v7977_v47 = vld [vmem:[%s14579_s1 + $0x468] sm:$0xff]  ;;  %v7987_v52 = vld [vmem:[%s14579_s1 + $0x4b8] sm:$0xff] }
  0x58   : > { %7948 = vmatmul.mubr.msk.f32.vlgmr.msra.gmra.mrb[4].mxu0 %vm364_vm0, %v11504_v19  ;;  %9758 = vmatprep.subr.bf16.mxu1 %v11746_v29  ;;  %v11809_v29 = vpack.c.bf16 %v8040_v37, %v8030_v5  ;;  %v8014_v5 = vld [vmem:[%s14579_s1 + $0x530] sm:$0xff]  ;;  %v8024_v37 = vld [vmem:[%s14579_s1 + $0x580] sm:$0xff] }
  0x59   : > { %8002 = vmatmul.mubr.msk.f32.vlgmr.msra.gmra.mrb[4].mxu1 %vm364_vm0, %v11678_v56  ;;  %9704 = vmatpush1.bf16.msra.mxu0 %v11757_v61  ;;  %14653 = vst [vmem:[#allocation34_spill] sm:$0xff] %v11799_v33  ;;  %v7956_v61 = vld [vmem:[%s14579_s1 + $0x3c0] sm:$0xff]  ;;  %14655 = vst [vmem:[#allocation36_spill] sm:$0xff] %v11819_v39  ;;  %v11854_v48 = vpack.c.bf16 %v8024_v37, %v8014_v5  ;;  %v8034_v5 = vld [vmem:[%s14579_s1 + $0x5d0] sm:$0xff] }
  0x5a   : > { %9760 = vmatpush1.bf16.msra.mxu1 %v11767_v20  ;;  %1421 = vmatprep.mubr.f32.mxu0 %v14633_v44  ;;  %14654 = vst [vmem:[#allocation35_spill] sm:$0xff] %v11809_v29  ;;  %v11830_v20 = vpack.c.bf16 %v8025_v40, %v8015_v58  ;;  %v8035_v58 = vld [vmem:[%s14579_s1 + $0x5d8] sm:$0xff]  ;;  %v8045_v40 = vld [vmem:[%s14579_s1 + $0x628] sm:$0xff]  ;;  %v8044_v37 = vld [vmem:[%s14579_s1 + $0x620] sm:$0xff] }
  0x5b   : > { %1953 = vmatprep.mubr.f32.mxu1 %v14633_v44  ;;  %9706 = vmatprep.subr.bf16.mxu0 %v11777_v62  ;;  %v11841_v62 = vpack.c.bf16 %v7966_v11, %v7956_v61  ;;  %v7976_v61 = vld [vmem:[%s14579_s1 + $0x460] sm:$0xff]  ;;  %v7986_v11 = vld [vmem:[%s14579_s1 + $0x4b0] sm:$0xff] }
  0x5c   : > { %7949 = vmatmul.mubr.msk.f32.gmra.mrb[6].mxu0 %vm364_vm0, %v11549_v1  ;;  %9762 = vmatprep.subr.bf16.mxu1 %v11788_v4  ;;  %14656 = vst [vmem:[#allocation37_spill] sm:$0xff] %v11830_v20  ;;  %v11852_v4 = vld [vmem:[%s11116_s8 + $0x40] sm:$0xff] }
  0x5d   : > { %8003 = vmatmul.mubr.msk.f32.gmra.mrb[6].mxu1 %vm364_vm0, %v11723_v23  ;;  %9708 = vmatpush1.bf16.msra.mxu0 %v11799_v33  ;;  %v11875_v33 = vpack.c.bf16 %v8045_v40, %v8035_v58  ;;  %v11891_v58 = vld [vmem:[%s11116_s8 + $0x48] sm:$0xff]  ;;  %v11893_v40 = vpack.c.bf16 %v8044_v37, %v8034_v5  ;;  %v7991_v5 = vld [vmem:[%s14579_s1 + $0x4d8] sm:$0xff] }
  0x5e   : > { %9764 = vmatpush1.bf16.msra.mxu1 %v11809_v29  ;;  %1569 = vmatprep.mubr.f32.mxu0 %v14633_v44  ;;  %v11864_v29 = vpack.c.bf16 %v7987_v52, %v7977_v47  ;;  %v7961_v47 = vld [vmem:[%s14579_s1 + $0x3e8] sm:$0xff]  ;;  %v7971_v52 = vld [vmem:[%s14579_s1 + $0x438] sm:$0xff] }
  0x5f   : > { %2248 = vmatprep.mubr.f32.mxu1 %v14633_v44  ;;  %9710 = vmatprep.subr.bf16.mxu0 %v11819_v39  ;;  %14657 = vst [vmem:[#allocation38_spill] sm:$0xff] %v11875_v33  ;;  %v11886_v39 = vpack.c.bf16 %v7986_v11, %v7976_v61  ;;  %14658 = vst [vmem:[#allocation39_spill] sm:$0xff] %v11893_v40  ;;  %v11903_v61 = vpack.c.bf16 %v7971_v52, %v7961_v47  ;;  %v7981_v11 = vld [vmem:[%s14579_s1 + $0x488] sm:$0xff]  ;;  %v7980_v47 = vld [vmem:[%s14579_s1 + $0x480] sm:$0xff] }
  0x60   : > { %7952 = vmatmul.mubr.msk.f32.vlgmr.msra.gmra.mrb[8].mxu0 %vm364_vm0, %v11504_v19  ;;  %9774 = vmatprep.subr.bf16.mxu1 %v11830_v20  ;;  %v7960_v20 = vld [vmem:[%s14579_s1 + $0x3e0] sm:$0xff]  ;;  %v7990_v52 = vld [vmem:[%s14579_s1 + $0x4d0] sm:$0xff] }
  0x61   : > { %8050 = vmatmul.mubr.msk.f32.vlgmr.msra.gmra.mrb[0].mxu1 %vm364_vm0, %v11852_v4  ;;  %9712 = vmatpush1.bf16.msra.mxu0 %v11841_v62  ;;  %v11917_v37 = vpack.c.bf16 %v7970_v15, %v7960_v20  ;;  %v7965_v20 = vld [vmem:[%s14579_s1 + $0x408] sm:$0xff]  ;;  %v7975_v15 = vld [vmem:[%s14579_s1 + $0x458] sm:$0xff] }
  0x62   : > { %9776 = vmatpush1.bf16.msra.mxu1 %v11854_v48  ;;  %1575 = vmatprep.mubr.f32.mxu0 %v14633_v44 }
  0x63   : > { %2254 = vmatprep.mubr.f32.mxu1 %v14633_v44  ;;  %9714 = vmatprep.subr.bf16.mxu0 %v11864_v29 }
  0x64   : > { %7953 = vmatmul.mubr.msk.f32.gmra.mrb[10].mxu0 %vm364_vm0, %v11549_v1  ;;  %9778 = vmatprep.subr.bf16.mxu1 %v11875_v33  ;;  %v11929_v33 = vpack.c.bf16 %v7991_v5, %v7981_v11  ;;  %v11943_v11 = vpack.c.bf16 %v7990_v52, %v7980_v47  ;;  %v7974_v5 = vld [vmem:[%s14579_s1 + $0x450] sm:$0xff]  ;;  %v7995_v47 = vld [vmem:[%s14579_s1 + $0x4f8] sm:$0xff] }
  0x65   : > { %8051 = vmatmul.mubr.msk.f32.gmra.mrb[2].mxu1 %vm364_vm0, %v11891_v58  ;;  %9716 = vmatpush1.bf16.msra.mxu0 %v11886_v39 }
  0x66   : > { %9780 = vmatpush1.bf16.msra.mxu1 %v11893_v40  ;;  %1716 = vmatprep.mubr.f32.mxu0 %v14633_v44  ;;  %v11955_v40 = vpack.c.bf16 %v7975_v15, %v7965_v20  ;;  %v7994_v20 = vld [vmem:[%s14579_s1 + $0x4f0] sm:$0xff] }
  0x67   : > { %2402 = vmatprep.mubr.f32.mxu1 %v14633_v44  ;;  %9726 = vmatprep.subr.bf16.mxu0 %v11903_v61 }
  0x68   : > { %7996 = vmatmul.mubr.msk.f32.vlgmr.msra.gmra.mrb[0].mxu0 %vm364_vm0, %v11678_v56  ;;  %9790 = vmatprep.subr.bf16.mxu1 %v11031_v3  ;;  %v7964_v3 = vld [vmem:[%s14579_s1 + $0x400] sm:$0xff] }
  0x69   : > { %8054 = vmatmul.mubr.msk.f32.vlgmr.msra.gmra.mrb[4].mxu1 %vm364_vm0, %v11852_v4  ;;  %9728 = vmatpush1.bf16.msra.mxu0 %v11917_v37  ;;  %v11969_v52 = vpack.c.bf16 %v7974_v5, %v7964_v3  ;;  %v8019_v3 = vld [vmem:[%s14579_s1 + $0x558] sm:$0xff] }
  0x6a   : > { %9792 = vmatpush1.bf16.msra.mxu1 %v11056_v9  ;;  %1722 = vmatprep.mubr.f32.mxu0 %v14633_v44  ;;  %v7985_v9 = vld [vmem:[%s14579_s1 + $0x4a8] sm:$0xff] }
  0x6b   : > { %2408 = vmatprep.mubr.f32.mxu1 %v14633_v44  ;;  %9730 = vmatprep.subr.bf16.mxu0 %v11929_v33  ;;  %v11981_v15 = vpack.c.bf16 %v7995_v47, %v7985_v9  ;;  %v8018_v9 = vld [vmem:[%s14579_s1 + $0x550] sm:$0xff] }
  0x6c   : > { %7997 = vmatmul.mubr.msk.f32.gmra.mrb[2].mxu0 %vm364_vm0, %v11723_v23  ;;  %9794 = vmatprep.subr.bf16.mxu1 %v11084_v17  ;;  %v7984_v17 = vld [vmem:[%s14579_s1 + $0x4a0] sm:$0xff] }
  0x6d   : > { %8055 = vmatmul.mubr.msk.f32.gmra.mrb[6].mxu1 %vm364_vm0, %v11891_v58  ;;  %9732 = vmatpush1.bf16.msra.mxu0 %v11943_v11  ;;  %v11995_v5 = vpack.c.bf16 %v7994_v20, %v7984_v17  ;;  %v8039_v17 = vld [vmem:[%s14579_s1 + $0x5f8] sm:$0xff] }
  0x6e   : > { %9796 = vmatpush1.bf16.msra.mxu1 %v11098_v22  ;;  %1870 = vmatprep.mubr.f32.mxu0 %v14633_v44  ;;  %v8009_v22 = vld [vmem:[%s14579_s1 + $0x508] sm:$0xff] }
  0x6f   : > { %2718 = vmatprep.mubr.f32.mxu1 %v14633_v44  ;;  %9742 = vmatprep.subr.bf16.mxu0 %v11955_v40  ;;  %v12007_v47 = vpack.c.bf16 %v8019_v3, %v8009_v22  ;;  %v8038_v22 = vld [vmem:[%s14579_s1 + $0x5f0] sm:$0xff] }
  0x70   : > { %8000 = vmatmul.mubr.msk.f32.vlgmr.msra.gmra.mrb[4].mxu0 %vm364_vm0, %v11678_v56  ;;  %9798 = vmatprep.subr.bf16.mxu1 %v11054_v8  ;;  %v8008_v8 = vld [vmem:[%s14579_s1 + $0x500] sm:$0xff] }
  0x71   : > { %8058 = vmatmul.mubr.msk.f32.vlgmr.msra.gmra.mrb[8].mxu1 %vm364_vm0, %v11504_v19  ;;  %9744 = vmatpush1.bf16.msra.mxu0 %v11969_v52  ;;  %v12021_v20 = vpack.c.bf16 %v8018_v9, %v8008_v8  ;;  %v8023_v8 = vld [vmem:[%s14579_s1 + $0x578] sm:$0xff] }
  0x72   : > { %9800 = vmatpush1.bf16.msra.mxu1 %v11071_v13  ;;  %1876 = vmatprep.mubr.f32.mxu0 %v14633_v44  ;;  %v8029_v13 = vld [vmem:[%s14579_s1 + $0x5a8] sm:$0xff] }
  0x73   : > { %2724 = vmatprep.mubr.f32.mxu1 %v14633_v44  ;;  %9746 = vmatprep.subr.bf16.mxu0 %v11981_v15  ;;  %v12033_v3 = vpack.c.bf16 %v8039_v17, %v8029_v13  ;;  %v8022_v13 = vld [vmem:[%s14579_s1 + $0x570] sm:$0xff] }
  0x74   : > { %8001 = vmatmul.mubr.msk.f32.gmra.mrb[6].mxu0 %vm364_vm0, %v11723_v23  ;;  %9802 = vmatprep.subr.bf16.mxu1 %v11086_v18  ;;  %v8028_v18 = vld [vmem:[%s14579_s1 + $0x5a0] sm:$0xff] }
  0x75   : > { %8059 = vmatmul.mubr.msk.f32.gmra.mrb[10].mxu1 %vm364_vm0, %v11549_v1  ;;  %9748 = vmatpush1.bf16.msra.mxu0 %v11995_v5  ;;  %v12047_v9 = vpack.c.bf16 %v8038_v22, %v8028_v18  ;;  %v8043_v18 = vld [vmem:[%s14579_s1 + $0x618] sm:$0xff] }
  0x76   : > { %9804 = vmatpush1.bf16.msra.mxu1 %v11111_v26  ;;  %2024 = vmatprep.mubr.f32.mxu0 %v14633_v44  ;;  %v8013_v26 = vld [vmem:[%s14579_s1 + $0x528] sm:$0xff] }
  0x77   : > { %2795 = vmatprep.mubr.f32.mxu1 %v14633_v44  ;;  %9750 = vmatprep.subr.bf16.mxu0 %v12007_v47  ;;  %v12059_v17 = vpack.c.bf16 %v8023_v8, %v8013_v26  ;;  %v8042_v26 = vld [vmem:[%s14579_s1 + $0x610] sm:$0xff] }
  0x78   : > { %8004 = vmatmul.mubr.msk.f32.vlgmr.msra.gmra.mrb[8].mxu0 %vm364_vm0, %v11678_v56  ;;  %9806 = vmatprep.subr.bf16.mxu1 %v11118_v27  ;;  %v8012_v27 = vld [vmem:[%s14579_s1 + $0x520] sm:$0xff] }
  0x79   : > { %8060 = vmatmul.mubr.msk.f32.vlgmr.msra.gmra.mrb[12].mxu1 %vm364_vm0, %v11504_v19  ;;  %9752 = vmatpush1.bf16.msra.mxu0 %v12021_v20  ;;  %v12073_v22 = vpack.c.bf16 %v8022_v13, %v8012_v27  ;;  %v8027_v27 = vld [vmem:[%s14579_s1 + $0x598] sm:$0xff]  ;;  %v12102_v13 = vld [vmem:[#allocation2] sm:$0xff] }
  0x7a   : > { %9808 = vmatpush1.bf16.msra.mxu1 %v11141_v35  ;;  %2030 = vmatprep.mubr.f32.mxu0 %v14633_v44  ;;  %v8033_v35 = vld [vmem:[%s14579_s1 + $0x5c8] sm:$0xff] }
  0x7b   : > { %2801 = vmatprep.mubr.f32.mxu1 %v14633_v44  ;;  %9754 = vmatprep.subr.bf16.mxu0 %v12033_v3  ;;  %v12085_v8 = vpack.c.bf16 %v8043_v18, %v8033_v35  ;;  %v8026_v35 = vld [vmem:[%s14579_s1 + $0x590] sm:$0xff] }
  0x7c   : > { %8005 = vmatmul.mubr.msk.f32.gmra.mrb[10].mxu0 %vm364_vm0, %v11723_v23  ;;  %9810 = vmatprep.subr.bf16.mxu1 %v11163_v42  ;;  %v8032_v42 = vld [vmem:[%s14579_s1 + $0x5c0] sm:$0xff] }
  0x7d   : > { %8061 = vmatmul.mubr.msk.f32.gmra.mrb[14].mxu1 %vm364_vm0, %v11549_v1  ;;  %9756 = vmatpush1.bf16.msra.mxu0 %v12047_v9 }
  0x7e   : > { %9812 = vmatpush1.bf16.msra.mxu1 %v11193_v51  ;;  %2171 = vmatprep.mubr.f32.mxu0 %v14633_v44  ;;  %v8017_v51 = vld [vmem:[%s14579_s1 + $0x548] sm:$0xff] }
  0x7f   : > { %2872 = vmatprep.mubr.f32.mxu1 %v14633_v44  ;;  %9766 = vmatprep.subr.bf16.mxu0 %v12059_v17  ;;  %v12099_v44 = vpack.c.bf16 %v8042_v26, %v8032_v42  ;;  %v12113_v18 = vpack.c.bf16 %v8027_v27, %v8017_v51  ;;  %v8047_v42 = vld [vmem:[%s14579_s1 + $0x638] sm:$0xff]  ;;  %v8046_v51 = vld [vmem:[%s14579_s1 + $0x630] sm:$0xff] }
  0x80   : > { %8048 = vmatmul.mubr.msk.f32.vlgmr.msra.gmra.mrb[0].mxu0 %vm364_vm0, %v11852_v4  ;;  %9814 = vmatprep.subr.bf16.mxu1 %v11129_v31  ;;  %v8016_v31 = vld [vmem:[%s14579_s1 + $0x540] sm:$0xff] }
  0x81   : > { %8062 = vmatmul.mubr.msk.f32.vlgmr.msra.gmra.mrb[16].mxu1 %vm364_vm0, %v11504_v19  ;;  %9768 = vmatpush1.bf16.msra.mxu0 %v12073_v22  ;;  %v12127_v26 = vpack.c.bf16 %v8026_v35, %v8016_v31 }
  0x82   : > { %9816 = vmatpush1.bf16.msra.mxu1 %v11151_v38  ;;  %2177 = vmatprep.mubr.f32.mxu0 %v12102_v13  ;;  %v8037_v38 = vld [vmem:[%s14579_s1 + $0x5e8] sm:$0xff] }
  0x83   : > { %2878 = vmatprep.mubr.f32.mxu1 %v12102_v13  ;;  %9770 = vmatprep.subr.bf16.mxu0 %v12085_v8  ;;  %v12139_v27 = vpack.c.bf16 %v8047_v42, %v8037_v38 }
  0x84   : > { %8049 = vmatmul.mubr.msk.f32.gmra.mrb[2].mxu0 %vm364_vm0, %v11891_v58  ;;  %9818 = vmatprep.subr.bf16.mxu1 %v11176_v46  ;;  %v8036_v46 = vld [vmem:[%s14579_s1 + $0x5e0] sm:$0xff] }
  0x85   : > { %8063 = vmatmul.mubr.msk.f32.gmra.mrb[18].mxu1 %vm364_vm0, %v11549_v1  ;;  %9772 = vmatpush1.bf16.msra.mxu0 %v12099_v44 }
  0x86   : > { %9820 = vmatpush1.bf16.msra.mxu1 %v11203_v54  ;;  %2325 = vmatprep.mubr.f32.mxu0 %v12102_v13  ;;  %v12147_v54 = vpack.c.bf16 %v8046_v51, %v8036_v46 }
  0x87   : > { %2949 = vmatprep.mubr.f32.mxu1 %v12102_v13  ;;  %9782 = vmatprep.subr.bf16.mxu0 %v12113_v18 }
  0x88   : > { %8052 = vmatmul.mubr.msk.f32.vlgmr.msra.gmra.mrb[4].mxu0 %vm364_vm0, %v11852_v4  ;;  %9822 = vmatprep.subr.bf16.mxu1 %v11213_v57  ;;  %v10861_v57 = vld [vmem:[%s11116_s8 + $0x10] sm:$0xff] }
  0x89   : > { %8064 = vmatmul.mubr.msk.f32.vlgmr.msra.gmra.mrb[20].mxu1 %vm364_vm0, %v11504_v19  ;;  %9784 = vmatpush1.bf16.msra.mxu0 %v12127_v26 }
  0x8a   : > { %9824 = vmatpush1.bf16.msra.mxu1 %v11235_v63  ;;  %2331 = vmatprep.mubr.f32.mxu0 %v12102_v13  ;;  %v14660_v63 = vld [vmem:[#allocation18_spill] sm:$0xff] }
  0x8b   : > { %2955 = vmatprep.mubr.f32.mxu1 %v12102_v13  ;;  %9786 = vmatprep.subr.bf16.mxu0 %v12139_v27 }
  0x8c   : > { %8053 = vmatmul.mubr.msk.f32.gmra.mrb[6].mxu0 %vm364_vm0, %v11891_v58  ;;  %9826 = vmatprep.subr.bf16.mxu1 %v11255_v6  ;;  %v14662_v6 = vld [vmem:[#allocation7_spill] sm:$0xff] }
  0x8d   : > { %8065 = vmatmul.mubr.msk.f32.gmra.mrb[22].mxu1 %vm364_vm0, %v11549_v1  ;;  %9788 = vmatpush1.bf16.msra.mxu0 %v12147_v54 }
  0x8e   : > { %9828 = vmatpush1.bf16.msra.mxu1 %v11277_v16  ;;  %2479 = vmatprep.mubr.f32.mxu0 %v12102_v13  ;;  %v14665_v16 = vld [vmem:[#allocation20_spill] sm:$0xff] }
  0x8f   : > { %3026 = vmatprep.mubr.f32.mxu1 %v12102_v13  ;;  %9830 = vmatprep.subr.bf16.mxu1 %v11297_v25  ;;  %v14667_v25 = vld [vmem:[#allocation24_spill] sm:$0xff] }
  0x90   : > { %8056 = vmatmul.mubr.msk.f32.vlgmr.msra.gmra.mrb[8].mxu0 %vm364_vm0, %v11852_v4 }
  0x91   : > { %8066 = vmatmul.mubr.msk.f32.vlgmr.msra.gmra.mrb[24].mxu1 %vm364_vm0, %v11504_v19  ;;  %2485 = vmatprep.mubr.f32.mxu0 %v12102_v13  ;;  %v14681_v19 = vld [vmem:[#allocation19_spill] sm:$0xff] }
  0x92   : > { %9832 = vmatpush1.bf16.msra.mxu1 %v11319_v36  ;;  %3032 = vmatprep.mubr.f32.mxu1 %v12102_v13  ;;  %v14669_v36 = vld [vmem:[#allocation10_spill] sm:$0xff] }
  0x93   : > { %9834 = vmatprep.subr.bf16.mxu1 %v11342_v45  ;;  %v14671_v45 = vld [vmem:[#allocation12_spill] sm:$0xff] }
  0x94   : > { %8057 = vmatmul.mubr.msk.f32.gmra.mrb[10].mxu0 %vm364_vm0, %v11891_v58 }
  0x95   : > { %8067 = vmatmul.mubr.msk.f32.gmra.mrb[26].mxu1 %vm364_vm0, %v11549_v1  ;;  %v8098_v1 = vld [vmem:[%s11116_s8 + $0x50] sm:$0xff] }
  0x96   : > { %9836 = vmatpush1.bf16.msra.mxu1 %v11364_v55  ;;  %3103 = vmatprep.mubr.f32.mxu1 %v12102_v13  ;;  %v14673_v55 = vld [vmem:[#allocation28_spill] sm:$0xff] }
  0x97   : > { %9838 = vmatprep.subr.bf16.mxu1 %v11224_v60  ;;  %v10862_v60 = vld [vmem:[%s11116_s8 + $0x18] sm:$0xff] }
  0x99   : > { %8068 = vmatmul.mubr.msk.f32.vlgmr.msra.gmra.mrb[8].mxu1 %vm364_vm0, %v10861_v57 }
  0x9a   : > { %9840 = vmatpush1.bf16.msra.mxu1 %v11245_v2  ;;  %3109 = vmatprep.mubr.f32.mxu1 %v12102_v13  ;;  %v14661_v2 = vld [vmem:[#allocation6_spill] sm:$0xff] }
  0x9b   : > { %9842 = vmatprep.subr.bf16.mxu1 %v11266_v12  ;;  %v14664_v12 = vld [vmem:[#allocation9_spill] sm:$0xff] }
  0x9d   : > { %8069 = vmatmul.mubr.msk.f32.gmra.mrb[10].mxu1 %vm364_vm0, %v11191_v50 }
  0x9e   : > { %9844 = vmatpush1.bf16.msra.mxu1 %v11287_v21  ;;  %3180 = vmatprep.mubr.f32.mxu1 %v12102_v13  ;;  %v14666_v21 = vld [vmem:[#allocation22_spill] sm:$0xff] }
  0x9f   : > { %9846 = vmatprep.subr.bf16.mxu1 %v11387_v0  ;;  %v14675_v0 = vld [vmem:[#allocation32_spill] sm:$0xff] }
  0xa1   : > { %8070 = vmatmul.mubr.msk.f32.vlgmr.msra.gmra.mrb[12].mxu1 %vm364_vm0, %v10861_v57 }
  0xa2   : > { %9848 = vmatpush1.bf16.msra.mxu1 %v11409_v14  ;;  %3186 = vmatprep.mubr.f32.mxu1 %v12102_v13  ;;  %v14676_v14 = vld [vmem:[#allocation34_spill] sm:$0xff] }
  0xa3   : > { %9850 = vmatprep.subr.bf16.mxu1 %v11429_v28  ;;  %v14677_v28 = vld [vmem:[#allocation36_spill] sm:$0xff] }
  0xa5   : > { %8071 = vmatmul.mubr.msk.f32.gmra.mrb[14].mxu1 %vm364_vm0, %v11191_v50  ;;  %v14659_v50 = vld [vmem:[#allocation16_spill] sm:$0xff] }
  0xa6   : > { %9852 = vmatpush1.bf16.msra.mxu1 %v11451_v43  ;;  %3257 = vmatprep.mubr.f32.mxu1 %v12102_v13  ;;  %v14678_v43 = vld [vmem:[#allocation14_spill] sm:$0xff] }
  0xa7   : > { %9854 = vmatprep.subr.bf16.mxu1 %v11308_v30  ;;  %v14668_v30 = vld [vmem:[#allocation26_spill] sm:$0xff] }
  0xa9   : > { %8072 = vmatmul.mubr.msk.f32.vlgmr.msra.gmra.mrb[16].mxu1 %vm364_vm0, %v10861_v57 }
  0xaa   : > { %9856 = vmatpush1.bf16.msra.mxu1 %v11332_v41  ;;  %3263 = vmatprep.mubr.f32.mxu1 %v12102_v13  ;;  %v14670_v41 = vld [vmem:[#allocation11_spill] sm:$0xff] }
  0xab   : > { %9858 = vmatprep.subr.bf16.mxu1 %v11353_v49  ;;  %v14672_v49 = vld [vmem:[#allocation13_spill] sm:$0xff] }
  0xad   : > { %8073 = vmatmul.mubr.msk.f32.gmra.mrb[18].mxu1 %vm364_vm0, %v10862_v60 }
  0xae   : > { %9860 = vmatpush1.bf16.msra.mxu1 %v11377_v59  ;;  %3334 = vmatprep.mubr.f32.mxu1 %v12102_v13  ;;  %v14674_v59 = vld [vmem:[#allocation30_spill] sm:$0xff] }
  0xaf   : > { %9862 = vmatprep.subr.bf16.mxu1 %v11471_v34  ;;  %v14679_v34 = vld [vmem:[#allocation15_spill] sm:$0xff] }
  0xb1   : > { %8074 = vmatmul.mubr.msk.f32.vlgmr.msra.gmra.mrb[20].mxu1 %vm364_vm0, %v10861_v57 }
  0xb2   : > { %9864 = vmatpush1.bf16.msra.mxu1 %v11493_v10  ;;  %3340 = vmatprep.mubr.f32.mxu1 %v12102_v13  ;;  %v14680_v10 = vld [vmem:[#allocation17_spill] sm:$0xff] }
  0xb3   : > { %9866 = vmatprep.subr.bf16.mxu1 %v11516_v32  ;;  %v14683_v32 = vld [vmem:[#allocation23_spill] sm:$0xff] }
  0xb5   : > { %8075 = vmatmul.mubr.msk.f32.gmra.mrb[22].mxu1 %vm364_vm0, %v10862_v60 }
  0xb6   : > { %9868 = vmatpush1.bf16.msra.mxu1 %v11538_v53  ;;  %3411 = vmatprep.mubr.f32.mxu1 %v12102_v13  ;;  %v14684_v53 = vld [vmem:[#allocation25_spill] sm:$0xff] }
  0xb7   : > { %9870 = vmatprep.subr.bf16.mxu1 %v11561_v24  ;;  %v14686_v24 = vld [vmem:[#allocation29_spill] sm:$0xff] }
  0xb9   : > { %8076 = vmatmul.mubr.msk.f32.vlgmr.msra.gmra.mrb[24].mxu1 %vm364_vm0, %v10861_v57 }
  0xba   : > { %9872 = vmatpush1.bf16.msra.mxu1 %v11583_v7  ;;  %3417 = vmatprep.mubr.f32.mxu1 %v12102_v13  ;;  %v14663_v7 = vld [vmem:[#allocation8_spill] sm:$0xff] }
  0xbb   : > { %9874 = vmatprep.subr.bf16.mxu1 %v14659_v50 }
  0xbd   : > { %8077 = vmatmul.mubr.msk.f32.gmra.mrb[26].mxu1 %vm364_vm0, %v10862_v60 }
  0xbe   : > { %9876 = vmatpush1.bf16.msra.mxu1 %v14660_v63  ;;  %3488 = vmatprep.mubr.f32.mxu1 %v12102_v13 }
  0xbf   : > { %9878 = vmatprep.subr.bf16.mxu1 %v14661_v2 }
  0xc1   : > { %8078 = vmatmul.mubr.msk.f32.vlgmr.msra.gmra.mrb[8].mxu1 %vm364_vm0, %v11678_v56 }
  0xc2   : > { %9880 = vmatpush1.bf16.msra.mxu1 %v14662_v6  ;;  %3494 = vmatprep.mubr.f32.mxu1 %v12102_v13 }
  0xc3   : > { %9882 = vmatprep.subr.bf16.mxu1 %v14663_v7 }
  0xc5   : > { %8079 = vmatmul.mubr.msk.f32.gmra.mrb[10].mxu1 %vm364_vm0, %v11723_v23 }
  0xc6   : > { %9884 = vmatpush1.bf16.msra.mxu1 %v14664_v12  ;;  %3565 = vmatprep.mubr.f32.mxu1 %v12102_v13 }
  0xc7   : > { %9886 = vmatprep.subr.bf16.mxu1 %v14665_v16 }
  0xc9   : > { %8080 = vmatmul.mubr.msk.f32.vlgmr.msra.gmra.mrb[12].mxu1 %vm364_vm0, %v11678_v56 }
  0xca   : > { %9888 = vmatpush1.bf16.msra.mxu1 %v14666_v21  ;;  %3571 = vmatprep.mubr.f32.mxu1 %v12102_v13 }
  0xcb   : > { %9890 = vmatprep.subr.bf16.mxu1 %v14667_v25 }
  0xcd   : > { %8081 = vmatmul.mubr.msk.f32.gmra.mrb[14].mxu1 %vm364_vm0, %v11723_v23 }
  0xce   : > { %9892 = vmatpush1.bf16.msra.mxu1 %v14668_v30  ;;  %3642 = vmatprep.mubr.f32.mxu1 %v12102_v13 }
  0xcf   : > { %9894 = vmatprep.subr.bf16.mxu1 %v14669_v36 }
  0xd1   : > { %8082 = vmatmul.mubr.msk.f32.vlgmr.msra.gmra.mrb[16].mxu1 %vm364_vm0, %v11678_v56 }
  0xd2   : > { %9896 = vmatpush1.bf16.msra.mxu1 %v14670_v41  ;;  %3648 = vmatprep.mubr.f32.mxu1 %v12102_v13 }
  0xd3   : > { %9898 = vmatprep.subr.bf16.mxu1 %v14671_v45 }
  0xd5   : > { %8083 = vmatmul.mubr.msk.f32.gmra.mrb[18].mxu1 %vm364_vm0, %v11723_v23 }
  0xd6   : > { %9900 = vmatpush1.bf16.msra.mxu1 %v14672_v49  ;;  %3719 = vmatprep.mubr.f32.mxu1 %v12102_v13 }
  0xd7   : > { %9902 = vmatprep.subr.bf16.mxu1 %v14673_v55 }
  0xd9   : > { %8084 = vmatmul.mubr.msk.f32.vlgmr.msra.gmra.mrb[20].mxu1 %vm364_vm0, %v11678_v56 }
  0xda   : > { %9904 = vmatpush1.bf16.msra.mxu1 %v14674_v59  ;;  %3725 = vmatprep.mubr.f32.mxu1 %v12102_v13 }
  0xdb   : > { %9906 = vmatprep.subr.bf16.mxu1 %v14675_v0 }
  0xdd   : > { %8085 = vmatmul.mubr.msk.f32.gmra.mrb[22].mxu1 %vm364_vm0, %v11723_v23 }
  0xde   : > { %9908 = vmatpush1.bf16.msra.mxu1 %v14676_v14  ;;  %3796 = vmatprep.mubr.f32.mxu1 %v12102_v13 }
  0xdf   : > { %9910 = vmatprep.subr.bf16.mxu1 %v14677_v28 }
  0xe1   : > { %8086 = vmatmul.mubr.msk.f32.vlgmr.msra.gmra.mrb[24].mxu1 %vm364_vm0, %v11678_v56  ;;  %v14687_v56 = vld [vmem:[#allocation31_spill] sm:$0xff] }
  0xe2   : > { %9912 = vmatpush1.bf16.msra.mxu1 %v11841_v62  ;;  %3802 = vmatprep.mubr.f32.mxu1 %v12102_v13  ;;  %v14688_v62 = vld [vmem:[#allocation33_spill] sm:$0xff] }
  0xe3   : > { %9914 = vmatprep.subr.bf16.mxu1 %v11864_v29  ;;  %v8099_v29 = vld [vmem:[%s11116_s8 + $0x58] sm:$0xff] }
  0xe5   : > { %8087 = vmatmul.mubr.msk.f32.gmra.mrb[26].mxu1 %vm364_vm0, %v11723_v23  ;;  %v14682_v23 = vld [vmem:[#allocation21_spill] sm:$0xff] }
  0xe6   : > { %9916 = vmatpush1.bf16.msra.mxu1 %v11886_v39  ;;  %3893 = vmatprep.mubr.f32.mxu1 %v12102_v13  ;;  %v14690_v39 = vld [vmem:[#allocation37_spill] sm:$0xff] }
  0xe7   : > { %9918 = vmatprep.subr.bf16.mxu1 %v14678_v43 }
  0xe9   : > { %8088 = vmatmul.mubr.msk.f32.vlgmr.msra.gmra.mrb[8].mxu1 %vm364_vm0, %v11852_v4 }
  0xea   : > { %9920 = vmatpush1.bf16.msra.mxu1 %v14679_v34  ;;  %3899 = vmatprep.mubr.f32.mxu1 %v12102_v13 }
  0xeb   : > { %9922 = vmatprep.subr.bf16.mxu1 %v14680_v10 }
  0xed   : > { %8089 = vmatmul.mubr.msk.f32.gmra.mrb[10].mxu1 %vm364_vm0, %v11891_v58 }
  0xee   : > { %9924 = vmatpush1.bf16.msra.mxu1 %v14681_v19  ;;  %3970 = vmatprep.mubr.f32.mxu1 %v12102_v13 }
  0xef   : > { %9926 = vmatprep.subr.bf16.mxu1 %v11903_v61  ;;  %v2514_v61 = vlaneseq }
  0xf1   : > { %8090 = vmatmul.mubr.msk.f32.vlgmr.msra.gmra.mrb[12].mxu1 %vm364_vm0, %v11852_v4 }
  0xf2   : > { %9928 = vmatpush1.bf16.msra.mxu1 %v11917_v37  ;;  %3976 = vmatprep.mubr.f32.mxu1 %v12102_v13 }
  0xf3   : > { %9930 = vmatprep.subr.bf16.mxu1 %v11929_v33  ;;  %v14685_v33 = vld [vmem:[#allocation27_spill] sm:$0xff] }
  0xf5   : > { %8091 = vmatmul.mubr.msk.f32.gmra.mrb[14].mxu1 %vm364_vm0, %v11891_v58 }
  0xf6   : > { %9932 = vmatpush1.bf16.msra.mxu1 %v11943_v11  ;;  %4047 = vmatprep.mubr.f32.mxu1 %v12102_v13  ;;  %v12363_v11 = vld [vmem:[%s14580_s2] sm:$0xff] }
  0xf7   : > { %9934 = vmatprep.subr.bf16.mxu1 %v14682_v23 }
  0xf9   : > { %8092 = vmatmul.mubr.msk.f32.vlgmr.msra.gmra.mrb[16].mxu1 %vm364_vm0, %v11852_v4 }
  0xfa   : > { %9936 = vmatpush1.bf16.msra.mxu1 %v14683_v32  ;;  %4053 = vmatprep.mubr.f32.mxu1 %v12102_v13 }
  0xfb   : > { %9938 = vmatprep.subr.bf16.mxu1 %v14684_v53 }
  0xfd   : > { %8093 = vmatmul.mubr.msk.f32.gmra.mrb[18].mxu1 %vm364_vm0, %v11891_v58 }
  0xfe   : > { %9940 = vmatpush1.bf16.msra.mxu1 %v14685_v33  ;;  %4124 = vmatprep.mubr.f32.mxu1 %v12102_v13 }
  0xff   : > { %9942 = vmatprep.subr.bf16.mxu1 %v11955_v40  ;;  %v14692_v40 = vld [vmem:[#allocation39_spill] sm:$0xff] }
 0x101   : > { %8094 = vmatmul.mubr.msk.f32.vlgmr.msra.gmra.mrb[20].mxu1 %vm364_vm0, %v11852_v4 }
 0x102   : > { %9944 = vmatpush1.bf16.msra.mxu1 %v11969_v52  ;;  %4130 = vmatprep.mubr.f32.mxu1 %v12102_v13 }
 0x103   : > { %9946 = vmatprep.subr.bf16.mxu1 %v11981_v15 }
 0x105   : > { %8095 = vmatmul.mubr.msk.f32.gmra.mrb[22].mxu1 %vm364_vm0, %v11891_v58 }
 0x106   : > { %9948 = vmatpush1.bf16.msra.mxu1 %v11995_v5  ;;  %4201 = vmatprep.mubr.f32.mxu1 %v12102_v13 }
 0x107   : > { %9950 = vmatprep.subr.bf16.mxu1 %v12007_v47 }
 0x109   : > { %8096 = vmatmul.mubr.msk.f32.vlgmr.msra.gmra.mrb[24].mxu1 %vm364_vm0, %v11852_v4  ;;  %v14689_v4 = vld [vmem:[#allocation35_spill] sm:$0xff] }
 0x10a   : > { %9952 = vmatpush1.bf16.msra.mxu1 %v12021_v20  ;;  %4207 = vmatprep.mubr.f32.mxu1 %v12102_v13 }
 0x10b   : > { %9954 = vmatprep.subr.bf16.mxu1 %v12033_v3 }
 0x10d   : > { %8097 = vmatmul.mubr.msk.f32.gmra.mrb[26].mxu1 %vm364_vm0, %v11891_v58  ;;  %v14691_v58 = vld [vmem:[#allocation38_spill] sm:$0xff] }
 0x10e   : > { %9956 = vmatpush1.bf16.msra.mxu1 %v12047_v9  ;;  %4307 = vmatprep.mubr.f32.mxu1 %v12102_v13 }
 0x10f   : > { %9958 = vmatprep.subr.bf16.mxu1 %v14686_v24 }
 0x111   : > { %8100 = vmatmul.mubr.msk.f32.vlgmr.msra.gmra.mrb[8].mxu1 %vm364_vm0, %v8098_v1 }
 0x112   : > { %9960 = vmatpush1.bf16.msra.mxu1 %v14687_v56  ;;  %4313 = vmatprep.mubr.f32.mxu1 %v12102_v13 }
 0x113   : > { %9962 = vmatprep.subr.bf16.mxu1 %v14688_v62 }
 0x115   : > { %8101 = vmatmul.mubr.msk.f32.gmra.mrb[10].mxu1 %vm364_vm0, %v8099_v29 }
 0x116   : > { %9964 = vmatpush1.bf16.msra.mxu1 %v14689_v4  ;;  %4384 = vmatprep.mubr.f32.mxu1 %v12102_v13 }
 0x117   : > { %9966 = vmatprep.subr.bf16.mxu1 %v12059_v17 }
 0x119   : > { %8102 = vmatmul.mubr.msk.f32.vlgmr.msra.gmra.mrb[12].mxu1 %vm364_vm0, %v8098_v1 }
 0x11a   : > { %9968 = vmatpush1.bf16.msra.mxu1 %v12073_v22  ;;  %4390 = vmatprep.mubr.f32.mxu1 %v12102_v13 }
 0x11b   : > { %9970 = vmatprep.subr.bf16.mxu1 %v12085_v8 }
 0x11d   : > { %8103 = vmatmul.mubr.msk.f32.gmra.mrb[14].mxu1 %vm364_vm0, %v8099_v29 }
 0x11e   : > { %9972 = vmatpush1.bf16.msra.mxu1 %v12099_v44  ;;  %4461 = vmatprep.mubr.f32.mxu1 %v12102_v13 }
 0x11f   : > { %9974 = vmatprep.subr.bf16.mxu1 %v14690_v39 }
 0x121   : > { %8104 = vmatmul.mubr.msk.f32.vlgmr.msra.gmra.mrb[16].mxu1 %vm364_vm0, %v8098_v1 }
 0x122   : > { %9976 = vmatpush1.bf16.msra.mxu1 %v11854_v48  ;;  %4467 = vmatprep.mubr.f32.mxu1 %v12102_v13  ;;  %v12355_v48 = vshrl.u32 %v2514_v61, 7  ;;  %v277_v61 = vld [vmem:[%s14580_s2 + $0x8] sm:$0x3] }
 0x123   : > { %9978 = vmatprep.subr.bf16.mxu1 %v14691_v58 }
 0x124   : > { %v2524_v37 = vsub.s32 2, %v12355_v48  ;;  %v2544_v47 = vsub.s32 7, %v12355_v48  ;;  %v2540_v63 = vsub.s32 6, %v12355_v48  ;;  %v2520_v6 = vsub.s32 1, %v12355_v48 }
 0x125   : > { %8105 = vmatmul.mubr.msk.f32.gmra.mrb[18].mxu1 %vm364_vm0, %v8099_v29  ;;  %v2516_v7 = vsub.s32 0, %v12355_v48  ;;  %v2528_v30 = vsub.s32 3, %v12355_v48  ;;  %v2536_v41 = vsub.s32 5, %v12355_v48  ;;  %v2532_v28 = vsub.s32 4, %v12355_v48 }
 0x126   : > { %9980 = vmatpush1.bf16.msra.mxu1 %v14692_v40  ;;  %4538 = vmatprep.mubr.f32.mxu1 %v12102_v13  ;;  %v12369_v5 = vrot.slane %v12363_v11, %v2524_v37  ;;  %v12376_v17 = vrot.slane %v12363_v11, %v2544_v47  ;;  %v12395_v2 = vrot.slane %v12363_v11, %v2540_v63 }
 0x127   : > { %9982 = vmatprep.subr.bf16.mxu1 %v12113_v18  ;;  %v12401_v16 = vrot.slane %v12363_v11, %v2520_v6  ;;  %v12404_v21 = vrot.slane %v12363_v11, %v2516_v7  ;;  %v12413_v43 = vrot.slane %v12363_v11, %v2528_v30  ;;  %v12416_v10 = vrot.slane %v12363_v11, %v2536_v41 }
 0x128   : > { %v12427_v62 = vrot.slane %v12363_v11, %v2532_v28 }
 0x129   : > { %8106 = vmatmul.mubr.msk.f32.vlgmr.msra.gmra.mrb[20].mxu1 %vm364_vm0, %v8098_v1 }
 0x12a   : > { %9984 = vmatpush1.bf16.msra.mxu1 %v12127_v26  ;;  %4544 = vmatprep.mubr.f32.mxu1 %v12102_v13 }
 0x12b   : > { %9986 = vmatprep.subr.bf16.mxu1 %v12139_v27 }
 0x12d   : > { %8107 = vmatmul.mubr.msk.f32.gmra.mrb[22].mxu1 %vm364_vm0, %v8099_v29 }
 0x12e   : > { %9988 = vmatpush1.bf16.msra.mxu1 %v12147_v54  ;;  %4615 = vmatprep.mubr.f32.mxu1 %v12102_v13 }
 0x131   : > { %8108 = vmatmul.mubr.msk.f32.vlgmr.msra.gmra.mrb[24].mxu1 %vm364_vm0, %v8098_v1 }
 0x132   : > { %4621 = vmatprep.mubr.f32.mxu1 %v12102_v13 }
 0x134   : > { %v2250_v52 = vpop.f32.mrb[0].mxu1 }
 0x135   : > { %v12365_v15 = vpop.f32.mrb[1].mxu1  ;;  %8109 = vmatmul.mubr.msk.f32.gmra.mrb[26].mxu1 %vm364_vm0, %v8099_v29  ;;  %v2566_v9 = vadd.f32 %v12369_v5, %v2250_v52 }
 0x136   : > { %v2567_v48 = vadd.f32 %v12413_v43, %v12365_v15  ;;  %v12449_v15 = vrot.slane %v277_v61, %v2520_v6 }
 0x137   : > { %v2606_v44 = vmul.f32 0.01, %v2566_v9  ;;  %vm2586_vm1 = vcmp.ge.f32.partialorder %v2566_v9, 0.0 }
 0x138   : > { %v2256_v20 = vpop.f32.mrb[2].mxu1  ;;  %vm2587_vm12 = vcmp.ge.f32.partialorder %v2567_v48, 0.0 }
 0x139   : > { %v12372_v3 = vpop.f32.mrb[3].mxu1  ;;  %v2576_v13 = vadd.f32 %v12369_v5, %v2256_v20  ;;  %v12380_v42 = vsel %vm2586_vm1, %v2566_v9, %v2606_v44 }
 0x13a   : > { %v2577_v63 = vadd.f32 %v12413_v43, %v12372_v3 }
 0x13b   : > { %v2616_v26 = vmul.f32 0.01, %v2576_v13  ;;  %vm2596_vm3 = vcmp.ge.f32.partialorder %v2576_v13, 0.0 }
 0x13c   : > { %v2404_v22 = vpop.f32.mrb[4].mxu1 }
 0x13d   : > { %v2406_v8 = vpop.f32.mrb[5].mxu1  ;;  %v12387_v57 = vsel %vm2596_vm3, %v2576_v13, %v2616_v26  ;;  %v2570_v12 = vadd.f32 %v12395_v2, %v2404_v22 }
 0x13e   : > { %v2571_v31 = vadd.f32 %v12376_v17, %v2406_v8  ;;  %v12444_v8 = vrot.slane %v277_v61, %v2516_v7 }
 0x13f   : > { %v2610_v45 = vmul.f32 0.01, %v2570_v12  ;;  %vm2590_vm5 = vcmp.ge.f32.partialorder %v2570_v12, 0.0 }
 0x140   : > { %vm2591_vm2 = vcmp.ge.f32.partialorder %v2571_v31, 0.0  ;;  %v2611_v35 = vmul.f32 0.01, %v2571_v31  ;;  %v2410_v18 = vpop.f32.mrb[6].mxu1 }
 0x141   : > { %v2412_v38 = vpop.f32.mrb[7].mxu1  ;;  %v2580_v49 = vadd.f32 %v12395_v2, %v2410_v18  ;;  %v12418_v19 = vsel %vm2590_vm5, %v2570_v12, %v2610_v45 }
 0x142   : > { %v12382_v46 = vsel %vm2591_vm2, %v2571_v31, %v2611_v35  ;;  %v2581_v51 = vadd.f32 %v12376_v17, %v2412_v38  ;;  %v2607_v31 = vmul.f32 0.01, %v2567_v48  ;;  %vm2597_vm2 = vcmp.ge.f32.partialorder %v2577_v63, 0.0 }
 0x143   : > { %v2646_v27 = vmax.f32 %v12380_v42, %v12382_v46  ;;  %v2620_v23 = vmul.f32 0.01, %v2580_v49  ;;  %vm2600_vm7 = vcmp.ge.f32.partialorder %v2580_v49, 0.0 }
 0x144   : > { %vm2601_vm4 = vcmp.ge.f32.partialorder %v2581_v51, 0.0  ;;  %v2621_v54 = vmul.f32 0.01, %v2581_v51  ;;  %v12462_v30 = vsel %vm2587_vm12, %v2567_v48, %v2607_v31  ;;  %v8110_v31 = vld [vmem:[%s14581_s3 + $0x280] sm:$0xff]  ;;  %vm4773_vm12 = vcmask 1041408  }
 0x145   : > { %v12429_v39 = vsel %vm2600_vm7, %v2580_v49, %v2620_v23 }
 0x146   : > { %v12389_v60 = vsel %vm2601_vm4, %v2581_v51, %v2621_v54 }
 0x153   : > { %v2173_v25 = vpop.f32.mrb[0].mxu0 }
 0x154   : > { %v2175_v36 = vpop.f32.mrb[1].mxu0  ;;  %v2564_v59 = vadd.f32 %v12404_v21, %v2173_v25 }
 0x155   : > { %v2565_v55 = vadd.f32 %v12401_v16, %v2175_v36 }
 0x156   : > { %v2604_v33 = vmul.f32 0.01, %v2564_v59  ;;  %vm2584_vm8 = vcmp.ge.f32.partialorder %v2564_v59, 0.0 }
 0x157   : > { %vm2585_vm6 = vcmp.ge.f32.partialorder %v2565_v55, 0.0  ;;  %v2605_v0 = vmul.f32 0.01, %v2565_v55  ;;  %v2179_v14 = vpop.f32.mrb[2].mxu0 }
 0x158   : > { %v2181_v34 = vpop.f32.mrb[3].mxu0  ;;  %v2574_v24 = vadd.f32 %v12404_v21, %v2179_v14  ;;  %v12439_v37 = vsel %vm2584_vm8, %v2564_v59, %v2604_v33  ;;  %v2617_v59 = vmul.f32 0.01, %v2577_v63 }
 0x159   : > { %v12420_v32 = vsel %vm2585_vm6, %v2565_v55, %v2605_v0  ;;  %v2575_v53 = vadd.f32 %v12401_v16, %v2181_v34 }
 0x15a   : > { %v2645_v1 = vmax.f32 %v12420_v32, %v12418_v19  ;;  %v2614_v52 = vmul.f32 0.01, %v2574_v24  ;;  %vm2594_vm10 = vcmp.ge.f32.partialorder %v2574_v24, 0.0 }
 0x15b   : > { %vm2595_vm9 = vcmp.ge.f32.partialorder %v2575_v53, 0.0  ;;  %v2615_v56 = vmul.f32 0.01, %v2575_v53  ;;  %v2327_v29 = vpop.f32.mrb[4].mxu0 }
 0x15c   : > { %v2329_v4 = vpop.f32.mrb[5].mxu0  ;;  %v2568_v47 = vadd.f32 %v12427_v62, %v2327_v29  ;;  %v12451_v35 = vsel %vm2594_vm10, %v2574_v24, %v2614_v52 }
 0x15d   : > { %v12431_v58 = vsel %vm2595_vm9, %v2575_v53, %v2615_v56  ;;  %v2569_v40 = vadd.f32 %v12416_v10, %v2329_v4  ;;  %v12480_v4 = vsel %vm2597_vm2, %v2577_v63, %v2617_v59  ;;  %v8191_v63 = vld [vmem:[%s14581_s3 + $0x508] sm:$0xff]  ;;  %v8113_v59 = vld [vmem:[%s14581_s3 + $0x298] sm:$0xff] }
 0x15e   : > { %v2650_v11 = vmax.f32 %v12431_v58, %v12429_v39  ;;  %v2608_v38 = vmul.f32 0.01, %v2568_v47  ;;  %vm2588_vm14 = vcmp.ge.f32.partialorder %v2568_v47, 0.0 }
 0x15f   : > { %vm2589_vm11 = vcmp.ge.f32.partialorder %v2569_v40, 0.0  ;;  %v2609_v20 = vmul.f32 0.01, %v2569_v40  ;;  %v2333_v9 = vpop.f32.mrb[6].mxu0 }
 0x160   : > { %v2335_v22 = vpop.f32.mrb[7].mxu0  ;;  %v2578_v26 = vadd.f32 %v12427_v62, %v2333_v9  ;;  %v12466_v45 = vsel %vm2588_vm14, %v2568_v47, %v2608_v38  ;;  %v8126_v47 = vld [vmem:[%s14581_s3 + $0x300] sm:$0xff]  ;;  %v8111_v38 = vld [vmem:[%s14581_s3 + $0x288] sm:$0xff] }
 0x161   : > { %v12446_v44 = vsel %vm2589_vm11, %v2569_v40, %v2609_v20  ;;  %v2579_v13 = vadd.f32 %v12416_v10, %v2335_v22  ;;  %v8127_v20 = vld [vmem:[%s14581_s3 + $0x308] sm:$0xff]  ;;  %v8206_v9 = vld [vmem:[%s14581_s3 + $0x580] sm:$0xff] }
 0x162   : > { %v2644_v18 = vmax.f32 %v12439_v37, %v12446_v44  ;;  %v2618_v49 = vmul.f32 0.01, %v2578_v26  ;;  %vm2598_vm1 = vcmp.ge.f32.partialorder %v2578_v26, 0.0  ;;  %v9989_v22 = vpack.c.bf16 %v8127_v20, %v8126_v47  ;;  %v8130_v47 = vld [vmem:[%s14581_s3 + $0x320] sm:$0xff]  ;;  %v8131_v20 = vld [vmem:[%s14581_s3 + $0x328] sm:$0xff] }
 0x163   : > { %vm2599_vm13 = vcmp.ge.f32.partialorder %v2579_v13, 0.0  ;;  %v2619_v51 = vmul.f32 0.01, %v2579_v13  ;;  %v2481_v54 = vpop.f32.mrb[8].mxu0 }
 0x164   : > { %v2572_v6 = vadd.f32 %v12444_v8, %v2481_v54  ;;  %v2483_v7 = vpop.f32.mrb[9].mxu0  ;;  %v12478_v56 = vsel %vm2598_vm1, %v2578_v26, %v2618_v49  ;;  %v8190_v54 = vld [vmem:[%s14581_s3 + $0x500] sm:$0xff]  ;;  %9990 = vmatprep.subr.bf16.mxu0 %v9989_v22  ;;  %v9997_v22 = vpack.c.bf16 %v8131_v20, %v8130_v47  ;;  %v8135_v20 = vld [vmem:[%s14581_s3 + $0x348] sm:$0xff] }
 0x165   : > { %v12459_v12 = vsel %vm2599_vm13, %v2579_v13, %v2619_v51  ;;  %v2573_v25 = vadd.f32 %v12449_v15, %v2483_v7  ;;  %v8207_v13 = vld [vmem:[%s14581_s3 + $0x588] sm:$0xff]  ;;  %v9991_v51 = vpack.c.bf16 %v8111_v38, %v8110_v31  ;;  %v8128_v7 = vld [vmem:[%s14581_s3 + $0x310] sm:$0xff]  ;;  %v8114_v31 = vld [vmem:[%s14581_s3 + $0x2a0] sm:$0xff] }
 0x166   : > { %v2649_v36 = vmax.f32 %v12451_v35, %v12459_v12  ;;  %vm2592_vm15 = vcmp.ge.f32.partialorder %v2572_v6, 0.0  ;;  %v2612_v41 = vmul.f32 0.01, %v2572_v6  ;;  %v10181_v26 = vpack.c.bf16 %v8207_v13, %v8206_v9  ;;  %v8210_v9 = vld [vmem:[%s14581_s3 + $0x5a0] sm:$0xff]  ;;  %v8211_v13 = vld [vmem:[%s14581_s3 + $0x5a8] sm:$0xff] }
 0x167   : > { %vm2593_vm0 = vcmp.ge.f32.partialorder %v2573_v25, 0.0  ;;  %v2613_v3 = vmul.f32 0.01, %v2573_v25  ;;  %v2487_v55 = vpop.f32.mrb[10].mxu0  ;;  %9992 = vmatpush3.bf16.msra.mxu0 %v9991_v51  ;;  %v8115_v38 = vld [vmem:[%s14581_s3 + $0x2a8] sm:$0xff]  ;;  %v8134_v47 = vld [vmem:[%s14581_s3 + $0x340] sm:$0xff] }
 0x168   : > { %v12468_v0 = vsel %vm2592_vm15, %v2572_v6, %v2612_v41  ;;  %v2582_v14 = vadd.f32 %v12444_v8, %v2487_v55  ;;  %v2489_v28 = vpop.f32.mrb[11].mxu0  ;;  %v10183_v6 = vpack.c.bf16 %v8191_v63, %v8190_v54  ;;  %10182 = vmatprep.subr.bf16.mxu1 %v10181_v26  ;;  %v8208_v41 = vld [vmem:[%s14581_s3 + $0x590] sm:$0xff]  ;;  %v10189_v26 = vpack.c.bf16 %v8211_v13, %v8210_v9  ;;  %v8194_v54 = vld [vmem:[%s14581_s3 + $0x520] sm:$0xff]  ;;  %v8195_v63 = vld [vmem:[%s14581_s3 + $0x528] sm:$0xff] }
 0x169   : > { %v12473_v23 = vsel %vm2593_vm0, %v2573_v25, %v2613_v3  ;;  %v2583_v53 = vadd.f32 %v12449_v15, %v2489_v28  ;;  %v8129_v25 = vld [vmem:[%s14581_s3 + $0x318] sm:$0xff]  ;;  %v8112_v55 = vld [vmem:[%s14581_s3 + $0x290] sm:$0xff]  ;;  %v9999_v51 = vpack.c.bf16 %v8115_v38, %v8114_v31  ;;  %v8214_v9 = vld [vmem:[%s14581_s3 + $0x5c0] sm:$0xff] }
 0x16a   : > { %vm2602_vm3 = vcmp.ge.f32.partialorder %v2582_v14, 0.0  ;;  %v2622_v24 = vmul.f32 0.01, %v2582_v14  ;;  %10184 = vmatpush3.bf16.msra.mxu1 %v10183_v6  ;;  %v9993_v49 = vpack.c.bf16 %v8129_v25, %v8128_v7  ;;  %v8209_v3 = vld [vmem:[%s14581_s3 + $0x598] sm:$0xff]  ;;  %v9995_v28 = vpack.c.bf16 %v8113_v59, %v8112_v55  ;;  %v8132_v7 = vld [vmem:[%s14581_s3 + $0x330] sm:$0xff]  ;;  %v8215_v13 = vld [vmem:[%s14581_s3 + $0x5c8] sm:$0xff] }
 0x16b   : > { %vm2603_vm4 = vcmp.ge.f32.partialorder %v2583_v53, 0.0  ;;  %v2623_v29 = vmul.f32 0.01, %v2583_v53  ;;  %v10191_v6 = vpack.c.bf16 %v8195_v63, %v8194_v54  ;;  %v8133_v25 = vld [vmem:[%s14581_s3 + $0x338] sm:$0xff]  ;;  %v8116_v55 = vld [vmem:[%s14581_s3 + $0x2b0] sm:$0xff]  ;;  %v8118_v31 = vld [vmem:[%s14581_s3 + $0x2c0] sm:$0xff] }
 0x16c   : > { %v12482_v40 = vsel %vm2602_vm3, %v2582_v14, %v2622_v24  ;;  %v10185_v14 = vpack.c.bf16 %v8209_v3, %v8208_v41  ;;  %v8193_v24 = vld [vmem:[%s14581_s3 + $0x518] sm:$0xff]  ;;  %9994 = vmatprep.subr.bf16.mxu0 %v9993_v49  ;;  %v8212_v41 = vld [vmem:[%s14581_s3 + $0x5b0] sm:$0xff]  ;;  %v10001_v49 = vpack.c.bf16 %v8133_v25, %v8132_v7  ;;  %v8119_v38 = vld [vmem:[%s14581_s3 + $0x2c8] sm:$0xff] }
 0x16d   : > { %v12486_v48 = vsel %vm2603_vm4, %v2583_v53, %v2623_v29  ;;  %v8192_v53 = vld [vmem:[%s14581_s3 + $0x510] sm:$0xff]  ;;  %9996 = vmatpush3.bf16.msra.mxu0 %v9995_v28  ;;  %v8213_v3 = vld [vmem:[%s14581_s3 + $0x5b8] sm:$0xff]  ;;  %v8198_v54 = vld [vmem:[%s14581_s3 + $0x540] sm:$0xff] }
 0x16e   : > { %v10187_v29 = vpack.c.bf16 %v8193_v24, %v8192_v53  ;;  %10186 = vmatprep.subr.bf16.mxu1 %v10185_v14  ;;  %9998 = vmatprep.subr.bf16.mxu0 %v9997_v22  ;;  %v8117_v59 = vld [vmem:[%s14581_s3 + $0x2b8] sm:$0xff]  ;;  %v10193_v14 = vpack.c.bf16 %v8213_v3, %v8212_v41  ;;  %v8196_v53 = vld [vmem:[%s14581_s3 + $0x530] sm:$0xff]  ;;  %v10005_v22 = vpack.c.bf16 %v8135_v20, %v8134_v47  ;;  %v8199_v63 = vld [vmem:[%s14581_s3 + $0x548] sm:$0xff] }
 0x16f   : > { %v10003_v28 = vpack.c.bf16 %v8117_v59, %v8116_v55  ;;  %v8197_v24 = vld [vmem:[%s14581_s3 + $0x538] sm:$0xff]  ;;  %v8136_v7 = vld [vmem:[%s14581_s3 + $0x350] sm:$0xff]  ;;  %v8138_v47 = vld [vmem:[%s14581_s3 + $0x360] sm:$0xff] }
 0x170   : > { %10188 = vmatpush3.bf16.msra.mxu1 %v10187_v29  ;;  %v10195_v29 = vpack.c.bf16 %v8197_v24, %v8196_v53  ;;  %v8137_v25 = vld [vmem:[%s14581_s3 + $0x358] sm:$0xff]  ;;  %v8216_v41 = vld [vmem:[%s14581_s3 + $0x5d0] sm:$0xff]  ;;  %v8139_v20 = vld [vmem:[%s14581_s3 + $0x368] sm:$0xff] }
 0x171   : > { %10190 = vmatprep.subr.bf16.mxu1 %v10189_v26  ;;  %10000 = vmatpush3.bf16.msra.mxu0 %v9999_v51  ;;  %v10197_v26 = vpack.c.bf16 %v8215_v13, %v8214_v9  ;;  %v10007_v51 = vpack.c.bf16 %v8119_v38, %v8118_v31  ;;  %v8217_v3 = vld [vmem:[%s14581_s3 + $0x5d8] sm:$0xff]  ;;  %v8120_v55 = vld [vmem:[%s14581_s3 + $0x2d0] sm:$0xff]  ;;  %v8218_v9 = vld [vmem:[%s14581_s3 + $0x5e0] sm:$0xff] }
 0x172   : > { %10002 = vmatprep.subr.bf16.mxu0 %v10001_v49  ;;  %v10009_v49 = vpack.c.bf16 %v8137_v25, %v8136_v7  ;;  %v8121_v59 = vld [vmem:[%s14581_s3 + $0x2d8] sm:$0xff]  ;;  %v8200_v53 = vld [vmem:[%s14581_s3 + $0x550] sm:$0xff]  ;;  %v8219_v13 = vld [vmem:[%s14581_s3 + $0x5e8] sm:$0xff] }
 0x173   : > { %v8201_v24 = vld [vmem:[%s14581_s3 + $0x558] sm:$0xff]  ;;  %v8122_v31 = vld [vmem:[%s14581_s3 + $0x2e0] sm:$0xff]  ;;  %v8123_v38 = vld [vmem:[%s14581_s3 + $0x2e8] sm:$0xff] }
 0x174   : > { %10192 = vmatpush3.bf16.msra.mxu1 %v10191_v6  ;;  %v10199_v6 = vpack.c.bf16 %v8199_v63, %v8198_v54  ;;  %v8202_v54 = vld [vmem:[%s14581_s3 + $0x560] sm:$0xff]  ;;  %v8203_v63 = vld [vmem:[%s14581_s3 + $0x568] sm:$0xff]  ;;  %v8140_v7 = vld [vmem:[%s14581_s3 + $0x370] sm:$0xff] }
 0x175   : > { %10194 = vmatprep.subr.bf16.mxu1 %v10193_v14  ;;  %10004 = vmatpush3.bf16.msra.mxu0 %v10003_v28  ;;  %v10201_v14 = vpack.c.bf16 %v8217_v3, %v8216_v41  ;;  %v10011_v28 = vpack.c.bf16 %v8121_v59, %v8120_v55  ;;  %v8141_v25 = vld [vmem:[%s14581_s3 + $0x378] sm:$0xff]  ;;  %v8220_v41 = vld [vmem:[%s14581_s3 + $0x5f0] sm:$0xff] }
 0x176   : > { %10006 = vmatprep.subr.bf16.mxu0 %v10005_v22  ;;  %v10013_v22 = vpack.c.bf16 %v8139_v20, %v8138_v47  ;;  %v8221_v3 = vld [vmem:[%s14581_s3 + $0x5f8] sm:$0xff]  ;;  %v8124_v55 = vld [vmem:[%s14581_s3 + $0x2f0] sm:$0xff]  ;;  %v8158_v47 = vld [vmem:[%s14581_s3 + $0x400] sm:$0xff] }
 0x177   : > { %v8125_v59 = vld [vmem:[%s14581_s3 + $0x2f8] sm:$0xff]  ;;  %v8159_v20 = vld [vmem:[%s14581_s3 + $0x408] sm:$0xff] }
 0x178   : > { %10196 = vmatpush3.bf16.msra.mxu1 %v10195_v29  ;;  %v10203_v29 = vpack.c.bf16 %v8201_v24, %v8200_v53  ;;  %v8204_v53 = vld [vmem:[%s14581_s3 + $0x570] sm:$0xff]  ;;  %v8205_v24 = vld [vmem:[%s14581_s3 + $0x578] sm:$0xff] }
 0x179   : > { %10198 = vmatprep.subr.bf16.mxu1 %v10197_v26  ;;  %10008 = vmatpush3.bf16.msra.mxu0 %v10007_v51  ;;  %v10205_v26 = vpack.c.bf16 %v8219_v13, %v8218_v9  ;;  %v10015_v51 = vpack.c.bf16 %v8123_v38, %v8122_v31  ;;  %v10021_v9 = vpack.c.bf16 %v8159_v20, %v8158_v47  ;;  %v8287_v13 = vld [vmem:[%s14581_s3 + $0x808] sm:$0xff] }
 0x17a   : > { %10010 = vmatprep.subr.bf16.mxu0 %v10009_v49  ;;  %v10017_v49 = vpack.c.bf16 %v8141_v25, %v8140_v7 }
 0x17c   : > { %10200 = vmatpush3.bf16.msra.mxu1 %v10199_v6  ;;  %v10207_v6 = vpack.c.bf16 %v8203_v63, %v8202_v54 }
 0x17d   : > { %10202 = vmatprep.subr.bf16.mxu1 %v10201_v14  ;;  %10012 = vmatpush3.bf16.msra.mxu0 %v10011_v28  ;;  %v10209_v14 = vpack.c.bf16 %v8221_v3, %v8220_v41  ;;  %v10019_v28 = vpack.c.bf16 %v8125_v59, %v8124_v55  ;;  %v12695_v41 = vld [vmem:[#allocation2 + $0x50] sm:$0x1] }
 0x17e   : > { %10014 = vmatprep.subr.bf16.mxu0 %v10013_v22  ;;  %v8286_v22 = vld [vmem:[%s14581_s3 + $0x800] sm:$0xff] }
 0x17f   : > { %v10277_v31 = vpack.c.bf16 %v8287_v13, %v8286_v22  ;;  %v12708_v22 = vld [vmem:[#allocation2 + $0x58] sm:$0x3] }
 0x180   : > { %10204 = vmatpush3.bf16.msra.mxu1 %v10203_v29  ;;  %v10211_v29 = vpack.c.bf16 %v8205_v24, %v8204_v53 }
 0x181   : > { %10206 = vmatprep.subr.bf16.mxu1 %v10205_v26  ;;  %10016 = vmatpush3.bf16.msra.mxu0 %v10015_v51 }
 0x182   : > { %10018 = vmatprep.subr.bf16.mxu0 %v10017_v49  ;;  %v12697_v49 = vld [vmem:[#allocation2 + $0x50] sm:$0x3] }
 0x184   : > { %10208 = vmatpush3.bf16.msra.mxu1 %v10207_v6 }
 0x185   : > { %10210 = vmatprep.subr.bf16.mxu1 %v10209_v14  ;;  %10020 = vmatpush3.bf16.msra.mxu0 %v10019_v28  ;;  %v12701_v14 = vld [vmem:[#allocation2 + $0x58] sm:$0x1] }
 0x186   : > { %10022 = vmatprep.subr.bf16.mxu0 %v10021_v9 }
 0x188   : > { %10212 = vmatpush3.bf16.msra.mxu1 %v10211_v29 }
 0x189   : > { %10278 = vmatprep.subr.bf16.mxu1 %v10277_v31 }
 0x1e4   : > { %v4309_v38 = vpop.f32.mrb[8].mxu1 }
 0x1e5   : > { %v4311_v26 = vpop.f32.mrb[9].mxu1  ;;  %v4648_v7 = vadd.f32 %v4309_v38, %v12404_v21 }
 0x1e6   : > { %v4649_v3 = vadd.f32 %v4311_v26, %v12401_v16 }
 0x1e7   : > { %v4688_v47 = vmul.f32 0.01, %v4648_v7  ;;  %vm4668_vm5 = vcmp.ge.f32.partialorder %v4648_v7, 0.0 }
 0x1e8   : > { %v4315_v51 = vpop.f32.mrb[10].mxu1  ;;  %v4689_v13 = vmul.f32 0.01, %v4649_v3  ;;  %vm4669_vm6 = vcmp.ge.f32.partialorder %v4649_v3, 0.0 }
 0x1e9   : > { %v4317_v54 = vpop.f32.mrb[11].mxu1  ;;  %v4658_v55 = vadd.f32 %v4315_v51, %v12404_v21 }
 0x1ea   : > { %v4659_v28 = vadd.f32 %v4317_v54, %v12401_v16  ;;  %v4709_v52 = vsel %vm4669_vm6, %v4649_v3, %v4689_v13 }
 0x1eb   : > { %v4698_v21 = vmul.f32 0.01, %v4658_v55  ;;  %vm4678_vm7 = vcmp.ge.f32.partialorder %v4658_v55, 0.0 }
 0x1ec   : > { %v4386_v63 = vpop.f32.mrb[12].mxu1  ;;  %vm4679_vm8 = vcmp.ge.f32.partialorder %v4659_v28, 0.0  ;;  %v4699_v51 = vmul.f32 0.01, %v4659_v28 }
 0x1ed   : > { %v4388_v6 = vpop.f32.mrb[13].mxu1  ;;  %v4650_v53 = vadd.f32 %v4386_v63, %v12369_v5  ;;  %v4718_v61 = vsel %vm4678_vm7, %v4658_v55, %v4698_v21 }
 0x1ee   : > { %v4651_v31 = vadd.f32 %v4388_v6, %v12413_v43  ;;  %v4708_v6 = vsel %vm4668_vm5, %v4648_v7, %v4688_v47  ;;  %v12718_v63 = vsel %vm4679_vm8, %v4659_v28, %v4699_v51  ;;  %vm5010_vm8 = vcmask 1046528  }
 0x1ef   : > { %v4690_v54 = vmul.f32 0.01, %v4650_v53  ;;  %vm4670_vm9 = vcmp.ge.f32.partialorder %v4650_v53, 0.0 }
 0x1f0   : > { %v4392_v25 = vpop.f32.mrb[14].mxu1  ;;  %v4691_v33 = vmul.f32 0.01, %v4651_v31  ;;  %vm4671_vm11 = vcmp.ge.f32.partialorder %v4651_v31, 0.0 }
 0x1f1   : > { %v4394_v59 = vpop.f32.mrb[15].mxu1  ;;  %v4660_v16 = vadd.f32 %v4392_v25, %v12369_v5 }
 0x1f2   : > { %v4661_v29 = vadd.f32 %v4394_v59, %v12413_v43  ;;  %v4710_v43 = vsel %vm4670_vm9, %v4650_v53, %v4690_v54  ;;  %v12722_v47 = vsel %vm4671_vm11, %v4651_v31, %v4691_v33  ;;  %vm5597_vm9 = vcmask 1045504  }
 0x1f3   : > { %v4700_v5 = vmul.f32 0.01, %v4660_v16  ;;  %vm4680_vm13 = vcmp.ge.f32.partialorder %v4660_v16, 0.0 }
 0x1f4   : > { %v4463_v20 = vpop.f32.mrb[16].mxu1  ;;  %v4701_v50 = vmul.f32 0.01, %v4661_v29  ;;  %vm4681_vm15 = vcmp.ge.f32.partialorder %v4661_v29, 0.0 }
 0x1f5   : > { %v4465_v38 = vpop.f32.mrb[17].mxu1  ;;  %v4652_v7 = vadd.f32 %v4463_v20, %v12427_v62 }
 0x1f6   : > { %v4653_v26 = vadd.f32 %v4465_v38, %v12416_v10  ;;  %v12730_v33 = vsel %vm4681_vm15, %v4661_v29, %v4701_v50 }
 0x1f7   : > { %vm4672_vm1 = vcmp.ge.f32.partialorder %v4652_v7, 0.0  ;;  %v4692_v44 = vmul.f32 0.01, %v4652_v7 }
 0x1f8   : > { %vm4673_vm10 = vcmp.ge.f32.partialorder %v4653_v26, 0.0  ;;  %v4693_v24 = vmul.f32 0.01, %v4653_v26  ;;  %v4469_v9 = vpop.f32.mrb[18].mxu1 }
 0x1f9   : > { %v4471_v34 = vpop.f32.mrb[19].mxu1  ;;  %v4662_v53 = vadd.f32 %v4469_v9, %v12427_v62 }
 0x1fa   : > { %v4713_v25 = vsel %vm4673_vm10, %v4653_v26, %v4693_v24  ;;  %v4663_v38 = vadd.f32 %v4471_v34, %v12416_v10  ;;  %v4720_v24 = vsel %vm4680_vm13, %v4660_v16, %v4700_v5  ;;  %vm6325_vm13 = vcmask 1043456  }
 0x1fb   : > { %v4728_v59 = vmax.f32 %v4708_v6, %v4713_v25  ;;  %vm4682_vm3 = vcmp.ge.f32.partialorder %v4662_v53, 0.0  ;;  %v4702_v25 = vmul.f32 0.01, %v4662_v53 }
 0x1fc   : > { %vm4683_vm14 = vcmp.ge.f32.partialorder %v4663_v38, 0.0  ;;  %v4703_v3 = vmul.f32 0.01, %v4663_v38  ;;  %v4540_v55 = vpop.f32.mrb[20].mxu1 }
 0x1fd   : > { %v4738_v10 = vmax.f32 %v2644_v18, %v4728_v59  ;;  %v4654_v34 = vadd.f32 %v4540_v55, %v12395_v2  ;;  %v4542_v28 = vpop.f32.mrb[21].mxu1 }
 0x1fe   : > { %v4723_v13 = vsel %vm4683_vm14, %v4663_v38, %v4703_v3  ;;  %v4655_v21 = vadd.f32 %v4542_v28, %v12376_v17  ;;  %v4722_v28 = vsel %vm4682_vm3, %v4662_v53, %v4702_v25  ;;  %vm10931_vm14 = vmmov 0  }
 0x1ff   : > { %v4774_v20 = vrot.slane %v4738_v10, 6  ;;  %v4733_v26 = vmax.f32 %v4718_v61, %v4723_v13  ;;  %vm4674_vm0 = vcmp.ge.f32.partialorder %v4654_v34, 0.0  ;;  %v4694_v51 = vmul.f32 0.01, %v4654_v34 }
 0x200   : > { %vm4675_vm2 = vcmp.ge.f32.partialorder %v4655_v21, 0.0  ;;  %v4695_v31 = vmul.f32 0.01, %v4655_v21  ;;  %v4546_v37 = vpop.f32.mrb[22].mxu1 }
 0x201   : > { %4799 = vst [vmem:[#allocation2] sm:$0xfc] %v4774_v20  ;;  %v4743_v18 = vmax.f32 %v2649_v36, %v4733_v26  ;;  %v4714_v62 = vsel %vm4674_vm0, %v4654_v34, %v4694_v51  ;;  %v4664_v9 = vadd.f32 %v4546_v37, %v12395_v2  ;;  %v4548_v16 = vpop.f32.mrb[23].mxu1  ;;  %v4712_v34 = vsel %vm4672_vm1, %v4652_v7, %v4692_v44 }
 0x202   : > { %v4729_v61 = vmax.f32 %v4709_v52, %v4714_v62  ;;  %v4715_v54 = vsel %vm4675_vm2, %v4655_v21, %v4695_v31  ;;  %v4665_v50 = vadd.f32 %v4548_v16, %v12376_v17  ;;  %v8270_v16 = vld [vmem:[%s14581_s3 + $0x780] sm:$0xff]  ;;  %vm6622_vm0 = vcmask 523264  }
 0x203   : > { %v4779_v29 = vrot.slane %v4743_v18, 6  ;;  %v4730_v6 = vmax.f32 %v4710_v43, %v4715_v54  ;;  %vm4684_vm4 = vcmp.ge.f32.partialorder %v4664_v9, 0.0  ;;  %v4704_v5 = vmul.f32 0.01, %v4664_v9 }
 0x204   : > { %v4739_v38 = vmax.f32 %v2645_v1, %v4729_v61  ;;  %vm4685_vm5 = vcmp.ge.f32.partialorder %v4665_v50, 0.0  ;;  %v4705_v35 = vmul.f32 0.01, %v4665_v50  ;;  %v4617_v12 = vpop.f32.mrb[24].mxu1  ;;  %v8271_v61 = vld [vmem:[%s14581_s3 + $0x788] sm:$0xff]  ;;  %vm7765_vm2 = vcmask 73728  }
 0x205   : > { %v12741_v2 = vsel %vm4773_vm12, %v4774_v20, %v4779_v29  ;;  %v4740_v36 = vmax.f32 %v2646_v27, %v4730_v6  ;;  %v4724_v17 = vsel %vm4684_vm4, %v4664_v9, %v4704_v5  ;;  %v4656_v52 = vadd.f32 %v4617_v12, %v12444_v8  ;;  %v4619_v43 = vpop.f32.mrb[25].mxu1  ;;  %v12801_v6 = vld [vmem:[%s14581_s3 + $0x418] sm:$0xff]  ;;  %v12806_v5 = vld [vmem:[%s14581_s3 + $0x810] sm:$0xff] }
 0x206   : > { %4804 = vst [vmem:[#allocation2 + $0x28] sm:$0xff] %v12741_v2  ;;  %v4775_v59 = vrot.slane %v4739_v38, 6  ;;  %v4734_v19 = vmax.f32 %v12718_v63, %v4724_v17  ;;  %v4725_v32 = vsel %vm4685_vm5, %v4665_v50, %v4705_v35  ;;  %v4657_v1 = vadd.f32 %v4619_v43, %v12449_v15 }
 0x207   : > { %v4776_v3 = vrot.slane %v4740_v36, 6  ;;  %v4735_v55 = vmax.f32 %v4720_v24, %v4725_v32  ;;  %vm4676_vm6 = vcmp.ge.f32.partialorder %v4656_v52, 0.0  ;;  %v4696_v10 = vmul.f32 0.01, %v4656_v52  ;;  %v8289_v32 = vld [vmem:[%s14581_s3 + $0x818] sm:$0xff] }
 0x208   : > { %4800 = vst [vmem:[#allocation2 + $0x8] sm:$0xfc] %v4775_v59  ;;  %v4744_v42 = vmax.f32 %v2650_v11, %v4734_v19  ;;  %vm4677_vm7 = vcmp.ge.f32.partialorder %v4657_v1, 0.0  ;;  %v4697_v46 = vmul.f32 0.01, %v4657_v1  ;;  %v4623_v27 = vpop.f32.mrb[26].mxu1  ;;  %v14693_v63 = vmax.f32 %v12387_v57, %v12389_v60 }
 0x209   : > { %4801 = vst [vmem:[#allocation2 + $0x10] sm:$0xfc] %v4776_v3  ;;  %v4716_v24 = vsel %vm4676_vm6, %v4656_v52, %v4696_v10  ;;  %v4666_v21 = vadd.f32 %v4623_v27, %v12444_v8  ;;  %v4625_v20 = vpop.f32.mrb[27].mxu1  ;;  %v4899_v26 = vld [vmem:[#allocation2] sm:$0xfe]  ;;  %v14694_v60 = vmax.f32 %v12462_v30, %v12468_v0  ;;  %v14695_v30 = vmax.f32 %v12466_v45, %v12473_v23  ;;  %v12796_v23 = vld [vmem:[%s14581_s3 + $0x410] sm:$0xff] }
 0x20a   : > { %v4745_v13 = vmax.f32 %v14693_v63, %v4735_v55  ;;  %v4781_v7 = vrot.slane %v4744_v42, 6  ;;  %v4731_v39 = vmax.f32 %v12722_v47, %v4716_v24  ;;  %v4717_v58 = vsel %vm4677_vm7, %v4657_v1, %v4697_v46  ;;  %v12770_v47 = vld [vmem:[%s14581_s3 + $0x380] sm:$0xff]  ;;  %v12820_v1 = vld [vmem:[%s14581_s3 + $0x390] sm:$0xff]  ;;  %v12840_v46 = vld [vmem:[%s14581_s3 + $0x798] sm:$0xff] }
 0x20b   : > { %v4667_v11 = vadd.f32 %v4625_v20, %v12449_v15  ;;  %v4732_v53 = vmax.f32 %v4712_v34, %v4717_v58  ;;  %vm4686_vm10 = vcmp.ge.f32.partialorder %v4666_v21, 0.0  ;;  %v4706_v31 = vmul.f32 0.01, %v4666_v21  ;;  %v12775_v15 = vld [vmem:[%s14581_s3 + $0x388] sm:$0xff]  ;;  %v5496_v9 = vld [vmem:[#allocation2] sm:$0xfc] }
 0x20c   : > { %v4783_v51 = vrot.slane %v4745_v13, 6  ;;  %v12762_v57 = vsel %vm4773_vm12, %v4775_v59, %v4781_v7  ;;  %v4741_v8 = vmax.f32 %v14694_v60, %v4731_v39  ;;  %v5011_v62 = vrot.slane %v4899_v26, 1  ;;  %v12835_v42 = vld [vmem:[%s14581_s3 + $0x790] sm:$0xff]  ;;  %v8162_v39 = vld [vmem:[%s14581_s3 + $0x420] sm:$0xff]  ;;  %v8163_v58 = vld [vmem:[%s14581_s3 + $0x428] sm:$0xff] }
 0x20d   : > { %vm4687_vm11 = vcmp.ge.f32.partialorder %v4667_v11, 0.0  ;;  %v4707_v37 = vmul.f32 0.01, %v4667_v11  ;;  %4805 = vst [vmem:[#allocation2 + $0x30] sm:$0xff] %v12762_v57  ;;  %v4742_v0 = vmax.f32 %v14695_v30, %v4732_v53  ;;  %v4726_v18 = vsel %vm4686_vm10, %v4666_v21, %v4706_v31  ;;  %v12842_v27 = vld [vmem:[#allocation2 + $0x70] sm:$0x1] }
 0x20e   : > { %v12779_v44 = vsel %vm4773_vm12, %v4776_v3, %v4783_v51  ;;  %v4777_v54 = vrot.slane %v4741_v8, 6  ;;  %v4736_v50 = vmax.f32 %v12730_v33, %v4726_v18  ;;  %v5015_v45 = vrot.slane %v12762_v57, 1  ;;  %v12825_v3 = vld [vmem:[%s14581_s3 + $0x398] sm:$0xff]  ;;  %v12872_v31 = vld [vmem:[%s14581_s3 + $0x828] sm:$0xff]  ;;  %v12877_v60 = vld [vmem:[%s14581_s3 + $0x3a0] sm:$0xff] }
 0x20f   : > { %4806 = vst [vmem:[#allocation2 + $0x38] sm:$0xff] %v12779_v44  ;;  %v4727_v29 = vsel %vm4687_vm11, %v4667_v11, %v4707_v37  ;;  %v4778_v25 = vrot.slane %v4742_v0, 6  ;;  %v4900_v38 = vld [vmem:[#allocation2 + $0x8] sm:$0xfe]  ;;  %v5602_v12 = vrot.slane %v12762_v57, 2  ;;  %v10023_v36 = vpack.c.bf16 %v12775_v15, %v12770_v47  ;;  %v12860_v11 = vld [vmem:[%s14581_s3 + $0x820] sm:$0xff] }
 0x210   : > { %v4737_v33 = vmax.f32 %v4722_v28, %v4727_v29  ;;  %v5497_v35 = vld [vmem:[#allocation2 + $0x8] sm:$0xfc]  ;;  %4802 = vst [vmem:[#allocation2 + $0x18] sm:$0xfc] %v4777_v54  ;;  %v14696_v17 = vmax.f32 %v12480_v4, %v12482_v40  ;;  %v5014_v43 = vrot.slane %v4900_v38, 1  ;;  %v5598_v19 = vrot.slane %v5496_v9, 2 }
 0x211   : > { %v5601_v59 = vrot.slane %v5497_v35, 2  ;;  %4803 = vst [vmem:[#allocation2 + $0x20] sm:$0xfc] %v4778_v25  ;;  %v14697_v4 = vmax.f32 %v12478_v56, %v12486_v48  ;;  %v5012_v55 = vrot.slane %v12741_v2, 1  ;;  %v5599_v10 = vrot.slane %v12741_v2, 2  ;;  %v12882_v8 = vld [vmem:[%s14581_s3 + $0x3a8] sm:$0xff] }
 0x212   : > { %v4746_v52 = vmax.f32 %v14696_v17, %v4736_v50  ;;  %v10279_v34 = vpack.c.bf16 %v8271_v61, %v8270_v16  ;;  %v5016_v56 = vsel %vm5010_vm8, %v5014_v43, %v5015_v45  ;;  %v10025_v63 = vpack.c.bf16 %v12801_v6, %v12796_v23  ;;  %v5861_v13 = vld [vmem:[#allocation2 + $0x8] sm:$0xf8]  ;;  %v12898_v9 = vld [vmem:[%s14581_s3 + $0x7a0] sm:$0xff]  ;;  %v12914_v61 = vld [vmem:[%s14581_s3 + $0x438] sm:$0xff] }
 0x213   : > { %v4747_v40 = vmax.f32 %v14697_v4, %v4737_v33  ;;  %v5603_v48 = vsel %vm5597_vm9, %v5601_v59, %v5602_v12  ;;  %5110 = vmatprep.mubr.f32.mxu0 %v5016_v56  ;;  %v5013_v21 = vsel %vm5010_vm8, %v5011_v62, %v5012_v55  ;;  %v5600_v20 = vsel %vm5597_vm9, %v5598_v19, %v5599_v10  ;;  %v12903_v16 = vld [vmem:[%s14581_s3 + $0x7a8] sm:$0xff]  ;;  %v12924_v50 = vld [vmem:[%s14581_s3 + $0x838] sm:$0xff]  ;;  %v12939_v35 = vld [vmem:[%s14581_s3 + $0x3b0] sm:$0xff] }
 0x214   : > { %v4785_v28 = vrot.slane %v4746_v52, 6  ;;  %5697 = vmatprep.mubr.f32.mxu1 %v5603_v48  ;;  %v10281_v7 = vpack.c.bf16 %v8289_v32, %v12806_v5  ;;  %5111 = vmatmul.mubr.f32.vlgmr.msra.gmra.mrb[12].mxu0 %v5013_v21  ;;  %v10027_v51 = vpack.c.bf16 %v12825_v3, %v12820_v1  ;;  %v10283_v53 = vpack.c.bf16 %v12840_v46, %v12835_v42  ;;  %v12965_v43 = vld [vmem:[%s14581_s3 + $0x448] sm:$0xff]  ;;  %v12970_v59 = vld [vmem:[%s14581_s3 + $0x840] sm:$0xff]  ;;  %v13019_v56 = vld [vmem:[%s14581_s3 + $0x450] sm:$0xff] }
 0x215   : > { %v4787_v24 = vrot.slane %v4747_v40, 6  ;;  %5698 = vmatmul.mubr.f32.vlgmr.msra.gmra.mrb[28].mxu1 %v5600_v20  ;;  %v5034_v37 = vrot.slane %v12842_v27, 1  ;;  %10024 = vmatpush3.bf16.msra.mxu0 %v10023_v36  ;;  %v14698_v15 = vrot.slane %v12701_v14, 1  ;;  %v14699_v0 = vrot.slane %v12708_v22, 2  ;;  %v12908_v14 = vld [vmem:[%s14581_s3 + $0x430] sm:$0xff]  ;;  %v12959_v36 = vld [vmem:[%s14581_s3 + $0x440] sm:$0xff] }
 0x216   : > { %v12863_v26 = vsel %vm4773_vm12, %v4777_v54, %v4785_v28  ;;  %10280 = vmatpush3.bf16.msra.mxu1 %v10279_v34  ;;  %v5965_v62 = vrot.slane %v5861_v13, 3  ;;  %v10029_v22 = vpack.c.bf16 %v8163_v58, %v8162_v39  ;;  %v12919_v54 = vld [vmem:[%s14581_s3 + $0x830] sm:$0xff]  ;;  %10026 = vmatprep.subr.bf16.mxu0 %v10025_v63  ;;  %v14701_v6 = vrot.slane %v12697_v49, 2  ;;  %v12975_v19 = vld [vmem:[%s14581_s3 + $0x848] sm:$0xff]  ;;  %v12992_v40 = vld [vmem:[%s14581_s3 + $0x3c0] sm:$0xff] }
 0x217   : > { %4807 = vst [vmem:[#allocation2 + $0x40] sm:$0xff] %v12863_v26  ;;  %v12887_v47 = vsel %vm4773_vm12, %v4778_v25, %v4787_v24  ;;  %v5029_v30 = vsel %vm5010_vm8, %v5015_v45, %v14698_v15  ;;  %v5616_v18 = vsel %vm5597_vm9, %v5602_v12, %v14699_v0  ;;  %10282 = vmatprep.subr.bf16.mxu1 %v10281_v7  ;;  %v14700_v45 = vrot.slane %v12695_v41, 1  ;;  %v4902_v33 = vld [vmem:[#allocation2 + $0x18] sm:$0xfe]  ;;  %v12949_v49 = vld [vmem:[%s14581_s3 + $0x7b0] sm:$0xff]  ;;  %v13007_v34 = vld [vmem:[%s14581_s3 + $0x7c8] sm:$0xff] }
 0x218   : > { %4808 = vst [vmem:[#allocation2 + $0x48] sm:$0xff] %v12887_v47  ;;  %5115 = vmatprep.mubr.f32.mxu0 %v5029_v30  ;;  %5702 = vmatprep.mubr.f32.mxu1 %v5616_v18  ;;  %v5024_v29 = vrot.slane %v12887_v47, 1  ;;  %v5614_v5 = vsel %vm5597_vm9, %v5599_v10, %v14701_v6  ;;  %v5966_v25 = vrot.slane %v12762_v57, 3  ;;  %v10285_v38 = vpack.c.bf16 %v12872_v31, %v12860_v11  ;;  %v12944_v41 = vld [vmem:[%s14581_s3 + $0x3b8] sm:$0xff]  ;;  %v13002_v10 = vld [vmem:[%s14581_s3 + $0x7c0] sm:$0xff]  ;;  %v13031_v21 = vld [vmem:[%s14581_s3 + $0x850] sm:$0xff] }
 0x219   : > { %v5027_v23 = vsel %vm5010_vm8, %v5012_v55, %v14700_v45  ;;  %v12954_v12 = vld [vmem:[%s14581_s3 + $0x7b8] sm:$0xff]  ;;  %5703 = vmatmul.mubr.f32.gmra.mrb[30].mxu1 %v5614_v5  ;;  %vm5961_vm12 = vcmask 1044480   ;;  %v5020_v17 = vrot.slane %v4902_v33, 1  ;;  %v5021_v52 = vrot.slane %v12863_v26, 1  ;;  %10028 = vmatpush3.bf16.msra.mxu0 %v10027_v51  ;;  %v12997_v55 = vld [vmem:[%s14581_s3 + $0x3c8] sm:$0xff]  ;;  %v8152_v6 = vld [vmem:[%s14581_s3 + $0x3d0] sm:$0xff] }
 0x21a   : > { %5116 = vmatmul.mubr.f32.gmra.mrb[14].mxu0 %v5027_v23  ;;  %v12980_v32 = vsel %vm5010_vm8, %v5024_v29, %v5034_v37  ;;  %10284 = vmatpush3.bf16.msra.mxu1 %v10283_v53  ;;  %v5967_v1 = vsel %vm5961_vm12, %v5965_v62, %v5966_v25  ;;  %v10031_v3 = vpack.c.bf16 %v12882_v8, %v12877_v60  ;;  %v5504_v42 = vld [vmem:[#allocation2 + $0x68] sm:$0x3]  ;;  %v5499_v48 = vld [vmem:[#allocation2 + $0x18] sm:$0xfc]  ;;  %v5503_v63 = vld [vmem:[#allocation2 + $0x60] sm:$0x3] }
 0x21b   : > { %v10287_v4 = vpack.c.bf16 %v12903_v16, %v12898_v9  ;;  %6061 = vmatprep.mubr.f32.mxu1 %v5967_v1  ;;  %10030 = vmatprep.subr.bf16.mxu0 %v10029_v22  ;;  %v5022_v46 = vsel %vm5010_vm8, %v5020_v17, %v5021_v52  ;;  %v10033_v27 = vpack.c.bf16 %v12914_v61, %v12908_v14  ;;  %v13021_v13 = vld [vmem:[#allocation2 + $0x60] sm:$0xf]  ;;  %v13026_v24 = vld [vmem:[%s14581_s3 + $0x458] sm:$0xff]  ;;  %v5505_v20 = vld [vmem:[#allocation2 + $0x70] sm:$0x3]  ;;  %v5619_v51 = vrot.slane %v5504_v42, 2 }
 0x21c   : > { %v10289_v28 = vpack.c.bf16 %v12924_v50, %v12919_v54  ;;  %5185 = vmatprep.mubr.f32.mxu0 %v5022_v46  ;;  %10286 = vmatprep.subr.bf16.mxu1 %v10285_v38  ;;  %v10035_v7 = vpack.c.bf16 %v12944_v41, %v12939_v35  ;;  %v10291_v39 = vpack.c.bf16 %v12954_v12, %v12949_v49  ;;  %v13042_v11 = vld [vmem:[%s14581_s3 + $0x858] sm:$0xff]  ;;  %v5869_v53 = vld [vmem:[#allocation2 + $0x70] sm:$0x7]  ;;  %v13044_v31 = vld [vmem:[#allocation2 + $0x68] sm:$0xf]  ;;  %v5607_v8 = vrot.slane %v5499_v48, 2 }
 0x21d   : > { %v10037_v58 = vpack.c.bf16 %v12965_v43, %v12959_v36  ;;  %10032 = vmatpush3.bf16.msra.mxu0 %v10031_v3  ;;  %v10293_v60 = vpack.c.bf16 %v12975_v19, %v12970_v59  ;;  %v5498_v37 = vld [vmem:[#allocation2 + $0x10] sm:$0xfc]  ;;  %v5617_v15 = vrot.slane %v5503_v63, 2  ;;  %v6345_v30 = vrot.slane %v13021_v13, 4  ;;  %v5500_v9 = vld [vmem:[#allocation2 + $0x20] sm:$0xfc] }
 0x21e   : > { %10288 = vmatpush3.bf16.msra.mxu1 %v10287_v4  ;;  %10034 = vmatprep.subr.bf16.mxu0 %v10033_v27  ;;  %v10039_v0 = vpack.c.bf16 %v12997_v55, %v12992_v40  ;;  %v10295_v18 = vpack.c.bf16 %v13007_v34, %v13002_v10  ;;  %v5608_v62 = vrot.slane %v12863_v26, 2  ;;  %v5621_v16 = vrot.slane %v5505_v20, 2  ;;  %v5864_v14 = vld [vmem:[#allocation2 + $0x20] sm:$0xf8]  ;;  %v6227_v50 = vld [vmem:[#allocation2 + $0x18] sm:$0xf0] }
 0x21f   : > { %10290 = vmatprep.subr.bf16.mxu1 %v10289_v28  ;;  %v10041_v22 = vpack.c.bf16 %v13026_v24, %v13019_v56  ;;  %v10297_v61 = vpack.c.bf16 %v13042_v11, %v13031_v21  ;;  %v5985_v54 = vrot.slane %v5869_v53, 3  ;;  %v6347_v45 = vrot.slane %v13044_v31, 4  ;;  %v6233_v23 = vld [vmem:[#allocation2 + $0x70] sm:$0xf]  ;;  %v8153_v5 = vld [vmem:[%s14581_s3 + $0x3d8] sm:$0xff]  ;;  %v8170_v3 = vld [vmem:[%s14581_s3 + $0x460] sm:$0xff] }
 0x220   : > { %v8280_v33 = vld [vmem:[%s14581_s3 + $0x7d0] sm:$0xff]  ;;  %v13069_v38 = vsel %vm5597_vm9, %v5607_v8, %v5608_v62  ;;  %v5604_v35 = vrot.slane %v5498_v37, 2  ;;  %v5605_v41 = vrot.slane %v12779_v44, 2  ;;  %v13073_v49 = vsel %vm5597_vm9, %v5608_v62, %v5619_v51  ;;  %v6228_v19 = vld [vmem:[#allocation2 + $0x20] sm:$0xf0]  ;;  %v8281_v1 = vld [vmem:[%s14581_s3 + $0x7d8] sm:$0xff] }
 0x221   : > { %v6226_v12 = vld [vmem:[#allocation2 + $0x10] sm:$0xf0]  ;;  %10036 = vmatpush3.bf16.msra.mxu0 %v10035_v7  ;;  %v5610_v36 = vrot.slane %v5500_v9, 2  ;;  %v5611_v17 = vrot.slane %v12887_v47, 2  ;;  %v5974_v43 = vrot.slane %v5864_v14, 3  ;;  %v5975_v59 = vrot.slane %v12887_v47, 3 }
 0x222   : > { %10292 = vmatpush3.bf16.msra.mxu1 %v10291_v39  ;;  %10038 = vmatprep.subr.bf16.mxu0 %v10037_v58  ;;  %v8171_v4 = vld [vmem:[%s14581_s3 + $0x468] sm:$0xff]  ;;  %v13087_v40 = vsel %vm5597_vm9, %v5604_v35, %v5605_v41  ;;  %v13090_v55 = vsel %vm5597_vm9, %v5605_v41, %v5617_v15  ;;  %v6335_v10 = vrot.slane %v6227_v50, 4  ;;  %v6349_v34 = vrot.slane %v6233_v23, 4  ;;  %v8298_v42 = vld [vmem:[%s14581_s3 + $0x860] sm:$0xff]  ;;  %v8172_v37 = vld [vmem:[%s14581_s3 + $0x470] sm:$0xff] }
 0x223   : > { %10294 = vmatprep.subr.bf16.mxu1 %v10293_v60  ;;  %v8299_v46 = vld [vmem:[%s14581_s3 + $0x868] sm:$0xff]  ;;  %v13099_v27 = vsel %vm5597_vm9, %v5610_v36, %v5611_v17  ;;  %v13102_v28 = vsel %vm5597_vm9, %v5611_v17, %v5621_v16  ;;  %v13105_v56 = vsel %vm5961_vm12, %v5974_v43, %v5975_v59  ;;  %v13108_v48 = vsel %vm5961_vm12, %v5975_v59, %v5985_v54  ;;  %v8154_v11 = vld [vmem:[%s14581_s3 + $0x3e0] sm:$0xff]  ;;  %v8300_v62 = vld [vmem:[%s14581_s3 + $0x870] sm:$0xff] }
 0x224   : > { %v6336_v63 = vrot.slane %v12863_v26, 4  ;;  %v6332_v24 = vrot.slane %v6226_v12, 4  ;;  %v6333_v21 = vrot.slane %v12779_v44, 4  ;;  %v6338_v20 = vrot.slane %v6228_v19, 4  ;;  %v8155_v51 = vld [vmem:[%s14581_s3 + $0x3e8] sm:$0xff]  ;;  %v8282_v60 = vld [vmem:[%s14581_s3 + $0x7e0] sm:$0xff] }
 0x225   : > { %10040 = vmatpush3.bf16.msra.mxu0 %v10039_v0  ;;  %v10043_v7 = vpack.c.bf16 %v8153_v5, %v8152_v6  ;;  %v10299_v39 = vpack.c.bf16 %v8281_v1, %v8280_v33  ;;  %v10045_v58 = vpack.c.bf16 %v8171_v4, %v8170_v3  ;;  %v6339_v53 = vrot.slane %v12887_v47, 4  ;;  %v8283_v8 = vld [vmem:[%s14581_s3 + $0x7e8] sm:$0xff]  ;;  %v8301_v9 = vld [vmem:[%s14581_s3 + $0x878] sm:$0xff]  ;;  %v8284_v6 = vld [vmem:[%s14581_s3 + $0x7f0] sm:$0xff] }
 0x226   : > { %10296 = vmatpush3.bf16.msra.mxu1 %v10295_v18  ;;  %10042 = vmatprep.subr.bf16.mxu0 %v10041_v22  ;;  %v10301_v31 = vpack.c.bf16 %v8299_v46, %v8298_v42  ;;  %v13129_v15 = vsel %vm6325_vm13, %v6335_v10, %v6336_v63  ;;  %v13132_v0 = vsel %vm6325_vm13, %v6332_v24, %v6333_v21  ;;  %v8173_v18 = vld [vmem:[%s14581_s3 + $0x478] sm:$0xff]  ;;  %v8174_v33 = vld [vmem:[%s14581_s3 + $0x480] sm:$0xff]  ;;  %v8175_v35 = vld [vmem:[%s14581_s3 + $0x488] sm:$0xff] }
 0x227   : > { %10298 = vmatprep.subr.bf16.mxu1 %v10297_v61  ;;  %v13144_v16 = vsel %vm6325_vm13, %v6336_v63, %v6347_v45  ;;  %v13149_v14 = vsel %vm6325_vm13, %v6333_v21, %v6345_v30  ;;  %v13152_v22 = vsel %vm6325_vm13, %v6338_v20, %v6339_v53  ;;  %v13155_v61 = vsel %vm6325_vm13, %v6339_v53, %v6349_v34  ;;  %v8156_v45 = vld [vmem:[%s14581_s3 + $0x3f0] sm:$0xff]  ;;  %v8157_v13 = vld [vmem:[%s14581_s3 + $0x3f8] sm:$0xff]  ;;  %v8318_v41 = vld [vmem:[%s14581_s3 + $0x900] sm:$0xff] }
 0x228   : > { %v10047_v54 = vpack.c.bf16 %v8155_v51, %v8154_v11  ;;  %v10303_v50 = vpack.c.bf16 %v8283_v8, %v8282_v60  ;;  %v10049_v30 = vpack.c.bf16 %v8173_v18, %v8172_v37  ;;  %v10305_v23 = vpack.c.bf16 %v8301_v9, %v8300_v62  ;;  %v8285_v5 = vld [vmem:[%s14581_s3 + $0x7f8] sm:$0xff]  ;;  %v8319_v12 = vld [vmem:[%s14581_s3 + $0x908] sm:$0xff]  ;;  %v4901_v36 = vld [vmem:[#allocation2 + $0x10] sm:$0xfe] }
 0x229   : > { %10044 = vmatpush3.bf16.msra.mxu0 %v10043_v7  ;;  %v5860_v17 = vld [vmem:[#allocation2] sm:$0xf8]  ;;  %v10051_v43 = vpack.c.bf16 %v8157_v13, %v8156_v45  ;;  %v10307_v59 = vpack.c.bf16 %v8285_v5, %v8284_v6  ;;  %v4912_v19 = vld [vmem:[#allocation2 + $0x68] sm:$0x1]  ;;  %v10053_v1 = vpack.c.bf16 %v8175_v35, %v8174_v33  ;;  %v10309_v3 = vpack.c.bf16 %v8319_v12, %v8318_v41  ;;  %v5866_v4 = vld [vmem:[#allocation2 + $0x58] sm:$0x7] }
 0x22a   : > { %10300 = vmatpush3.bf16.msra.mxu1 %v10299_v39  ;;  %10046 = vmatprep.subr.bf16.mxu0 %v10045_v58  ;;  %v4911_v10 = vld [vmem:[#allocation2 + $0x60] sm:$0x1]  ;;  %v5865_v34 = vld [vmem:[#allocation2 + $0x50] sm:$0x7]  ;;  %v5017_v42 = vrot.slane %v4901_v36, 1  ;;  %v5962_v46 = vrot.slane %v5860_v17, 3 }
 0x22b   : > { %10302 = vmatprep.subr.bf16.mxu1 %v10301_v31  ;;  %v8302_v63 = vld [vmem:[%s14581_s3 + $0x880] sm:$0xff]  ;;  %v8303_v24 = vld [vmem:[%s14581_s3 + $0x888] sm:$0xff]  ;;  %v8176_v21 = vld [vmem:[%s14581_s3 + $0x490] sm:$0xff]  ;;  %v5032_v20 = vrot.slane %v4912_v19, 1  ;;  %v5018_v11 = vrot.slane %v12779_v44, 1  ;;  %v5963_v51 = vrot.slane %v12741_v2, 3 }
 0x22c   : > { %v8177_v7 = vld [vmem:[%s14581_s3 + $0x498] sm:$0xff]  ;;  %v8320_v39 = vld [vmem:[%s14581_s3 + $0x910] sm:$0xff]  ;;  %v5979_v53 = vrot.slane %v5866_v4, 3  ;;  %v4903_v31 = vld [vmem:[#allocation2 + $0x20] sm:$0xfe]  ;;  %v10311_v60 = vpack.c.bf16 %v8303_v24, %v8302_v63  ;;  %v5030_v8 = vrot.slane %v4911_v10, 1 }
 0x22d   : > { %10048 = vmatpush3.bf16.msra.mxu0 %v10047_v54  ;;  %v8321_v58 = vld [vmem:[%s14581_s3 + $0x918] sm:$0xff]  ;;  %v5977_v37 = vrot.slane %v5865_v34, 3  ;;  %v8304_v18 = vld [vmem:[%s14581_s3 + $0x890] sm:$0xff]  ;;  %v5019_v9 = vsel %vm5010_vm8, %v5017_v42, %v5018_v11  ;;  %v5964_v54 = vsel %vm5961_vm12, %v5962_v46, %v5963_v51  ;;  %v8178_v13 = vld [vmem:[%s14581_s3 + $0x4a0] sm:$0xff]  ;;  %v5023_v6 = vrot.slane %v4903_v31, 1 }
 0x22e   : > { %10304 = vmatpush3.bf16.msra.mxu1 %v10303_v50  ;;  %10050 = vmatprep.subr.bf16.mxu0 %v10049_v30  ;;  %v5863_v62 = vld [vmem:[#allocation2 + $0x18] sm:$0xf8]  ;;  %v10057_v50 = vpack.c.bf16 %v8177_v7, %v8176_v21  ;;  %v10313_v45 = vpack.c.bf16 %v8321_v58, %v8320_v39  ;;  %v8179_v30 = vld [vmem:[%s14581_s3 + $0x4a8] sm:$0xff]  ;;  %v8322_v5 = vld [vmem:[%s14581_s3 + $0x920] sm:$0xff]  ;;  %v5980_v35 = vsel %vm5961_vm12, %v5966_v25, %v5979_v53 }
 0x22f   : > { %10306 = vmatprep.subr.bf16.mxu1 %v10305_v23  ;;  %v8305_v2 = vld [vmem:[%s14581_s3 + $0x898] sm:$0xff]  ;;  %v5033_v23 = vsel %vm5010_vm8, %v5021_v52, %v5032_v20  ;;  %v8323_v33 = vld [vmem:[%s14581_s3 + $0x928] sm:$0xff]  ;;  %v5971_v41 = vrot.slane %v5863_v62, 3  ;;  %v10061_v52 = vpack.c.bf16 %v8179_v30, %v8178_v13  ;;  %v8306_v36 = vld [vmem:[%s14581_s3 + $0x8a0] sm:$0xff]  ;;  %v5031_v17 = vsel %vm5010_vm8, %v5018_v11, %v5030_v8 }
 0x230   : > { %v10315_v12 = vpack.c.bf16 %v8305_v2, %v8304_v18  ;;  %v10317_v19 = vpack.c.bf16 %v8323_v33, %v8322_v5  ;;  %v8307_v25 = vld [vmem:[%s14581_s3 + $0x8a8] sm:$0xff]  ;;  %v5025_v4 = vsel %vm5010_vm8, %v5023_v6, %v5024_v29  ;;  %v8324_v10 = vld [vmem:[%s14581_s3 + $0x930] sm:$0xff]  ;;  %v8325_v34 = vld [vmem:[%s14581_s3 + $0x938] sm:$0xff] }
 0x231   : > { %10052 = vmatpush3.bf16.msra.mxu0 %v10051_v43  ;;  %v5978_v43 = vsel %vm5961_vm12, %v5963_v51, %v5977_v37  ;;  %v10319_v46 = vpack.c.bf16 %v8307_v25, %v8306_v36  ;;  %v8308_v29 = vld [vmem:[%s14581_s3 + $0x8b0] sm:$0xff]  ;;  %v10321_v63 = vpack.c.bf16 %v8325_v34, %v8324_v10  ;;  %v8309_v24 = vld [vmem:[%s14581_s3 + $0x8b8] sm:$0xff]  ;;  %v8182_v21 = vld [vmem:[%s14581_s3 + $0x4c0] sm:$0xff] }
 0x232   : > { %10308 = vmatpush3.bf16.msra.mxu1 %v10307_v59  ;;  %10054 = vmatprep.subr.bf16.mxu0 %v10053_v1  ;;  %v5972_v59 = vrot.slane %v12863_v26, 3  ;;  %v8183_v20 = vld [vmem:[%s14581_s3 + $0x4c8] sm:$0xff]  ;;  %v8326_v7 = vld [vmem:[%s14581_s3 + $0x940] sm:$0xff]  ;;  %v10323_v58 = vpack.c.bf16 %v8309_v24, %v8308_v29  ;;  %v8185_v8 = vld [vmem:[%s14581_s3 + $0x4d8] sm:$0xff] }
 0x233   : > { %10310 = vmatprep.subr.bf16.mxu1 %v10309_v3  ;;  %v8181_v3 = vld [vmem:[%s14581_s3 + $0x4b8] sm:$0xff]  ;;  %v8327_v39 = vld [vmem:[%s14581_s3 + $0x948] sm:$0xff]  ;;  %v10069_v11 = vpack.c.bf16 %v8183_v20, %v8182_v21  ;;  %v8310_v51 = vld [vmem:[%s14581_s3 + $0x8c0] sm:$0xff] }
 0x234   : > { %5186 = vmatmul.mubr.f32.vlgmr.msra.gmra.mrb[16].mxu0 %v5019_v9  ;;  %v5973_v42 = vsel %vm5961_vm12, %v5971_v41, %v5972_v59  ;;  %v10325_v53 = vpack.c.bf16 %v8327_v39, %v8326_v7  ;;  %v8311_v31 = vld [vmem:[%s14581_s3 + $0x8c8] sm:$0xff]  ;;  %v8328_v37 = vld [vmem:[%s14581_s3 + $0x950] sm:$0xff]  ;;  %v8329_v18 = vld [vmem:[%s14581_s3 + $0x958] sm:$0xff] }
 0x235   : > { %6062 = vmatmul.mubr.f32.vlgmr.msra.gmra.mrb[32].mxu1 %v5964_v54  ;;  %5190 = vmatprep.mubr.f32.mxu0 %v5033_v23  ;;  %v10327_v62 = vpack.c.bf16 %v8311_v31, %v8310_v51  ;;  %v8312_v54 = vld [vmem:[%s14581_s3 + $0x8d0] sm:$0xff]  ;;  %v8186_v2 = vld [vmem:[%s14581_s3 + $0x4e0] sm:$0xff]  ;;  %v8187_v13 = vld [vmem:[%s14581_s3 + $0x4e8] sm:$0xff] }
 0x236   : > { %10056 = vmatpush3.bf16.msra.mxu0 %v10053_v1  ;;  %6066 = vmatprep.mubr.f32.mxu1 %v5980_v35  ;;  %v8180_v1 = vld [vmem:[%s14581_s3 + $0x4b0] sm:$0xff]  ;;  %v8330_v30 = vld [vmem:[%s14581_s3 + $0x960] sm:$0xff]  ;;  %v8331_v23 = vld [vmem:[%s14581_s3 + $0x968] sm:$0xff]  ;;  %v10077_v5 = vpack.c.bf16 %v8187_v13, %v8186_v2 }
 0x237   : > { %10312 = vmatpush3.bf16.msra.mxu1 %v10311_v60  ;;  %10058 = vmatprep.subr.bf16.mxu0 %v10057_v50  ;;  %v10065_v47 = vpack.c.bf16 %v8181_v3, %v8180_v1  ;;  %v8184_v60 = vld [vmem:[%s14581_s3 + $0x4d0] sm:$0xff]  ;;  %v8314_v33 = vld [vmem:[%s14581_s3 + $0x8e0] sm:$0xff]  ;;  %v10333_v35 = vpack.c.bf16 %v8331_v23, %v8330_v30  ;;  %v8315_v41 = vld [vmem:[%s14581_s3 + $0x8e8] sm:$0xff] }
 0x238   : > { %10314 = vmatprep.subr.bf16.mxu1 %v10313_v45  ;;  %5191 = vmatmul.mubr.f32.gmra.mrb[18].mxu0 %v5031_v17  ;;  %v10073_v9 = vpack.c.bf16 %v8185_v8, %v8184_v60  ;;  %v8313_v45 = vld [vmem:[%s14581_s3 + $0x8d8] sm:$0xff]  ;;  %v8332_v36 = vld [vmem:[%s14581_s3 + $0x970] sm:$0xff]  ;;  %v4836_v10 = vld [vmem:[%s14581_s3 + $0x88] sm:$0xff] }
 0x239   : > { %6067 = vmatmul.mubr.f32.gmra.mrb[34].mxu1 %v5978_v43  ;;  %9180 = vmatprep.mubr.f32.mxu0 %v5025_v4  ;;  %v10331_v6 = vpack.c.bf16 %v8313_v45, %v8312_v54  ;;  %v8333_v17 = vld [vmem:[%s14581_s3 + $0x978] sm:$0xff]  ;;  %v10335_v43 = vpack.c.bf16 %v8315_v41, %v8314_v33  ;;  %v8316_v25 = vld [vmem:[%s14581_s3 + $0x8f0] sm:$0xff]  ;;  %v4835_v4 = vld [vmem:[%s14581_s3 + $0x80] sm:$0xff] }
 0x23a   : > { %10060 = vmatpush3.bf16.msra.mxu0 %v10057_v50  ;;  %6136 = vmatprep.mubr.f32.mxu1 %v5973_v42  ;;  %v10329_v50 = vpack.c.bf16 %v8329_v18, %v8328_v37  ;;  %v10337_v1 = vpack.c.bf16 %v8333_v17, %v8332_v36  ;;  %v8317_v3 = vld [vmem:[%s14581_s3 + $0x8f8] sm:$0xff]  ;;  %v8366_v34 = vld [vmem:[%s14581_s3 + $0xa80] sm:$0xff]  ;;  %v8367_v42 = vld [vmem:[%s14581_s3 + $0xa88] sm:$0xff]  ;;  %v10085_v29 = vpack.c.bf16 %v4836_v10, %v4835_v4  ;;  %v5969_v18 = vrot.slane %v12779_v44, 3 }
 0x23b   : > { %10316 = vmatpush3.bf16.msra.mxu1 %v10315_v12  ;;  %10062 = vmatprep.subr.bf16.mxu0 %v10061_v52  ;;  %v8188_v12 = vld [vmem:[%s14581_s3 + $0x4f0] sm:$0xff]  ;;  %v4820_v24 = vld [vmem:[%s14581_s3 + $0x8] sm:$0xff]  ;;  %v10373_v20 = vpack.c.bf16 %v8367_v42, %v8366_v34  ;;  %v8350_v7 = vld [vmem:[%s14581_s3 + $0xa00] sm:$0xff] }
 0x23c   : > { %10318 = vmatprep.subr.bf16.mxu1 %v10317_v19  ;;  %v5868_v21 = vld [vmem:[#allocation2 + $0x68] sm:$0x7]  ;;  %v4838_v51 = vld [vmem:[%s14581_s3 + $0x98] sm:$0xff]  ;;  %v5867_v60 = vld [vmem:[#allocation2 + $0x60] sm:$0x7] }
 0x23d   : > { %v5983_v31 = vrot.slane %v5868_v21, 3  ;;  %v8368_v8 = vld [vmem:[%s14581_s3 + $0xa90] sm:$0xff]  ;;  %v8369_v37 = vld [vmem:[%s14581_s3 + $0xa98] sm:$0xff]  ;;  %v6225_v54 = vld [vmem:[#allocation2 + $0x8] sm:$0xf0]  ;;  %v5981_v30 = vrot.slane %v5867_v60, 3 }
 0x23e   : > { %10064 = vmatpush3.bf16.msra.mxu0 %v10061_v52  ;;  %v8189_v52 = vld [vmem:[%s14581_s3 + $0x4f8] sm:$0xff]  ;;  %v4839_v2 = vld [vmem:[%s14581_s3 + $0xa0] sm:$0xff]  ;;  %v4840_v44 = vld [vmem:[%s14581_s3 + $0xa8] sm:$0xff]  ;;  %v10377_v23 = vpack.c.bf16 %v8369_v37, %v8368_v8  ;;  %v6329_v41 = vrot.slane %v6225_v54, 4 }
 0x23f   : > { %10320 = vmatpush3.bf16.msra.mxu1 %v10319_v46  ;;  %10066 = vmatprep.subr.bf16.mxu0 %v10065_v47  ;;  %v10081_v19 = vpack.c.bf16 %v8189_v52, %v8188_v12  ;;  %v5862_v46 = vld [vmem:[#allocation2 + $0x10] sm:$0xf8]  ;;  %v4810_v33 = vld [vmem:[#allocation2 + $0x8] sm:$0xff]  ;;  %v8370_v12 = vld [vmem:[%s14581_s3 + $0xaa0] sm:$0xff]  ;;  %v10093_v36 = vpack.c.bf16 %v4840_v44, %v4839_v2 }
 0x240   : > { %10322 = vmatprep.subr.bf16.mxu1 %v10321_v63  ;;  %v4819_v63 = vld [vmem:[%s14581_s3] sm:$0xff]  ;;  %v5968_v39 = vrot.slane %v5862_v46, 3  ;;  %v8371_v52 = vld [vmem:[%s14581_s3 + $0xaa8] sm:$0xff]  ;;  %v8372_v46 = vld [vmem:[%s14581_s3 + $0xab0] sm:$0xff] }
 0x241   : > { %v4823_v17 = vld [vmem:[%s14581_s3 + $0x20] sm:$0xff]  ;;  %v4824_v26 = vld [vmem:[%s14581_s3 + $0x28] sm:$0xff]  ;;  %v8376_v44 = vld [vmem:[%s14581_s3 + $0xad0] sm:$0xff] }
 0x242   : > { %10068 = vmatpush3.bf16.msra.mxu0 %v10065_v47  ;;  %v10339_v47 = vpack.c.bf16 %v8317_v3, %v8316_v25  ;;  %v5970_v13 = vsel %vm5961_vm12, %v5968_v39, %v5969_v18  ;;  %v4842_v25 = vld [vmem:[%s14581_s3 + $0xb8] sm:$0xff]  ;;  %v10381_v3 = vpack.c.bf16 %v8371_v52, %v8370_v12  ;;  %v8354_v4 = vld [vmem:[%s14581_s3 + $0xa20] sm:$0xff]  ;;  %v8355_v10 = vld [vmem:[%s14581_s3 + $0xa28] sm:$0xff]  ;;  %v10095_v42 = vpack.c.bf16 %v4824_v26, %v4823_v17 }
 0x243   : > { %10324 = vmatpush3.bf16.msra.mxu1 %v10323_v58  ;;  %10070 = vmatprep.subr.bf16.mxu0 %v10069_v11  ;;  %v8351_v58 = vld [vmem:[%s14581_s3 + $0xa08] sm:$0xff]  ;;  %v10383_v21 = vpack.c.bf16 %v8355_v10, %v8354_v4  ;;  %v4827_v8 = vld [vmem:[%s14581_s3 + $0x40] sm:$0xff]  ;;  %v8361_v12 = vld [vmem:[%s14581_s3 + $0xa58] sm:$0xff] }
 0x244   : > { %10326 = vmatprep.subr.bf16.mxu1 %v10325_v53  ;;  %v10087_v53 = vpack.c.bf16 %v4820_v24, %v4819_v63  ;;  %v4825_v63 = vld [vmem:[%s14581_s3 + $0x30] sm:$0xff]  ;;  %v4826_v24 = vld [vmem:[%s14581_s3 + $0x38] sm:$0xff]  ;;  %v4828_v37 = vld [vmem:[%s14581_s3 + $0x48] sm:$0xff] }
 0x245   : > { %v10103_v2 = vpack.c.bf16 %v4828_v37, %v4827_v8  ;;  %v8379_v17 = vld [vmem:[%s14581_s3 + $0xae8] sm:$0xff]  ;;  %v8362_v10 = vld [vmem:[%s14581_s3 + $0xa60] sm:$0xff] }
 0x246   : > { %10072 = vmatpush3.bf16.msra.mxu0 %v10069_v11  ;;  %v4837_v11 = vld [vmem:[%s14581_s3 + $0x90] sm:$0xff]  ;;  %v4852_v8 = vld [vmem:[%s14581_s3 + $0x108] sm:$0xff] }
 0x247   : > { %10328 = vmatpush3.bf16.msra.mxu1 %v10327_v62  ;;  %10074 = vmatprep.subr.bf16.mxu0 %v10073_v9  ;;  %v4821_v62 = vld [vmem:[%s14581_s3 + $0x10] sm:$0xff]  ;;  %v10089_v45 = vpack.c.bf16 %v4838_v51, %v4837_v11  ;;  %v8357_v11 = vld [vmem:[%s14581_s3 + $0xa38] sm:$0xff]  ;;  %v10099_v51 = vpack.c.bf16 %v4826_v24, %v4825_v63 }
 0x248   : > { %10330 = vmatprep.subr.bf16.mxu1 %v10329_v50  ;;  %v10375_v50 = vpack.c.bf16 %v8351_v58, %v8350_v7  ;;  %v4844_v7 = vld [vmem:[%s14581_s3 + $0xc8] sm:$0xff]  ;;  %v8356_v58 = vld [vmem:[%s14581_s3 + $0xa30] sm:$0xff]  ;;  %v4834_v24 = vld [vmem:[%s14581_s3 + $0x78] sm:$0xff] }
 0x249   : > { %v4833_v63 = vld [vmem:[%s14581_s3 + $0x70] sm:$0xff] }
 0x24a   : > { %10076 = vmatpush3.bf16.msra.mxu0 %v10073_v9  ;;  %v4822_v9 = vld [vmem:[%s14581_s3 + $0x18] sm:$0xff] }
 0x24b   : > { %10332 = vmatpush3.bf16.msra.mxu1 %v10331_v6  ;;  %10078 = vmatprep.subr.bf16.mxu0 %v10077_v5  ;;  %v8352_v6 = vld [vmem:[%s14581_s3 + $0xa10] sm:$0xff] }
 0x24c   : > { %10334 = vmatprep.subr.bf16.mxu1 %v10333_v35  ;;  %v5984_v35 = vsel %vm5961_vm12, %v5972_v59, %v5983_v31  ;;  %v8375_v31 = vld [vmem:[%s14581_s3 + $0xac8] sm:$0xff] }
 0x24e   : > { %10080 = vmatpush3.bf16.msra.mxu0 %v10077_v5  ;;  %v8353_v5 = vld [vmem:[%s14581_s3 + $0xa18] sm:$0xff] }
 0x24f   : > { %10336 = vmatpush3.bf16.msra.mxu1 %v10335_v43  ;;  %10082 = vmatprep.subr.bf16.mxu0 %v10081_v19  ;;  %v10379_v59 = vpack.c.bf16 %v8353_v5, %v8352_v6  ;;  %v6330_v43 = vrot.slane %v12762_v57, 4  ;;  %v4830_v6 = vld [vmem:[%s14581_s3 + $0x58] sm:$0xff] }
 0x250   : > { %10338 = vmatprep.subr.bf16.mxu1 %v10337_v1  ;;  %v5982_v1 = vsel %vm5961_vm12, %v5969_v18, %v5981_v30  ;;  %v10387_v18 = vpack.c.bf16 %v8357_v11, %v8356_v58  ;;  %v8364_v58 = vld [vmem:[%s14581_s3 + $0xa70] sm:$0xff]  ;;  %v8365_v11 = vld [vmem:[%s14581_s3 + $0xa78] sm:$0xff] }
 0x251   : > { %v6331_v34 = vsel %vm6325_vm13, %v6329_v41, %v6330_v43  ;;  %v8360_v41 = vld [vmem:[%s14581_s3 + $0xa50] sm:$0xff]  ;;  %v10403_v37 = vpack.c.bf16 %v8365_v11, %v8364_v58  ;;  %v4874_v57 = vld [vmem:[%s14581_s3 + $0x1b8] sm:$0xff] }
 0x252   : > { %10084 = vmatpush3.bf16.msra.mxu0 %v10081_v19  ;;  %v4841_v19 = vld [vmem:[%s14581_s3 + $0xb0] sm:$0xff]  ;;  %v4862_v11 = vld [vmem:[%s14581_s3 + $0x158] sm:$0xff] }
 0x253   : > { %10340 = vmatpush3.bf16.msra.mxu1 %v10339_v47  ;;  %10086 = vmatprep.subr.bf16.mxu0 %v10085_v29  ;;  %v8373_v47 = vld [vmem:[%s14581_s3 + $0xab8] sm:$0xff]  ;;  %v10097_v29 = vpack.c.bf16 %v4842_v25, %v4841_v19  ;;  %v4832_v19 = vld [vmem:[%s14581_s3 + $0x68] sm:$0xff]  ;;  %v10395_v25 = vpack.c.bf16 %v8361_v12, %v8360_v41  ;;  %v4861_v58 = vld [vmem:[%s14581_s3 + $0x150] sm:$0xff] }
 0x254   : > { %10374 = vmatprep.subr.bf16.mxu1 %v10373_v20  ;;  %v4843_v20 = vld [vmem:[%s14581_s3 + $0xc0] sm:$0xff]  ;;  %v10385_v39 = vpack.c.bf16 %v8373_v47, %v8372_v46  ;;  %v8380_v46 = vld [vmem:[%s14581_s3 + $0xaf0] sm:$0xff]  ;;  %v8381_v47 = vld [vmem:[%s14581_s3 + $0xaf8] sm:$0xff] }
 0x255   : > { %9181 = vmatmul.mubr.f32.vlgmr.msra.gmra.mrb[20].mxu0 %v12980_v32  ;;  %v10091_v32 = vpack.c.bf16 %v4822_v9, %v4821_v62  ;;  %v10101_v60 = vpack.c.bf16 %v4844_v7, %v4843_v20  ;;  %v4845_v62 = vld [vmem:[%s14581_s3 + $0xd0] sm:$0xff]  ;;  %v4846_v9 = vld [vmem:[%s14581_s3 + $0xd8] sm:$0xff]  ;;  %v4867_v20 = vld [vmem:[%s14581_s3 + $0x180] sm:$0xff] }
 0x256   : > { %6137 = vmatmul.mubr.f32.vlgmr.msra.gmra.mrb[36].mxu1 %v5970_v13  ;;  %10088 = vmatpush3.bf16.msra.mxu0 %v10087_v53  ;;  %v8374_v53 = vld [vmem:[%s14581_s3 + $0xac0] sm:$0xff]  ;;  %v8377_v13 = vld [vmem:[%s14581_s3 + $0xad8] sm:$0xff]  ;;  %v10105_v30 = vpack.c.bf16 %v4846_v9, %v4845_v62  ;;  %v4868_v7 = vld [vmem:[%s14581_s3 + $0x188] sm:$0xff] }
 0x257   : > { %5335 = vmatprep.mubr.f32.mxu0 %v4810_v33  ;;  %6141 = vmatprep.mubr.f32.mxu1 %v5984_v35  ;;  %v10389_v54 = vpack.c.bf16 %v8375_v31, %v8374_v53  ;;  %v4847_v33 = vld [vmem:[%s14581_s3 + $0xe0] sm:$0xff]  ;;  %v4848_v35 = vld [vmem:[%s14581_s3 + $0xe8] sm:$0xff]  ;;  %v10117_v53 = vpack.c.bf16 %v4868_v7, %v4867_v20  ;;  %v4869_v62 = vld [vmem:[%s14581_s3 + $0x190] sm:$0xff] }
 0x258   : > { %10376 = vmatpush3.bf16.msra.mxu1 %v10375_v50  ;;  %10090 = vmatprep.subr.bf16.mxu0 %v10089_v45  ;;  %v8358_v50 = vld [vmem:[%s14581_s3 + $0xa40] sm:$0xff]  ;;  %v8359_v45 = vld [vmem:[%s14581_s3 + $0xa48] sm:$0xff]  ;;  %v10109_v26 = vpack.c.bf16 %v4848_v35, %v4847_v33  ;;  %v4870_v9 = vld [vmem:[%s14581_s3 + $0x198] sm:$0xff] }
 0x259   : > { %10378 = vmatprep.subr.bf16.mxu1 %v10377_v23  ;;  %v4829_v23 = vld [vmem:[%s14581_s3 + $0x50] sm:$0xff]  ;;  %v10391_v5 = vpack.c.bf16 %v8359_v45, %v8358_v50  ;;  %v6224_v31 = vld [vmem:[#allocation2] sm:$0xf0]  ;;  %v4872_v35 = vld [vmem:[%s14581_s3 + $0x1a8] sm:$0xff] }
 0x25a   : > { %6142 = vmatmul.mubr.f32.gmra.mrb[38].mxu1 %v5982_v1  ;;  %10092 = vmatpush3.bf16.msra.mxu0 %v10091_v32  ;;  %v10393_v32 = vpack.c.bf16 %v8377_v13, %v8376_v44  ;;  %v10107_v52 = vpack.c.bf16 %v4830_v6, %v4829_v23  ;;  %v4849_v1 = vld [vmem:[%s14581_s3 + $0xf0] sm:$0xff]  ;;  %v4809_v23 = vld [vmem:[#allocation2] sm:$0xff]  ;;  %v10863_v6 = vld [vmem:[#allocation2 + $0x28] sm:$0xff] }
 0x25b   : > { %6425 = vmatprep.mubr.f32.mxu1 %v6331_v34  ;;  %10094 = vmatprep.subr.bf16.mxu0 %v10093_v36  ;;  %v8378_v36 = vld [vmem:[%s14581_s3 + $0xae0] sm:$0xff]  ;;  %v8363_v34 = vld [vmem:[%s14581_s3 + $0xa68] sm:$0xff]  ;;  %v6229_v44 = vld [vmem:[#allocation2 + $0x50] sm:$0xf] }
 0x25c   : > { %10380 = vmatpush3.bf16.msra.mxu1 %v10379_v59  ;;  %v4831_v59 = vld [vmem:[%s14581_s3 + $0x60] sm:$0xff]  ;;  %v10397_v4 = vpack.c.bf16 %v8379_v17, %v8378_v36  ;;  %v4853_v13 = vld [vmem:[%s14581_s3 + $0x110] sm:$0xff]  ;;  %v6341_v12 = vrot.slane %v6229_v44, 4  ;;  %v4878_v20 = vld [vmem:[%s14581_s3 + $0x1d8] sm:$0xff] }
 0x25d   : > { %10382 = vmatprep.subr.bf16.mxu1 %v10381_v3  ;;  %v4850_v3 = vld [vmem:[%s14581_s3 + $0xf8] sm:$0xff]  ;;  %v4871_v33 = vld [vmem:[%s14581_s3 + $0x1a0] sm:$0xff]  ;;  %v4884_v44 = vld [vmem:[%s14581_s3 + $0x208] sm:$0xff] }
 0x25e   : > { %10096 = vmatpush3.bf16.msra.mxu0 %v10095_v42  ;;  %v10111_v42 = vpack.c.bf16 %v4832_v19, %v4831_v59  ;;  %v10125_v17 = vpack.c.bf16 %v4872_v35, %v4871_v33  ;;  %v4856_v59 = vld [vmem:[%s14581_s3 + $0x128] sm:$0xff]  ;;  %v4811_v33 = vld [vmem:[#allocation2 + $0x10] sm:$0xff]  ;;  %v4887_v35 = vld [vmem:[%s14581_s3 + $0x220] sm:$0xff] }
 0x25f   : > { %10098 = vmatprep.subr.bf16.mxu0 %v10097_v29  ;;  %v10113_v29 = vpack.c.bf16 %v4850_v3, %v4849_v1  ;;  %v4814_v19 = vld [vmem:[#allocation2 + $0x28] sm:$0xff] }
 0x260   : > { %10384 = vmatpush3.bf16.msra.mxu1 %v10383_v21  ;;  %v10399_v21 = vpack.c.bf16 %v8363_v34, %v8362_v10  ;;  %v4857_v10 = vld [vmem:[%s14581_s3 + $0x130] sm:$0xff]  ;;  %v4858_v34 = vld [vmem:[%s14581_s3 + $0x138] sm:$0xff] }
 0x261   : > { %10386 = vmatprep.subr.bf16.mxu1 %v10385_v39  ;;  %v10401_v39 = vpack.c.bf16 %v8381_v47, %v8380_v46  ;;  %v4876_v46 = vld [vmem:[%s14581_s3 + $0x1c8] sm:$0xff]  ;;  %v10131_v47 = vpack.c.bf16 %v4858_v34, %v4857_v10 }
 0x262   : > { %10100 = vmatpush3.bf16.msra.mxu0 %v10099_v51  ;;  %v10115_v51 = vpack.c.bf16 %v4834_v24, %v4833_v63  ;;  %v4859_v63 = vld [vmem:[%s14581_s3 + $0x140] sm:$0xff]  ;;  %v4860_v24 = vld [vmem:[%s14581_s3 + $0x148] sm:$0xff] }
 0x263   : > { %10102 = vmatprep.subr.bf16.mxu0 %v10101_v60  ;;  %v4851_v60 = vld [vmem:[%s14581_s3 + $0x100] sm:$0xff]  ;;  %v10135_v7 = vpack.c.bf16 %v4860_v24, %v4859_v63  ;;  %v4896_v10 = vld [vmem:[%s14581_s3 + $0x268] sm:$0xff] }
 0x264   : > { %10388 = vmatpush3.bf16.msra.mxu1 %v10387_v18  ;;  %v6230_v18 = vld [vmem:[#allocation2 + $0x58] sm:$0xf]  ;;  %v10119_v50 = vpack.c.bf16 %v4852_v8, %v4851_v60  ;;  %v4863_v8 = vld [vmem:[%s14581_s3 + $0x160] sm:$0xff]  ;;  %v8239_v63 = vld [vmem:[%s14581_s3 + $0x688] sm:$0xff] }
 0x265   : > { %10390 = vmatprep.subr.bf16.mxu1 %v10389_v54  ;;  %v6326_v54 = vrot.slane %v6224_v31, 4  ;;  %v6343_v45 = vrot.slane %v6230_v18, 4  ;;  %v10139_v31 = vpack.c.bf16 %v4862_v11, %v4861_v58  ;;  %v4881_v18 = vld [vmem:[%s14581_s3 + $0x1f0] sm:$0xff] }
 0x266   : > { %10104 = vmatpush3.bf16.msra.mxu0 %v10103_v2  ;;  %v10121_v2 = vpack.c.bf16 %v4870_v9, %v4869_v62  ;;  %v4882_v62 = vld [vmem:[%s14581_s3 + $0x1f8] sm:$0xff] }
 0x267   : > { %10106 = vmatprep.subr.bf16.mxu0 %v10105_v30  ;;  %v4854_v30 = vld [vmem:[%s14581_s3 + $0x118] sm:$0xff]  ;;  %v6344_v36 = vsel %vm6325_vm13, %v6330_v43, %v6343_v45 }
 0x268   : > { %10392 = vmatpush3.bf16.msra.mxu1 %v10391_v5  ;;  %v6327_v5 = vrot.slane %v10863_v6, 4  ;;  %v4812_v43 = vld [vmem:[#allocation2 + $0x18] sm:$0xff] }
 0x269   : > { %10394 = vmatprep.subr.bf16.mxu1 %v10393_v32  ;;  %v4815_v32 = vld [vmem:[#allocation2 + $0x30] sm:$0xff]  ;;  %v4866_v45 = vld [vmem:[%s14581_s3 + $0x178] sm:$0xff] }
 0x26a   : > { %10108 = vmatpush3.bf16.msra.mxu0 %v10107_v52  ;;  %v6328_v41 = vsel %vm6325_vm13, %v6326_v54, %v6327_v5  ;;  %v10123_v52 = vpack.c.bf16 %v4854_v30, %v4853_v13  ;;  %v6342_v1 = vsel %vm6325_vm13, %v6327_v5, %v6341_v12  ;;  %v10145_v54 = vpack.c.bf16 %v4882_v62, %v4881_v18  ;;  %v4886_v6 = vld [vmem:[%s14581_s3 + $0x218] sm:$0xff]  ;;  %v8226_v62 = vld [vmem:[%s14581_s3 + $0x620] sm:$0xff] }
 0x26b   : > { %10110 = vmatprep.subr.bf16.mxu0 %v10109_v26  ;;  %v4855_v26 = vld [vmem:[%s14581_s3 + $0x120] sm:$0xff] }
 0x26c   : > { %10396 = vmatpush3.bf16.msra.mxu1 %v10395_v25  ;;  %v4873_v25 = vld [vmem:[%s14581_s3 + $0x1b0] sm:$0xff]  ;;  %v10127_v3 = vpack.c.bf16 %v4856_v59, %v4855_v26  ;;  %v4813_v26 = vld [vmem:[#allocation2 + $0x20] sm:$0xff] }
 0x26d   : > { %10398 = vmatprep.subr.bf16.mxu1 %v10397_v4  ;;  %v10129_v4 = vpack.c.bf16 %v4874_v57, %v4873_v25  ;;  %v4892_v25 = vld [vmem:[%s14581_s3 + $0x248] sm:$0xff] }
 0x26e   : > { %10112 = vmatpush3.bf16.msra.mxu0 %v10111_v42  ;;  %v4875_v42 = vld [vmem:[%s14581_s3 + $0x1c0] sm:$0xff] }
 0x26f   : > { %10114 = vmatprep.subr.bf16.mxu0 %v10113_v29  ;;  %v10133_v29 = vpack.c.bf16 %v4876_v46, %v4875_v42  ;;  %v4897_v42 = vld [vmem:[%s14581_s3 + $0x270] sm:$0xff]  ;;  %v4898_v46 = vld [vmem:[%s14581_s3 + $0x278] sm:$0xff] }
 0x270   : > { %10400 = vmatpush3.bf16.msra.mxu1 %v10399_v21  ;;  %v4877_v21 = vld [vmem:[%s14581_s3 + $0x1d0] sm:$0xff] }
 0x271   : > { %10402 = vmatprep.subr.bf16.mxu1 %v10401_v39  ;;  %v10137_v39 = vpack.c.bf16 %v4878_v20, %v4877_v21  ;;  %v8222_v21 = vld [vmem:[%s14581_s3 + $0x600] sm:$0xff]  ;;  %v8223_v20 = vld [vmem:[%s14581_s3 + $0x608] sm:$0xff] }
 0x272   : > { %10116 = vmatpush3.bf16.msra.mxu0 %v10115_v51  ;;  %v4879_v51 = vld [vmem:[%s14581_s3 + $0x1e0] sm:$0xff]  ;;  %v10215_v58 = vpack.c.bf16 %v8223_v20, %v8222_v21 }
 0x273   : > { %10118 = vmatprep.subr.bf16.mxu0 %v10117_v53  ;;  %v4880_v53 = vld [vmem:[%s14581_s3 + $0x1e8] sm:$0xff]  ;;  %v8258_v20 = vld [vmem:[%s14581_s3 + $0x720] sm:$0xff] }
 0x274   : > { %10404 = vmatpush3.bf16.msra.mxu1 %v10403_v37  ;;  %v10141_v60 = vpack.c.bf16 %v4880_v53, %v4879_v51  ;;  %v4864_v37 = vld [vmem:[%s14581_s3 + $0x168] sm:$0xff]  ;;  %v8224_v51 = vld [vmem:[%s14581_s3 + $0x610] sm:$0xff]  ;;  %v8225_v53 = vld [vmem:[%s14581_s3 + $0x618] sm:$0xff] }
 0x275   : > { %5336 = vmatmul.mubr.f32.vlgmr.msra.gmra.mrb[22].mxu0 %v4809_v23  ;;  %v10143_v9 = vpack.c.bf16 %v4864_v37, %v4863_v8  ;;  %v4885_v23 = vld [vmem:[%s14581_s3 + $0x210] sm:$0xff]  ;;  %v8243_v8 = vld [vmem:[%s14581_s3 + $0x6a8] sm:$0xff]  ;;  %v10219_v37 = vpack.c.bf16 %v8225_v53, %v8224_v51 }
 0x276   : > { %5340 = vmatprep.mubr.f32.mxu0 %v4815_v32  ;;  %10120 = vmatpush3.bf16.msra.mxu0 %v10119_v50  ;;  %v4865_v50 = vld [vmem:[%s14581_s3 + $0x170] sm:$0xff]  ;;  %v10153_v5 = vpack.c.bf16 %v4886_v6, %v4885_v23  ;;  %v4888_v32 = vld [vmem:[%s14581_s3 + $0x228] sm:$0xff] }
 0x277   : > { %6426 = vmatmul.mubr.f32.vlgmr.msra.gmra.mrb[40].mxu1 %v6328_v41  ;;  %10122 = vmatprep.subr.bf16.mxu0 %v10121_v2  ;;  %v4883_v2 = vld [vmem:[%s14581_s3 + $0x200] sm:$0xff]  ;;  %v10147_v13 = vpack.c.bf16 %v4866_v45, %v4865_v50  ;;  %v10157_v12 = vpack.c.bf16 %v4888_v32, %v4887_v35  ;;  %v8245_v50 = vld [vmem:[%s14581_s3 + $0x6b8] sm:$0xff]  ;;  %v8248_v35 = vld [vmem:[%s14581_s3 + $0x6d0] sm:$0xff] }
 0x278   : > { %6430 = vmatprep.mubr.f32.mxu1 %v6344_v36  ;;  %v10149_v30 = vpack.c.bf16 %v4884_v44, %v4883_v2  ;;  %v4817_v41 = vld [vmem:[#allocation2 + $0x40] sm:$0xff]  ;;  %v4889_v36 = vld [vmem:[%s14581_s3 + $0x230] sm:$0xff]  ;;  %v8229_v44 = vld [vmem:[%s14581_s3 + $0x638] sm:$0xff] }
 0x279   : > { %5341 = vmatmul.mubr.f32.gmra.mrb[24].mxu0 %v4814_v19  ;;  %v4891_v19 = vld [vmem:[%s14581_s3 + $0x240] sm:$0xff]  ;;  %v8228_v2 = vld [vmem:[%s14581_s3 + $0x630] sm:$0xff]  ;;  %v8249_v32 = vld [vmem:[%s14581_s3 + $0x6d8] sm:$0xff] }
 0x27a   : > { %10124 = vmatpush3.bf16.msra.mxu0 %v10123_v52  ;;  %5410 = vmatprep.mubr.f32.mxu0 %v4812_v43  ;;  %v4816_v52 = vld [vmem:[#allocation2 + $0x38] sm:$0xff]  ;;  %v10165_v57 = vpack.c.bf16 %v4892_v25, %v4891_v19  ;;  %v4893_v43 = vld [vmem:[%s14581_s3 + $0x250] sm:$0xff]  ;;  %v10227_v23 = vpack.c.bf16 %v8229_v44, %v8228_v2  ;;  %v8234_v25 = vld [vmem:[%s14581_s3 + $0x660] sm:$0xff] }
 0x27b   : > { %6431 = vmatmul.mubr.f32.gmra.mrb[42].mxu1 %v6342_v1  ;;  %10126 = vmatprep.subr.bf16.mxu0 %v10125_v17  ;;  %v4890_v17 = vld [vmem:[%s14581_s3 + $0x238] sm:$0xff]  ;;  %v8263_v51 = vld [vmem:[%s14581_s3 + $0x748] sm:$0xff] }
 0x27c   : > { %v10161_v59 = vpack.c.bf16 %v4890_v17, %v4889_v36  ;;  %v4894_v1 = vld [vmem:[%s14581_s3 + $0x258] sm:$0xff]  ;;  %v8250_v17 = vld [vmem:[%s14581_s3 + $0x6e0] sm:$0xff] }
 0x27d   : > { %v8233_v36 = vld [vmem:[%s14581_s3 + $0x658] sm:$0xff] }
 0x27e   : > { %10128 = vmatpush3.bf16.msra.mxu0 %v10127_v3  ;;  %v10169_v3 = vpack.c.bf16 %v4894_v1, %v4893_v43  ;;  %v8252_v43 = vld [vmem:[%s14581_s3 + $0x6f0] sm:$0xff]  ;;  %v8253_v1 = vld [vmem:[%s14581_s3 + $0x6f8] sm:$0xff] }
 0x27f   : > { %10130 = vmatprep.subr.bf16.mxu0 %v10129_v4  ;;  %v4895_v4 = vld [vmem:[%s14581_s3 + $0x260] sm:$0xff] }
 0x280   : > { %v10173_v34 = vpack.c.bf16 %v4896_v10, %v4895_v4  ;;  %v10241_v4 = vpack.c.bf16 %v8253_v1, %v8252_v43  ;;  %v8236_v10 = vld [vmem:[%s14581_s3 + $0x670] sm:$0xff] }
 0x281   : > { %v8344_v1 = vld [vmem:[%s14581_s3 + $0x9d0] sm:$0xff] }
 0x282   : > { %10132 = vmatpush3.bf16.msra.mxu0 %v10131_v47  ;;  %v10177_v47 = vpack.c.bf16 %v4898_v46, %v4897_v42  ;;  %v8254_v42 = vld [vmem:[%s14581_s3 + $0x700] sm:$0xff]  ;;  %v8255_v46 = vld [vmem:[%s14581_s3 + $0x708] sm:$0xff] }
 0x283   : > { %10134 = vmatprep.subr.bf16.mxu0 %v10133_v29  ;;  %v8238_v29 = vld [vmem:[%s14581_s3 + $0x680] sm:$0xff] }
 0x284   : > { %v10213_v24 = vpack.c.bf16 %v8239_v63, %v8238_v29  ;;  %v10245_v29 = vpack.c.bf16 %v8255_v46, %v8254_v42  ;;  %v8256_v63 = vld [vmem:[%s14581_s3 + $0x710] sm:$0xff] }
 0x286   : > { %10136 = vmatpush3.bf16.msra.mxu0 %v10135_v7  ;;  %v8240_v7 = vld [vmem:[%s14581_s3 + $0x690] sm:$0xff] }
 0x287   : > { %10138 = vmatprep.subr.bf16.mxu0 %v10137_v39  ;;  %v8241_v39 = vld [vmem:[%s14581_s3 + $0x698] sm:$0xff] }
 0x288   : > { %v10217_v11 = vpack.c.bf16 %v8241_v39, %v8240_v7  ;;  %v8259_v7 = vld [vmem:[%s14581_s3 + $0x728] sm:$0xff] }
 0x289   : > { %v10253_v39 = vpack.c.bf16 %v8259_v7, %v8258_v20 }
 0x28a   : > { %10140 = vmatpush3.bf16.msra.mxu0 %v10139_v31  ;;  %v4818_v31 = vld [vmem:[#allocation2 + $0x48] sm:$0xff] }
 0x28b   : > { %10142 = vmatprep.subr.bf16.mxu0 %v10141_v60  ;;  %v8242_v60 = vld [vmem:[%s14581_s3 + $0x6a0] sm:$0xff] }
 0x28c   : > { %v10221_v18 = vpack.c.bf16 %v8243_v8, %v8242_v60  ;;  %v8266_v60 = vld [vmem:[%s14581_s3 + $0x760] sm:$0xff]  ;;  %v8267_v8 = vld [vmem:[%s14581_s3 + $0x768] sm:$0xff] }
 0x28e   : > { %10144 = vmatpush3.bf16.msra.mxu0 %v10143_v9  ;;  %v8227_v9 = vld [vmem:[%s14581_s3 + $0x628] sm:$0xff] }
 0x28f   : > { %10146 = vmatprep.subr.bf16.mxu0 %v10145_v54  ;;  %v8244_v54 = vld [vmem:[%s14581_s3 + $0x6b0] sm:$0xff] }
 0x290   : > { %v10225_v45 = vpack.c.bf16 %v8245_v50, %v8244_v54  ;;  %v8269_v54 = vld [vmem:[%s14581_s3 + $0x778] sm:$0xff] }
 0x292   : > { %10148 = vmatpush3.bf16.msra.mxu0 %v10147_v13  ;;  %v8246_v13 = vld [vmem:[%s14581_s3 + $0x6c0] sm:$0xff] }
 0x293   : > { %10150 = vmatprep.subr.bf16.mxu0 %v10149_v30 }
 0x295   : > { %5411 = vmatmul.mubr.f32.vlgmr.msra.gmra.mrb[26].mxu0 %v4811_v33  ;;  %v8231_v33 = vld [vmem:[%s14581_s3 + $0x648] sm:$0xff] }
 0x296   : > { %5415 = vmatprep.mubr.f32.mxu0 %v4817_v41  ;;  %10152 = vmatpush3.bf16.msra.mxu0 %v10149_v30  ;;  %v8247_v30 = vld [vmem:[%s14581_s3 + $0x6c8] sm:$0xff] }
 0x297   : > { %10154 = vmatprep.subr.bf16.mxu0 %v10153_v5  ;;  %v10229_v6 = vpack.c.bf16 %v8247_v30, %v8246_v13 }
 0x299   : > { %5416 = vmatmul.mubr.f32.gmra.mrb[28].mxu0 %v4816_v52  ;;  %v8232_v52 = vld [vmem:[%s14581_s3 + $0x650] sm:$0xff] }
 0x29a   : > { %10156 = vmatpush3.bf16.msra.mxu0 %v10153_v5  ;;  %9215 = vmatprep.mubr.f32.mxu0 %v4813_v26  ;;  %v8230_v5 = vld [vmem:[%s14581_s3 + $0x640] sm:$0xff]  ;;  %v8251_v26 = vld [vmem:[%s14581_s3 + $0x6e8] sm:$0xff] }
 0x29b   : > { %10158 = vmatprep.subr.bf16.mxu0 %v10157_v12  ;;  %v10231_v41 = vpack.c.bf16 %v8231_v33, %v8230_v5  ;;  %v10237_v19 = vpack.c.bf16 %v8251_v26, %v8250_v17  ;;  %v8338_v17 = vld [vmem:[%s14581_s3 + $0x9a0] sm:$0xff]  ;;  %v8339_v26 = vld [vmem:[%s14581_s3 + $0x9a8] sm:$0xff] }
 0x29e   : > { %10160 = vmatpush3.bf16.msra.mxu0 %v10157_v12  ;;  %v10233_v12 = vpack.c.bf16 %v8249_v32, %v8248_v35 }
 0x29f   : > { %10162 = vmatprep.subr.bf16.mxu0 %v10161_v59 }
 0x2a2   : > { %10164 = vmatpush3.bf16.msra.mxu0 %v10161_v59  ;;  %v10235_v59 = vpack.c.bf16 %v8233_v36, %v8232_v52  ;;  %v8337_v52 = vld [vmem:[%s14581_s3 + $0x998] sm:$0xff] }
 0x2a3   : > { %10166 = vmatprep.subr.bf16.mxu0 %v10165_v57 }
 0x2a6   : > { %10168 = vmatpush3.bf16.msra.mxu0 %v10165_v57  ;;  %v8235_v57 = vld [vmem:[%s14581_s3 + $0x668] sm:$0xff] }
 0x2a7   : > { %10170 = vmatprep.subr.bf16.mxu0 %v10169_v3 }
 0x2aa   : > { %10172 = vmatpush3.bf16.msra.mxu0 %v10169_v3  ;;  %v10239_v3 = vpack.c.bf16 %v8235_v57, %v8234_v25  ;;  %v8341_v25 = vld [vmem:[%s14581_s3 + $0x9b8] sm:$0xff] }
 0x2ab   : > { %10174 = vmatprep.subr.bf16.mxu0 %v10173_v34 }
 0x2ae   : > { %10176 = vmatpush3.bf16.msra.mxu0 %v10173_v34  ;;  %v8237_v34 = vld [vmem:[%s14581_s3 + $0x678] sm:$0xff] }
 0x2af   : > { %10178 = vmatprep.subr.bf16.mxu0 %v10177_v47 }
 0x2b2   : > { %10180 = vmatpush3.bf16.msra.mxu0 %v10177_v47  ;;  %v10243_v47 = vpack.c.bf16 %v8237_v34, %v8236_v10  ;;  %v8346_v10 = vld [vmem:[%s14581_s3 + $0x9e0] sm:$0xff]  ;;  %v8347_v34 = vld [vmem:[%s14581_s3 + $0x9e8] sm:$0xff] }
 0x2b3   : > { %10214 = vmatprep.subr.bf16.mxu0 %v10213_v24  ;;  %v8257_v24 = vld [vmem:[%s14581_s3 + $0x718] sm:$0xff]  ;;  %v10365_v42 = vpack.c.bf16 %v8347_v34, %v8346_v10 }
 0x2b4   : > { %v10249_v21 = vpack.c.bf16 %v8257_v24, %v8256_v63  ;;  %v8349_v63 = vld [vmem:[%s14581_s3 + $0x9f8] sm:$0xff] }
 0x2b5   : > { %9216 = vmatmul.mubr.f32.vlgmr.msra.gmra.mrb[20].mxu0 %v4818_v31 }
 0x2b6   : > { %10216 = vmatpush3.bf16.msra.mxu0 %v10215_v58  ;;  %5772 = vmatprep.mubr.f32.mxu0 %v13069_v38  ;;  %v10223_v38 = vpack.c.bf16 %v8227_v9, %v8226_v62  ;;  %v8260_v58 = vld [vmem:[%s14581_s3 + $0x730] sm:$0xff] }
 0x2b7   : > { %10218 = vmatprep.subr.bf16.mxu0 %v10217_v11  ;;  %v8261_v11 = vld [vmem:[%s14581_s3 + $0x738] sm:$0xff]  ;;  %v8268_v9 = vld [vmem:[%s14581_s3 + $0x770] sm:$0xff] }
 0x2b8   : > { %v10273_v44 = vpack.c.bf16 %v8269_v54, %v8268_v9  ;;  %v8401_v9 = vld [vmem:[%s14581_s3 + $0xb98] sm:$0xff] }
 0x2ba   : > { %10220 = vmatpush3.bf16.msra.mxu0 %v10219_v37  ;;  %v10269_v37 = vpack.c.bf16 %v8267_v8, %v8266_v60  ;;  %v8382_v8 = vld [vmem:[%s14581_s3 + $0xb00] sm:$0xff] }
 0x2bb   : > { %10222 = vmatprep.subr.bf16.mxu0 %v10221_v18 }
 0x2be   : > { %10224 = vmatpush3.bf16.msra.mxu0 %v10223_v38 }
 0x2bf   : > { %10226 = vmatprep.subr.bf16.mxu0 %v10225_v45 }
 0x2c2   : > { %10228 = vmatpush3.bf16.msra.mxu0 %v10227_v23  ;;  %v8334_v23 = vld [vmem:[%s14581_s3 + $0x980] sm:$0xff] }
 0x2c3   : > { %10230 = vmatprep.subr.bf16.mxu0 %v10229_v6  ;;  %v8335_v6 = vld [vmem:[%s14581_s3 + $0x988] sm:$0xff] }
 0x2c6   : > { %10232 = vmatpush3.bf16.msra.mxu0 %v10231_v41  ;;  %v10341_v41 = vpack.c.bf16 %v8335_v6, %v8334_v23  ;;  %v8386_v6 = vld [vmem:[%s14581_s3 + $0xb20] sm:$0xff] }
 0x2c7   : > { %10234 = vmatprep.subr.bf16.mxu0 %v10233_v12  ;;  %v8336_v12 = vld [vmem:[%s14581_s3 + $0x990] sm:$0xff] }
 0x2c8   : > { %v10345_v36 = vpack.c.bf16 %v8337_v52, %v8336_v12  ;;  %v8389_v12 = vld [vmem:[%s14581_s3 + $0xb38] sm:$0xff]  ;;  %v8406_v52 = vld [vmem:[%s14581_s3 + $0xbc0] sm:$0xff] }
 0x2ca   : > { %10236 = vmatpush3.bf16.msra.mxu0 %v10235_v59  ;;  %v10349_v59 = vpack.c.bf16 %v8339_v26, %v8338_v17 }
 0x2cb   : > { %10238 = vmatprep.subr.bf16.mxu0 %v10237_v19  ;;  %v8340_v19 = vld [vmem:[%s14581_s3 + $0x9b0] sm:$0xff] }
 0x2cc   : > { %v10353_v57 = vpack.c.bf16 %v8341_v25, %v8340_v19  ;;  %v8391_v19 = vld [vmem:[%s14581_s3 + $0xb48] sm:$0xff]  ;;  %v8408_v25 = vld [vmem:[%s14581_s3 + $0xbd0] sm:$0xff] }
 0x2ce   : > { %10240 = vmatpush3.bf16.msra.mxu0 %v10239_v3  ;;  %v8345_v3 = vld [vmem:[%s14581_s3 + $0x9d8] sm:$0xff] }
 0x2cf   : > { %10242 = vmatprep.subr.bf16.mxu0 %v10241_v4  ;;  %v10361_v4 = vpack.c.bf16 %v8345_v3, %v8344_v1  ;;  %v8393_v1 = vld [vmem:[%s14581_s3 + $0xb58] sm:$0xff]  ;;  %v8410_v3 = vld [vmem:[%s14581_s3 + $0xbe0] sm:$0xff] }
 0x2d2   : > { %10244 = vmatpush3.bf16.msra.mxu0 %v10243_v47 }
 0x2d3   : > { %10246 = vmatprep.subr.bf16.mxu0 %v10245_v29 }
 0x2d5   : > { %5773 = vmatmul.mubr.f32.vlgmr.msra.gmra.mrb[30].mxu0 %v13087_v40  ;;  %v10257_v40 = vpack.c.bf16 %v8261_v11, %v8260_v58 }
 0x2d6   : > { %5777 = vmatprep.mubr.f32.mxu0 %v13073_v49  ;;  %10248 = vmatpush3.bf16.msra.mxu0 %v10245_v29  ;;  %v8262_v49 = vld [vmem:[%s14581_s3 + $0x740] sm:$0xff]  ;;  %v8348_v29 = vld [vmem:[%s14581_s3 + $0x9f0] sm:$0xff] }
 0x2d7   : > { %10250 = vmatprep.subr.bf16.mxu0 %v10249_v21  ;;  %v10261_v53 = vpack.c.bf16 %v8263_v51, %v8262_v49  ;;  %v8398_v49 = vld [vmem:[%s14581_s3 + $0xb80] sm:$0xff]  ;;  %v8399_v51 = vld [vmem:[%s14581_s3 + $0xb88] sm:$0xff] }
 0x2d8   : > { %v10405_v60 = vpack.c.bf16 %v8399_v51, %v8398_v49  ;;  %v8414_v49 = vld [vmem:[%s14581_s3 + $0xc00] sm:$0xff]  ;;  %v8415_v51 = vld [vmem:[%s14581_s3 + $0xc08] sm:$0xff] }
 0x2d9   : > { %5778 = vmatmul.mubr.f32.gmra.mrb[32].mxu0 %v13090_v55  ;;  %v8264_v55 = vld [vmem:[%s14581_s3 + $0x750] sm:$0xff] }
 0x2da   : > { %10252 = vmatpush3.bf16.msra.mxu0 %v10249_v21  ;;  %9250 = vmatprep.mubr.f32.mxu0 %v13099_v27  ;;  %v8265_v27 = vld [vmem:[%s14581_s3 + $0x758] sm:$0xff] }
 0x2db   : > { %10254 = vmatprep.subr.bf16.mxu0 %v10253_v39  ;;  %v10265_v31 = vpack.c.bf16 %v8265_v27, %v8264_v55 }
 0x2de   : > { %10256 = vmatpush3.bf16.msra.mxu0 %v10253_v39  ;;  %v10369_v39 = vpack.c.bf16 %v8349_v63, %v8348_v29  ;;  %v8413_v29 = vld [vmem:[%s14581_s3 + $0xbf8] sm:$0xff] }
 0x2df   : > { %10258 = vmatprep.subr.bf16.mxu0 %v10257_v40 }
 0x2e2   : > { %10260 = vmatpush3.bf16.msra.mxu0 %v10257_v40 }
 0x2e3   : > { %10262 = vmatprep.subr.bf16.mxu0 %v10261_v53 }
 0x2e6   : > { %10264 = vmatpush3.bf16.msra.mxu0 %v10261_v53 }
 0x2e7   : > { %10266 = vmatprep.subr.bf16.mxu0 %v10265_v31  ;;  %v8584_v18 = vpop.f32.mrb[12].mxu0 }
 0x2e8   : > { %v8772_v62 = vpop.f32.mrb[28].mxu1  ;;  %v8585_v50 = vpop.f32.mrb[13].mxu0 }
 0x2e9   : > { %v8773_v38 = vpop.f32.mrb[29].mxu1  ;;  %v8586_v45 = vadd.f32 %v8585_v50, %v8584_v18 }
 0x2ea   : > { %v13833_v2 = vadd.f32 %v8773_v38, %v8772_v62  ;;  %10268 = vmatpush3.bf16.msra.mxu0 %v10265_v31  ;;  %v8400_v62 = vld [vmem:[%s14581_s3 + $0xb90] sm:$0xff] }
 0x2eb   : > { %10270 = vmatprep.subr.bf16.mxu0 %v10269_v37  ;;  %v10409_v50 = vpack.c.bf16 %v8401_v9, %v8400_v62  ;;  %v8384_v38 = vld [vmem:[%s14581_s3 + $0xb10] sm:$0xff]  ;;  %v8417_v9 = vld [vmem:[%s14581_s3 + $0xc18] sm:$0xff] }
 0x2ec   : > { %v8775_v30 = vpop.f32.mrb[30].mxu1  ;;  %v8416_v62 = vld [vmem:[%s14581_s3 + $0xc10] sm:$0xff] }
 0x2ed   : > { %v8587_v13 = vpop.f32.mrb[14].mxu0  ;;  %v8776_v33 = vpop.f32.mrb[31].mxu1 }
 0x2ee   : > { %v8588_v5 = vpop.f32.mrb[15].mxu0  ;;  %v13841_v32 = vadd.f32 %v8776_v33, %v8775_v30  ;;  %10272 = vmatpush3.bf16.msra.mxu0 %v10269_v37  ;;  %v8383_v37 = vld [vmem:[%s14581_s3 + $0xb08] sm:$0xff]  ;;  %v8404_v33 = vld [vmem:[%s14581_s3 + $0xbb0] sm:$0xff] }
 0x2ef   : > { %v8589_v35 = vadd.f32 %v8588_v5, %v8587_v13  ;;  %10274 = vmatprep.subr.bf16.mxu0 %v10273_v44  ;;  %v10407_v54 = vpack.c.bf16 %v8383_v37, %v8382_v8  ;;  %v8403_v13 = vld [vmem:[%s14581_s3 + $0xba8] sm:$0xff]  ;;  %v10437_v37 = vpack.c.bf16 %v8415_v51, %v8414_v49  ;;  %v8462_v49 = vld [vmem:[%s14583_s5 + $0x118] sm:$0xff] }
 0x2f0   : > { %v8387_v5 = vld [vmem:[%s14581_s3 + $0xb28] sm:$0xff] }
 0x2f2   : > { %10276 = vmatpush3.bf16.msra.mxu0 %v10273_v44  ;;  %v8402_v44 = vld [vmem:[%s14581_s3 + $0xba0] sm:$0xff] }
 0x2f3   : > { %10342 = vmatprep.subr.bf16.mxu0 %v10341_v41  ;;  %v10413_v23 = vpack.c.bf16 %v8403_v13, %v8402_v44  ;;  %v8421_v44 = vld [vmem:[%s14581_s3 + $0xc38] sm:$0xff]  ;;  %v8423_v13 = vld [vmem:[%s14581_s3 + $0xc48] sm:$0xff] }
 0x2f5   : > { %9251 = vmatmul.mubr.f32.vlgmr.msra.gmra.mrb[20].mxu0 %v13102_v28  ;;  %v8342_v28 = vld [vmem:[%s14581_s3 + $0x9c0] sm:$0xff] }
 0x2f6   : > { %10344 = vmatpush3.bf16.msra.mxu0 %v10341_v41  ;;  %9285 = vmatprep.mubr.f32.mxu0 %v13105_v56  ;;  %v8343_v56 = vld [vmem:[%s14581_s3 + $0x9c8] sm:$0xff]  ;;  %v8388_v41 = vld [vmem:[%s14581_s3 + $0xb30] sm:$0xff] }
 0x2f7   : > { %10346 = vmatprep.subr.bf16.mxu0 %v10345_v36  ;;  %v10357_v43 = vpack.c.bf16 %v8343_v56, %v8342_v28  ;;  %v10419_v17 = vpack.c.bf16 %v8389_v12, %v8388_v41 }
 0x2fa   : > { %10348 = vmatpush3.bf16.msra.mxu0 %v10345_v36  ;;  %v8407_v36 = vld [vmem:[%s14581_s3 + $0xbc8] sm:$0xff] }
 0x2fb   : > { %10350 = vmatprep.subr.bf16.mxu0 %v10349_v59  ;;  %v10421_v26 = vpack.c.bf16 %v8407_v36, %v8406_v52 }
 0x2fe   : > { %10352 = vmatpush3.bf16.msra.mxu0 %v10349_v59  ;;  %v8390_v59 = vld [vmem:[%s14581_s3 + $0xb40] sm:$0xff] }
 0x2ff   : > { %10354 = vmatprep.subr.bf16.mxu0 %v10353_v57  ;;  %v10423_v28 = vpack.c.bf16 %v8391_v19, %v8390_v59 }
 0x302   : > { %10356 = vmatpush3.bf16.msra.mxu0 %v10353_v57  ;;  %v8409_v57 = vld [vmem:[%s14581_s3 + $0xbd8] sm:$0xff] }
 0x303   : > { %10358 = vmatprep.subr.bf16.mxu0 %v10357_v43  ;;  %v10425_v56 = vpack.c.bf16 %v8409_v57, %v8408_v25 }
 0x306   : > { %10360 = vmatpush3.bf16.msra.mxu0 %v10357_v43  ;;  %v8392_v43 = vld [vmem:[%s14581_s3 + $0xb50] sm:$0xff] }
 0x307   : > { %10362 = vmatprep.subr.bf16.mxu0 %v10361_v4  ;;  %v8622_v46 = vpop.f32.mrb[16].mxu0  ;;  %v10427_v10 = vpack.c.bf16 %v8393_v1, %v8392_v43 }
 0x308   : > { %v8866_v47 = vpop.f32.mrb[32].mxu1  ;;  %v8623_v24 = vpop.f32.mrb[17].mxu0 }
 0x309   : > { %v8867_v21 = vpop.f32.mrb[33].mxu1  ;;  %v8624_v20 = vadd.f32 %v8623_v24, %v8622_v46  ;;  %v8395_v46 = vld [vmem:[%s14581_s3 + $0xb68] sm:$0xff] }
 0x30a   : > { %v13887_v7 = vadd.f32 %v8867_v21, %v8866_v47  ;;  %10364 = vmatpush3.bf16.msra.mxu0 %v10361_v4  ;;  %v8411_v4 = vld [vmem:[%s14581_s3 + $0xbe8] sm:$0xff]  ;;  %v8412_v47 = vld [vmem:[%s14581_s3 + $0xbf0] sm:$0xff] }
 0x30b   : > { %10366 = vmatprep.subr.bf16.mxu0 %v10365_v42  ;;  %v13889_v58 = vadd.f32 %v8624_v20, %v8586_v45  ;;  %v8625_v11 = vpop.f32.mrb[18].mxu0  ;;  %v8385_v45 = vld [vmem:[%s14581_s3 + $0xb18] sm:$0xff]  ;;  %v10429_v34 = vpack.c.bf16 %v8411_v4, %v8410_v3 }
 0x30c   : > { %v8869_v40 = vpop.f32.mrb[34].mxu1  ;;  %v8626_v53 = vpop.f32.mrb[19].mxu0  ;;  %v10411_v30 = vpack.c.bf16 %v8385_v45, %v8384_v38  ;;  %v8419_v38 = vld [vmem:[%s14581_s3 + $0xc28] sm:$0xff] }
 0x30d   : > { %v8870_v55 = vpop.f32.mrb[35].mxu1  ;;  %v8627_v27 = vadd.f32 %v8626_v53, %v8625_v11  ;;  %v8396_v11 = vld [vmem:[%s14581_s3 + $0xb70] sm:$0xff] }
 0x30e   : > { %v13897_v31 = vadd.f32 %v8870_v55, %v8869_v40  ;;  %10368 = vmatpush3.bf16.msra.mxu0 %v10365_v42  ;;  %v8394_v42 = vld [vmem:[%s14581_s3 + $0xb60] sm:$0xff]  ;;  %v8397_v40 = vld [vmem:[%s14581_s3 + $0xb78] sm:$0xff] }
 0x30f   : > { %10370 = vmatprep.subr.bf16.mxu0 %v10369_v39  ;;  %v13905_v18 = vadd.f32 %v8627_v27, %v8589_v35  ;;  %v10431_v21 = vpack.c.bf16 %v8395_v46, %v8394_v42 }
 0x312   : > { %10372 = vmatpush3.bf16.msra.mxu0 %v10369_v39  ;;  %v10433_v39 = vpack.c.bf16 %v8413_v29, %v8412_v47  ;;  %v8431_v29 = vld [vmem:[%s14583_s5 + $0x40] sm:$0xff] }
 0x313   : > { %10406 = vmatprep.subr.bf16.mxu0 %v10405_v60  ;;  %v10435_v60 = vpack.c.bf16 %v8397_v40, %v8396_v11  ;;  %v8461_v40 = vld [vmem:[%s14583_s5 + $0x110] sm:$0xff] }
 0x315   : > { %9286 = vmatmul.mubr.f32.vlgmr.msra.gmra.mrb[20].mxu0 %v13108_v48  ;;  %v8405_v48 = vld [vmem:[%s14581_s3 + $0xbb8] sm:$0xff] }
 0x316   : > { %10408 = vmatpush3.bf16.msra.mxu0 %v10407_v54  ;;  %6500 = vmatprep.mubr.f32.mxu0 %v13129_v15  ;;  %v10415_v15 = vpack.c.bf16 %v8387_v5, %v8386_v6  ;;  %v10417_v35 = vpack.c.bf16 %v8405_v48, %v8404_v33  ;;  %v8426_v6 = vld [vmem:[%s14581_s3 + $0xc60] sm:$0xff]  ;;  %v8427_v5 = vld [vmem:[%s14581_s3 + $0xc68] sm:$0xff] }
 0x317   : > { %10410 = vmatprep.subr.bf16.mxu0 %v10409_v50  ;;  %v8418_v50 = vld [vmem:[%s14581_s3 + $0xc20] sm:$0xff]  ;;  %v10461_v33 = vpack.c.bf16 %v8427_v5, %v8426_v6 }
 0x318   : > { %v10445_v45 = vpack.c.bf16 %v8419_v38, %v8418_v50 }
 0x31a   : > { %10412 = vmatpush3.bf16.msra.mxu0 %v10411_v30 }
 0x31b   : > { %10414 = vmatprep.subr.bf16.mxu0 %v10413_v23 }
 0x31e   : > { %10416 = vmatpush3.bf16.msra.mxu0 %v10415_v15  ;;  %v8428_v15 = vld [vmem:[%s14581_s3 + $0xc70] sm:$0xff] }
 0x31f   : > { %10418 = vmatprep.subr.bf16.mxu0 %v10417_v35  ;;  %v8429_v35 = vld [vmem:[%s14581_s3 + $0xc78] sm:$0xff] }
 0x322   : > { %10420 = vmatpush3.bf16.msra.mxu0 %v10419_v17  ;;  %v10465_v17 = vpack.c.bf16 %v8429_v35, %v8428_v15 }
 0x323   : > { %10422 = vmatprep.subr.bf16.mxu0 %v10421_v26 }
 0x326   : > { %10424 = vmatpush3.bf16.msra.mxu0 %v10423_v28 }
 0x327   : > { %10426 = vmatprep.subr.bf16.mxu0 %v10425_v56 }
 0x329   : > { %v8904_v63 = vpop.f32.mrb[36].mxu1 }
 0x32a   : > { %v8905_v24 = vpop.f32.mrb[37].mxu1  ;;  %10428 = vmatpush3.bf16.msra.mxu0 %v10427_v10 }
 0x32b   : > { %v8906_v20 = vadd.f32 %v8905_v24, %v8904_v63  ;;  %10430 = vmatprep.subr.bf16.mxu0 %v10429_v34  ;;  %v10930_v63 = vmov 0.0|0.0  }
 0x32c   : > { %10469 = vmatprep.subr.bf16.mxu1 %v10930_v63 }
 0x32d   : > { %v14000_v53 = vadd.f32 %v8906_v20, %v13887_v7  ;;  %v8907_v55 = vpop.f32.mrb[38].mxu1  ;;  %v10441_v7 = vpack.c.bf16 %v8417_v9, %v8416_v62  ;;  %v8433_v20 = vld [vmem:[%s14583_s5 + $0x50] sm:$0xff] }
 0x32e   : > { %v8908_v27 = vpop.f32.mrb[39].mxu1  ;;  %10432 = vmatpush3.bf16.msra.mxu0 %v10431_v21  ;;  %v8460_v21 = vld [vmem:[%s14583_s5 + $0x108] sm:$0xff] }
 0x32f   : > { %v8909_v8 = vadd.f32 %v8908_v27, %v8907_v55  ;;  %10434 = vmatprep.subr.bf16.mxu0 %v10433_v39  ;;  %v8434_v39 = vld [vmem:[%s14583_s5 + $0x58] sm:$0xff]  ;;  %v10521_v55 = vpack.c.bf16 %v8462_v49, %v8461_v40  ;;  %v8481_v40 = vld [vmem:[%s14583_s5 + $0x1a0] sm:$0xff]  ;;  %v8482_v49 = vld [vmem:[%s14583_s5 + $0x1a8] sm:$0xff] }
 0x330   : > { %v10473_v51 = vpack.c.bf16 %v8434_v39, %v8433_v20  ;;  %v6607_v39 = vld [vmem:[%s14583_s5 + $0x20] sm:$0xff] }
 0x331   : > { %v14009_v54 = vadd.f32 %v8909_v8, %v13897_v31  ;;  %v8420_v31 = vld [vmem:[%s14581_s3 + $0xc30] sm:$0xff] }
 0x332   : > { %10436 = vmatpush3.bf16.msra.mxu0 %v10435_v60 }
 0x333   : > { %10438 = vmatprep.subr.bf16.mxu0 %v10437_v37 }
 0x335   : > { %6501 = vmatmul.mubr.f32.vlgmr.msra.gmra.mrb[34].mxu0 %v13132_v0  ;;  %v10449_v0 = vpack.c.bf16 %v8421_v44, %v8420_v31  ;;  %v8435_v31 = vld [vmem:[%s14583_s5 + $0x60] sm:$0xff]  ;;  %v8436_v44 = vld [vmem:[%s14583_s5 + $0x68] sm:$0xff] }
 0x336   : > { %6505 = vmatprep.mubr.f32.mxu0 %v13144_v16  ;;  %10440 = vmatpush3.bf16.msra.mxu0 %v10437_v37  ;;  %v8422_v16 = vld [vmem:[%s14581_s3 + $0xc40] sm:$0xff] }
 0x337   : > { %10442 = vmatprep.subr.bf16.mxu0 %v10441_v7  ;;  %v10453_v30 = vpack.c.bf16 %v8423_v13, %v8422_v16  ;;  %v8464_v16 = vld [vmem:[%s14583_s5 + $0x128] sm:$0xff]  ;;  %v14109_v13 = vld [vmem:[#allocation2 + $0x50] sm:$0xff] }
 0x338   : > { %9339 = vmatprep.mubr.msk.f32.mxu1 %vm10931_vm14, %v14109_v13 }
 0x339   : > { %6506 = vmatmul.mubr.f32.gmra.mrb[36].mxu0 %v13149_v14  ;;  %v8424_v14 = vld [vmem:[%s14581_s3 + $0xc50] sm:$0xff] }
 0x33a   : > { %10444 = vmatpush3.bf16.msra.mxu0 %v10441_v7  ;;  %9320 = vmatprep.mubr.f32.mxu0 %v13152_v22  ;;  %v8425_v22 = vld [vmem:[%s14581_s3 + $0xc58] sm:$0xff] }
 0x33b   : > { %10446 = vmatprep.subr.bf16.mxu0 %v10445_v45  ;;  %v10457_v23 = vpack.c.bf16 %v8425_v22, %v8424_v14  ;;  %v8465_v22 = vld [vmem:[%s14583_s5 + $0x130] sm:$0xff] }
 0x33e   : > { %10448 = vmatpush3.bf16.msra.mxu0 %v10445_v45 }
 0x33f   : > { %10450 = vmatprep.subr.bf16.mxu0 %v10449_v0 }
 0x342   : > { %10452 = vmatpush3.bf16.msra.mxu0 %v10449_v0  ;;  %v10476_v0 = vpack.c.bf16 %v8436_v44, %v8435_v31 }
 0x343   : > { %10454 = vmatprep.subr.bf16.mxu0 %v10453_v30 }
 0x346   : > { %10456 = vmatpush3.bf16.msra.mxu0 %v10453_v30 }
 0x347   : > { %10458 = vmatprep.subr.bf16.mxu0 %v10457_v23 }
 0x348   : > { %v8678_v48 = vpop.f32.mrb[22].mxu0 }
 0x349   : > { %v8679_v41 = vpop.f32.mrb[23].mxu0 }
 0x34a   : > { %v8960_v12 = vpop.f32.mrb[40].mxu1  ;;  %v8680_v52 = vadd.f32 %v8679_v41, %v8678_v48  ;;  %10460 = vmatpush3.bf16.msra.mxu0 %v10457_v23  ;;  %v8466_v23 = vld [vmem:[%s14583_s5 + $0x138] sm:$0xff] }
 0x34b   : > { %v8961_v36 = vpop.f32.mrb[41].mxu1  ;;  %10462 = vmatprep.subr.bf16.mxu0 %v10461_v33 }
 0x34c   : > { %v10643_v26 = vadd.f32 %v8680_v52, %v13889_v58  ;;  %v14052_v59 = vadd.f32 %v8961_v36, %v8960_v12  ;;  %v8681_v19 = vpop.f32.mrb[24].mxu0 }
 0x34d   : > { %v8682_v25 = vpop.f32.mrb[25].mxu0 }
 0x34e   : > { %v8963_v57 = vpop.f32.mrb[42].mxu1  ;;  %v8683_v28 = vadd.f32 %v8682_v25, %v8681_v19  ;;  %10464 = vmatpush3.bf16.msra.mxu0 %v10461_v33  ;;  %v10527_v33 = vpack.c.bf16 %v8466_v23, %v8465_v22  ;;  %v8445_v22 = vld [vmem:[%s14583_s5 + $0xa0] sm:$0xff]  ;;  %v8446_v23 = vld [vmem:[%s14583_s5 + $0xa8] sm:$0xff] }
 0x34f   : > { %v8964_v56 = vpop.f32.mrb[43].mxu1  ;;  %10466 = vmatprep.subr.bf16.mxu0 %v10465_v17 }
 0x350   : > { %v10637_v43 = vadd.f32 %v8683_v28, %v13905_v18  ;;  %v14055_v1 = vadd.f32 %v8964_v56, %v8963_v57  ;;  %v8432_v18 = vld [vmem:[%s14583_s5 + $0x48] sm:$0xff]  ;;  %v14133_v57 = vld [vmem:[%s14582_s4] ss:$0 sm:$0xff] }
 0x351   : > { %v10470_v24 = vpack.c.bf16 %v8432_v18, %v8431_v29  ;;  %v6606_v18 = vld [vmem:[%s14583_s5 + $0x18] sm:$0xff] }
 0x352   : > { %10468 = vmatpush3.bf16.msra.mxu0 %v10465_v17 }
 0x353   : > { %10517 = vmatprep.subr.bf16.mxu0 %v10930_v63  ;;  %10471 = vmatpush3.bf16.msra.mxu1 %v10470_v24  ;;  %v8480_v24 = vld [vmem:[%s14583_s5 + $0x198] sm:$0xff] }
 0x354   : > { %10472 = vmatprep.subr.bf16.mxu1 %v10930_v63 }
 0x355   : > { %9321 = vmatmul.mubr.f32.vlgmr.msra.gmra.mrb[20].mxu0 %v13155_v61  ;;  %v8459_v61 = vld [vmem:[%s14583_s5 + $0x100] sm:$0xff] }
 0x356   : > { %v10518_v11 = vpack.c.bf16 %v8460_v21, %v8459_v61  ;;  %9415 = vmatprep.mubr.msk.f32.mxu0 %vm10931_vm14, %v14109_v13  ;;  %v8479_v61 = vld [vmem:[%s14583_s5 + $0x190] sm:$0xff] }
 0x357   : > { %10474 = vmatpush3.bf16.msra.mxu1 %v10473_v51  ;;  %v10545_v20 = vpack.c.bf16 %v8480_v24, %v8479_v61 }
 0x358   : > { %10519 = vmatpush3.bf16.msra.mxu0 %v10518_v11  ;;  %10475 = vmatprep.subr.bf16.mxu1 %v10930_v63  ;;  %v6608_v11 = vld [vmem:[%s14583_s5 + $0x28] sm:$0xff] }
 0x359   : > { %10520 = vmatprep.subr.bf16.mxu0 %v10930_v63  ;;  %v10488_v51 = vpack.c.bf16 %v6608_v11, %v6607_v39  ;;  %v8519_v39 = vld [vmem:[%s14583_s5 + $0x2b0] sm:$0xff]  ;;  %v8520_v11 = vld [vmem:[%s14583_s5 + $0x2b8] sm:$0xff] }
 0x35b   : > { %10477 = vmatpush3.bf16.msra.mxu1 %v10476_v0 }
 0x35c   : > { %10522 = vmatpush3.bf16.msra.mxu0 %v10521_v55  ;;  %10478 = vmatprep.subr.bf16.mxu1 %v10930_v63  ;;  %v10548_v55 = vpack.c.bf16 %v8482_v49, %v8481_v40  ;;  %v10599_v49 = vpack.c.bf16 %v8520_v11, %v8519_v39  ;;  %v8524_v39 = vld [vmem:[%s14583_s5 + $0x2d0] sm:$0xff]  ;;  %v8525_v11 = vld [vmem:[%s14583_s5 + $0x2d8] sm:$0xff] }
 0x35d   : > { %10523 = vmatprep.subr.bf16.mxu0 %v10930_v63 }
 0x368   : > { %v8716_v3 = vpop.f32.mrb[26].mxu0 }
 0x369   : > { %v8717_v4 = vpop.f32.mrb[27].mxu0 }
 0x36a   : > { %v8718_v10 = vadd.f32 %v8717_v4, %v8716_v3  ;;  %v8477_v3 = vld [vmem:[%s14583_s5 + $0x180] sm:$0xff]  ;;  %v8478_v4 = vld [vmem:[%s14583_s5 + $0x188] sm:$0xff] }
 0x36c   : > { %v10644_v58 = vadd.f32 %v10643_v26, %v8718_v10  ;;  %v8719_v34 = vpop.f32.mrb[28].mxu0 }
 0x36d   : > { %v8720_v42 = vpop.f32.mrb[29].mxu0 }
 0x36e   : > { %v8721_v46 = vadd.f32 %v8720_v42, %v8719_v34  ;;  %v10542_v42 = vpack.c.bf16 %v8478_v4, %v8477_v3  ;;  %v8515_v3 = vld [vmem:[%s14583_s5 + $0x290] sm:$0xff]  ;;  %v8516_v4 = vld [vmem:[%s14583_s5 + $0x298] sm:$0xff] }
 0x370   : > { %v10638_v47 = vadd.f32 %v10637_v43, %v8721_v46  ;;  %v6605_v46 = vld [vmem:[%s14583_s5 + $0x10] sm:$0xff] }
 0x371   : > { %v10485_v21 = vpack.c.bf16 %v6606_v18, %v6605_v46  ;;  %v8454_v46 = vld [vmem:[%s14583_s5 + $0xe0] sm:$0xff]  ;;  %v8518_v18 = vld [vmem:[%s14583_s5 + $0x2a8] sm:$0xff] }
 0x3a8   : > { %v8810_v27 = vpop.f32.mrb[30].mxu0 }
 0x3a9   : > { %v8811_v60 = vpop.f32.mrb[31].mxu0 }
 0x3aa   : > { %v8812_v8 = vadd.f32 %v8811_v60, %v8810_v27  ;;  %v6609_v27 = vld [vmem:[%s14583_s5 + $0x30] sm:$0xff]  ;;  %v6610_v60 = vld [vmem:[%s14583_s5 + $0x38] sm:$0xff] }
 0x3ac   : > { %v5775_v37 = vadd.f32 %v8812_v8, %v13833_v2  ;;  %v8813_v62 = vpop.f32.mrb[32].mxu0  ;;  %v8463_v2 = vld [vmem:[%s14583_s5 + $0x120] sm:$0xff]  ;;  %v8483_v8 = vld [vmem:[%s14583_s5 + $0x1b0] sm:$0xff] }
 0x3ad   : > { %v8814_v9 = vpop.f32.mrb[33].mxu0  ;;  %v10524_v14 = vpack.c.bf16 %v8464_v16, %v8463_v2  ;;  %v8443_v2 = vld [vmem:[%s14583_s5 + $0x90] sm:$0xff]  ;;  %v8444_v16 = vld [vmem:[%s14583_s5 + $0x98] sm:$0xff] }
 0x3ae   : > { %v10645_v7 = vadd.f32 %v10644_v58, %v5775_v37  ;;  %v8815_v50 = vadd.f32 %v8814_v9, %v8813_v62  ;;  %v8484_v37 = vld [vmem:[%s14583_s5 + $0x1b8] sm:$0xff]  ;;  %v10491_v62 = vpack.c.bf16 %v6610_v60, %v6609_v27  ;;  %v8531_v27 = vld [vmem:[%s14583_s5 + $0x300] sm:$0xff]  ;;  %v8532_v60 = vld [vmem:[%s14583_s5 + $0x308] sm:$0xff] }
 0x3af   : > { %10525 = vmatpush3.bf16.msra.mxu0 %v10524_v14  ;;  %v10551_v9 = vpack.c.bf16 %v8484_v37, %v8483_v8  ;;  %v10614_v37 = vpack.c.bf16 %v8532_v60, %v8531_v27  ;;  %v8528_v27 = vld [vmem:[%s14583_s5 + $0x2f0] sm:$0xff]  ;;  %v8529_v60 = vld [vmem:[%s14583_s5 + $0x2f8] sm:$0xff] }
 0x3b0   : > { %v5780_v38 = vadd.f32 %v8815_v50, %v13841_v32  ;;  %v10646_v45 = vadd.f32 %v10645_v7, %v14000_v53  ;;  %v8437_v32 = vld [vmem:[%s14583_s5 + $0x70] sm:$0xff]  ;;  %v8438_v53 = vld [vmem:[%s14583_s5 + $0x78] sm:$0xff]  ;;  %10526 = vmatprep.subr.bf16.mxu0 %v10930_v63  ;;  %v8441_v7 = vld [vmem:[%s14583_s5 + $0x80] sm:$0xff] }
 0x3b1   : > { %v10479_v6 = vpack.c.bf16 %v8438_v53, %v8437_v32  ;;  %v8442_v50 = vld [vmem:[%s14583_s5 + $0x88] sm:$0xff]  ;;  %v8497_v32 = vld [vmem:[%s14583_s5 + $0x210] sm:$0xff]  ;;  %v8498_v53 = vld [vmem:[%s14583_s5 + $0x218] sm:$0xff] }
 0x3b2   : > { %v10639_v30 = vadd.f32 %v10638_v47, %v5780_v38  ;;  %v8495_v38 = vld [vmem:[%s14583_s5 + $0x200] sm:$0xff]  ;;  %v10494_v31 = vpack.c.bf16 %v8442_v50, %v8441_v7  ;;  %v10569_v14 = vpack.c.bf16 %v8498_v53, %v8497_v32  ;;  %v8471_v50 = vld [vmem:[%s14583_s5 + $0x158] sm:$0xff]  ;;  %v8536_v32 = vld [vmem:[%s14583_s5 + $0x328] sm:$0xff] }
 0x3b3   : > { %10480 = vmatpush3.bf16.msra.mxu1 %v10479_v6  ;;  %10528 = vmatpush3.bf16.msra.mxu0 %v10527_v33  ;;  %v8499_v6 = vld [vmem:[%s14583_s5 + $0x220] sm:$0xff]  ;;  %v10500_v33 = vpack.c.bf16 %v8446_v23, %v8445_v22  ;;  %v8475_v22 = vld [vmem:[%s14583_s5 + $0x178] sm:$0xff]  ;;  %v8537_v23 = vld [vmem:[%s14583_s5 + $0x330] sm:$0xff] }
 0x3b4   : > { %v10640_v5 = vadd.f32 %v10639_v30, %v14009_v54  ;;  %10481 = vmatprep.subr.bf16.mxu1 %v10930_v63  ;;  %10541 = vmatprep.subr.bf16.mxu0 %v10930_v63  ;;  %v10497_v30 = vpack.c.bf16 %v8444_v16, %v8443_v2  ;;  %v8472_v2 = vld [vmem:[%s14583_s5 + $0x160] sm:$0xff] }
 0x3b5   : > { %v8535_v16 = vld [vmem:[%s14583_s5 + $0x320] sm:$0xff] }
 0x408   : > { %v8998_v48 = vpop.f32.mrb[34].mxu0 }
 0x409   : > { %v8999_v15 = vpop.f32.mrb[35].mxu0 }
 0x40a   : > { %v9000_v35 = vadd.f32 %v8999_v15, %v8998_v48  ;;  %v8447_v15 = vld [vmem:[%s14583_s5 + $0xb0] sm:$0xff] }
 0x40c   : > { %v6503_v41 = vadd.f32 %v9000_v35, %v14052_v59  ;;  %v9001_v12 = vpop.f32.mrb[36].mxu0  ;;  %v6603_v59 = vld [vmem:[%s14583_s5] sm:$0xff]  ;;  %v8448_v35 = vld [vmem:[%s14583_s5 + $0xb8] sm:$0xff] }
 0x40d   : > { %v9002_v52 = vpop.f32.mrb[37].mxu0 }
 0x40e   : > { %v9003_v54 = vadd.f32 %v9002_v52, %v9001_v12  ;;  %v10647_v36 = vadd.f32 %v10646_v45, %v6503_v41  ;;  %v8496_v45 = vld [vmem:[%s14583_s5 + $0x208] sm:$0xff]  ;;  %v8501_v41 = vld [vmem:[%s14583_s5 + $0x230] sm:$0xff]  ;;  %v8502_v12 = vld [vmem:[%s14583_s5 + $0x238] sm:$0xff] }
 0x40f   : > { %v10566_v44 = vpack.c.bf16 %v8496_v45, %v8495_v38  ;;  %v8533_v38 = vld [vmem:[%s14583_s5 + $0x310] sm:$0xff]  ;;  %v8534_v45 = vld [vmem:[%s14583_s5 + $0x318] sm:$0xff] }
 0x410   : > { %v6508_v17 = vadd.f32 %v9003_v54, %v14055_v1  ;;  %v6604_v1 = vld [vmem:[%s14583_s5 + $0x8] sm:$0xff]  ;;  %v10503_v54 = vpack.c.bf16 %v8448_v35, %v8447_v15 }
 0x411   : > { %v10482_v34 = vpack.c.bf16 %v6604_v1, %v6603_v59  ;;  %v8453_v1 = vld [vmem:[%s14583_s5 + $0xd8] sm:$0xff]  ;;  %v8487_v15 = vld [vmem:[%s14583_s5 + $0x1c8] sm:$0xff] }
 0x412   : > { %v10641_v26 = vadd.f32 %v10640_v5, %v6508_v17  ;;  %v8500_v5 = vld [vmem:[%s14583_s5 + $0x228] sm:$0xff]  ;;  %v8450_v17 = vld [vmem:[%s14583_s5 + $0xc0] sm:$0xff] }
 0x413   : > { %v10572_v48 = vpack.c.bf16 %v8500_v5, %v8499_v6  ;;  %v8538_v6 = vld [vmem:[%s14583_s5 + $0x338] sm:$0xff] }
 0x428   : > { %v9322_v19 = vpop.f32.mrb[20].mxu0 }
 0x429   : > { %v14128_v25 = vadd.f32 %v10641_v26, %v9322_v19  ;;  %v6577_v28 = vpop.f32.mrb[21].mxu0  ;;  %v8451_v26 = vld [vmem:[%s14583_s5 + $0xc8] sm:$0xff]  ;;  %v8513_v19 = vld [vmem:[%s14583_s5 + $0x280] sm:$0xff] }
 0x42a   : > { %v10648_v56 = vadd.f32 %v10647_v36, %v6577_v28  ;;  %v10575_v36 = vpack.c.bf16 %v8502_v12, %v8501_v41  ;;  %v10506_v28 = vpack.c.bf16 %v8451_v26, %v8450_v17  ;;  %v8490_v17 = vld [vmem:[%s14583_s5 + $0x1e0] sm:$0xff]  ;;  %v8491_v26 = vld [vmem:[%s14583_s5 + $0x1e8] sm:$0xff] }
 0x42b   : > { %v6596_v52 = vadd.f32 %v14128_v25, %v14133_v57  ;;  %v8514_v25 = vld [vmem:[%s14583_s5 + $0x288] sm:$0xff] }
 0x42c   : > { %v6595_v43 = vadd.f32 %v10648_v56, %v14133_v57  ;;  %v10590_v56 = vpack.c.bf16 %v8514_v25, %v8513_v19  ;;  %v10560_v19 = vpack.c.bf16 %v8491_v26, %v8490_v17  ;;  %v8492_v25 = vld [vmem:[%s14583_s5 + $0x1f0] sm:$0xff] }
 0x42d   : > { %v6600_v57 = vmul.f32 0.01, %v6596_v52  ;;  %vm6598_vm1 = vcmp.ge.f32.partialorder %v6596_v52, 0.0 }
 0x42e   : > { %vm6597_vm15 = vcmp.ge.f32.partialorder %v6595_v43, 0.0  ;;  %v6599_v10 = vmul.f32 0.01, %v6595_v43 }
 0x430   : > { %v14148_v58 = vsel %vm6597_vm15, %v6595_v43, %v6599_v10  ;;  %v8452_v43 = vld [vmem:[%s14583_s5 + $0xd0] sm:$0xff]  ;;  %v14293_v10 = vsel %vm6598_vm1, %v6596_v52, %v6600_v57  ;;  %v8493_v57 = vld [vmem:[%s14583_s5 + $0x1f8] sm:$0xff] }
 0x431   : > { %v6621_v47 = vrot.slane %v14148_v58, 1  ;;  %v6942_v29 = vrot.slane %v14148_v58, 4  ;;  %v7108_v0 = vrot.slane %v14148_v58, 6  ;;  %v6776_v59 = vrot.slane %v14148_v58, 2  ;;  %v8488_v52 = vld [vmem:[%s14583_s5 + $0x1d0] sm:$0xff] }
 0x432   : > { %v7440_v7 = vrot.slane %v14293_v10, 2  ;;  %v7025_v41 = vrot.slane %v14148_v58, 5  ;;  %v7606_v12 = vrot.slane %v14293_v10, 4 }
 0x433   : > { %9340 = vmatmul.mubr.msk.f32.vlgmr.msra.gmra.mrb[44].mxu1 %vm6622_vm0, %v6621_v47  ;;  %9416 = vmatmul.mubr.msk.f32.vlgmr.msra.gmra.mrb[38].mxu0 %vm6622_vm0, %v6942_v29  ;;  %v8455_v47 = vld [vmem:[%s14583_s5 + $0xe8] sm:$0xff]  ;;  %v8517_v29 = vld [vmem:[%s14583_s5 + $0x2a0] sm:$0xff] }
 0x434   : > { %10483 = vmatpush3.bf16.msra.mxu1 %v10482_v34  ;;  %10543 = vmatpush3.bf16.msra.mxu0 %v10542_v42  ;;  %v10509_v34 = vpack.c.bf16 %v8453_v1, %v8452_v43  ;;  %v10593_v42 = vpack.c.bf16 %v8516_v4, %v8515_v3  ;;  %v10512_v61 = vpack.c.bf16 %v8455_v47, %v8454_v46  ;;  %v8505_v43 = vld [vmem:[%s14583_s5 + $0x248] sm:$0xff]  ;;  %v7191_v1 = vrot.slane %v14148_v58, 7  ;;  %v8506_v3 = vld [vmem:[%s14583_s5 + $0x250] sm:$0xff]  ;;  %v8507_v4 = vld [vmem:[%s14583_s5 + $0x258] sm:$0xff] }
 0x435   : > { %10484 = vmatprep.subr.bf16.mxu1 %v10930_v63  ;;  %10544 = vmatprep.subr.bf16.mxu0 %v10930_v63  ;;  %v10596_v24 = vpack.c.bf16 %v8518_v18, %v8517_v29  ;;  %v8510_v47 = vld [vmem:[%s14583_s5 + $0x270] sm:$0xff]  ;;  %v8511_v29 = vld [vmem:[%s14583_s5 + $0x278] sm:$0xff] }
 0x436   : > { %9358 = vmatprep.mubr.msk.f32.mxu1 %vm10931_vm14, %v14109_v13  ;;  %9453 = vmatprep.mubr.msk.f32.mxu0 %vm10931_vm14, %v14109_v13  ;;  %v10587_v18 = vpack.c.bf16 %v8511_v29, %v8510_v47 }
 0x438   : > { %10486 = vmatpush3.bf16.msra.mxu1 %v10485_v21  ;;  %10546 = vmatpush3.bf16.msra.mxu0 %v10545_v20  ;;  %v8456_v21 = vld [vmem:[%s14583_s5 + $0xf0] sm:$0xff]  ;;  %v8457_v20 = vld [vmem:[%s14583_s5 + $0xf8] sm:$0xff] }
 0x439   : > { %10487 = vmatprep.subr.bf16.mxu1 %v10930_v63  ;;  %10547 = vmatprep.subr.bf16.mxu0 %v10930_v63  ;;  %v10515_v40 = vpack.c.bf16 %v8457_v20, %v8456_v21  ;;  %v7357_v20 = vrot.slane %v14293_v10, 1 }
 0x43c   : > { %10489 = vmatpush3.bf16.msra.mxu1 %v10488_v51  ;;  %10549 = vmatpush3.bf16.msra.mxu0 %v10548_v55  ;;  %v8468_v51 = vld [vmem:[%s14583_s5 + $0x140] sm:$0xff]  ;;  %v8469_v55 = vld [vmem:[%s14583_s5 + $0x148] sm:$0xff] }
 0x43d   : > { %10490 = vmatprep.subr.bf16.mxu1 %v10930_v63  ;;  %10550 = vmatprep.subr.bf16.mxu0 %v10930_v63  ;;  %v10530_v8 = vpack.c.bf16 %v8469_v55, %v8468_v51  ;;  %v8527_v51 = vld [vmem:[%s14583_s5 + $0x2e8] sm:$0xff] }
 0x440   : > { %10492 = vmatpush3.bf16.msra.mxu1 %v10491_v62  ;;  %10552 = vmatpush3.bf16.msra.mxu0 %v10551_v9  ;;  %v8470_v62 = vld [vmem:[%s14583_s5 + $0x150] sm:$0xff]  ;;  %v6859_v9 = vrot.slane %v14148_v58, 3 }
 0x441   : > { %10493 = vmatprep.subr.bf16.mxu1 %v10930_v63  ;;  %10565 = vmatprep.subr.bf16.mxu0 %v10930_v63 }
 0x443   : > { %9359 = vmatmul.mubr.msk.f32.vlgmr.msra.gmra.mrb[46].mxu1 %vm6622_vm0, %v14148_v58  ;;  %9454 = vmatmul.mubr.msk.f32.vlgmr.msra.gmra.mrb[40].mxu0 %vm6622_vm0, %v7108_v0  ;;  %v8473_v0 = vld [vmem:[%s14583_s5 + $0x168] sm:$0xff]  ;;  %v8508_v58 = vld [vmem:[%s14583_s5 + $0x260] sm:$0xff] }
 0x444   : > { %10495 = vmatpush3.bf16.msra.mxu1 %v10494_v31  ;;  %10567 = vmatpush3.bf16.msra.mxu0 %v10566_v44  ;;  %v10533_v31 = vpack.c.bf16 %v8471_v50, %v8470_v62  ;;  %v10617_v44 = vpack.c.bf16 %v8534_v45, %v8533_v38  ;;  %v10536_v53 = vpack.c.bf16 %v8473_v0, %v8472_v2  ;;  %v8541_v62 = vld [vmem:[%s14583_s5 + $0x348] sm:$0xff]  ;;  %v8542_v50 = vld [vmem:[%s14583_s5 + $0x350] sm:$0xff]  ;;  %v8543_v38 = vld [vmem:[%s14583_s5 + $0x358] sm:$0xff] }
 0x445   : > { %10496 = vmatprep.subr.bf16.mxu1 %v10930_v63  ;;  %10568 = vmatprep.subr.bf16.mxu0 %v10930_v63  ;;  %v10629_v45 = vpack.c.bf16 %v8543_v38, %v8542_v50  ;;  %v8546_v0 = vld [vmem:[%s14583_s5 + $0x370] sm:$0xff] }
 0x446   : > { %9377 = vmatprep.mubr.msk.f32.mxu1 %vm10931_vm14, %v14109_v13  ;;  %9491 = vmatprep.mubr.msk.f32.mxu0 %vm10931_vm14, %v14109_v13 }
 0x448   : > { %10498 = vmatpush3.bf16.msra.mxu1 %v10497_v30  ;;  %10570 = vmatpush3.bf16.msra.mxu0 %v10569_v14  ;;  %v10620_v30 = vpack.c.bf16 %v8536_v32, %v8535_v16  ;;  %v8474_v14 = vld [vmem:[%s14583_s5 + $0x170] sm:$0xff]  ;;  %v7689_v32 = vrot.slane %v14293_v10, 5 }
 0x449   : > { %10499 = vmatprep.subr.bf16.mxu1 %v10930_v63  ;;  %10571 = vmatprep.subr.bf16.mxu0 %v10930_v63  ;;  %v10539_v5 = vpack.c.bf16 %v8475_v22, %v8474_v14 }
 0x44c   : > { %10501 = vmatpush3.bf16.msra.mxu1 %v10500_v33  ;;  %10573 = vmatpush3.bf16.msra.mxu0 %v10572_v48  ;;  %v10623_v33 = vpack.c.bf16 %v8538_v6, %v8537_v23  ;;  %v8486_v48 = vld [vmem:[%s14583_s5 + $0x1c0] sm:$0xff] }
 0x44d   : > { %10502 = vmatprep.subr.bf16.mxu1 %v10930_v63  ;;  %10574 = vmatprep.subr.bf16.mxu0 %v10930_v63  ;;  %v10554_v35 = vpack.c.bf16 %v8487_v15, %v8486_v48 }
 0x450   : > { %10504 = vmatpush3.bf16.msra.mxu1 %v10503_v54  ;;  %10576 = vmatpush3.bf16.msra.mxu0 %v10575_v36  ;;  %v8489_v54 = vld [vmem:[%s14583_s5 + $0x1d8] sm:$0xff] }
 0x451   : > { %10505 = vmatprep.subr.bf16.mxu1 %v10930_v63  ;;  %10589 = vmatprep.subr.bf16.mxu0 %v10930_v63  ;;  %v10557_v36 = vpack.c.bf16 %v8489_v54, %v8488_v52 }
 0x453   : > { %9378 = vmatmul.mubr.msk.f32.vlgmr.msra.gmra.mrb[48].mxu1 %vm6622_vm0, %v6776_v59  ;;  %9492 = vmatmul.mubr.msk.f32.vlgmr.msra.gmra.mrb[42].mxu0 %vm6622_vm0, %v14293_v10 }
 0x454   : > { %10507 = vmatpush3.bf16.msra.mxu1 %v10506_v28  ;;  %10591 = vmatpush3.bf16.msra.mxu0 %v10590_v56  ;;  %v10563_v28 = vpack.c.bf16 %v8493_v57, %v8492_v25  ;;  %v8504_v56 = vld [vmem:[%s14583_s5 + $0x240] sm:$0xff] }
 0x455   : > { %10508 = vmatprep.subr.bf16.mxu1 %v10930_v63  ;;  %10592 = vmatprep.subr.bf16.mxu0 %v10930_v63  ;;  %v10578_v59 = vpack.c.bf16 %v8505_v43, %v8504_v56 }
 0x456   : > { %9396 = vmatprep.mubr.msk.f32.mxu1 %vm10931_vm14, %v14109_v13  ;;  %9529 = vmatprep.mubr.msk.f32.mxu0 %vm10931_vm14, %v14109_v13 }
 0x458   : > { %10510 = vmatpush3.bf16.msra.mxu1 %v10509_v34  ;;  %10594 = vmatpush3.bf16.msra.mxu0 %v10593_v42  ;;  %v10581_v34 = vpack.c.bf16 %v8507_v4, %v8506_v3  ;;  %v8509_v42 = vld [vmem:[%s14583_s5 + $0x268] sm:$0xff] }
 0x459   : > { %10511 = vmatprep.subr.bf16.mxu1 %v10930_v63  ;;  %10595 = vmatprep.subr.bf16.mxu0 %v10930_v63  ;;  %v10584_v46 = vpack.c.bf16 %v8509_v42, %v8508_v58 }
 0x45c   : > { %10513 = vmatpush3.bf16.msra.mxu1 %v10512_v61  ;;  %10597 = vmatpush3.bf16.msra.mxu0 %v10596_v24  ;;  %v8522_v61 = vld [vmem:[%s14583_s5 + $0x2c0] sm:$0xff]  ;;  %v8523_v24 = vld [vmem:[%s14583_s5 + $0x2c8] sm:$0xff] }
 0x45d   : > { %10514 = vmatprep.subr.bf16.mxu1 %v10930_v63  ;;  %10598 = vmatprep.subr.bf16.mxu0 %v10930_v63  ;;  %v10602_v21 = vpack.c.bf16 %v8523_v24, %v8522_v61 }
 0x460   : > { %10516 = vmatpush3.bf16.msra.mxu1 %v10515_v40  ;;  %10600 = vmatpush3.bf16.msra.mxu0 %v10599_v49  ;;  %v10605_v40 = vpack.c.bf16 %v8525_v11, %v8524_v39  ;;  %v8526_v49 = vld [vmem:[%s14583_s5 + $0x2e0] sm:$0xff] }
 0x461   : > { %10529 = vmatprep.subr.bf16.mxu1 %v10930_v63  ;;  %10613 = vmatprep.subr.bf16.mxu0 %v10930_v63  ;;  %v10608_v55 = vpack.c.bf16 %v8527_v51, %v8526_v49 }
 0x463   : > { %9397 = vmatmul.mubr.msk.f32.vlgmr.msra.gmra.mrb[50].mxu1 %vm6622_vm0, %v6859_v9  ;;  %9530 = vmatmul.mubr.msk.f32.vlgmr.msra.gmra.mrb[44].mxu0 %vm6622_vm0, %v7440_v7  ;;  %v7523_v7 = vrot.slane %v14293_v10, 3 }
 0x464   : > { %10531 = vmatpush3.bf16.msra.mxu1 %v10530_v8  ;;  %10615 = vmatpush3.bf16.msra.mxu0 %v10614_v37  ;;  %v10611_v8 = vpack.c.bf16 %v8529_v60, %v8528_v27  ;;  %v8540_v37 = vld [vmem:[%s14583_s5 + $0x340] sm:$0xff] }
 0x465   : > { %10532 = vmatprep.subr.bf16.mxu1 %v10930_v63  ;;  %10616 = vmatprep.subr.bf16.mxu0 %v10930_v63  ;;  %v10626_v9 = vpack.c.bf16 %v8541_v62, %v8540_v37 }
 0x466   : > { %9434 = vmatprep.mubr.msk.f32.mxu1 %vm10931_vm14, %v14109_v13  ;;  %9567 = vmatprep.mubr.msk.f32.mxu0 %vm10931_vm14, %v14109_v13 }
 0x468   : > { %10534 = vmatpush3.bf16.msra.mxu1 %v10533_v31  ;;  %10618 = vmatpush3.bf16.msra.mxu0 %v10617_v44  ;;  %v8544_v31 = vld [vmem:[%s14583_s5 + $0x360] sm:$0xff]  ;;  %v8545_v44 = vld [vmem:[%s14583_s5 + $0x368] sm:$0xff] }
 0x469   : > { %10535 = vmatprep.subr.bf16.mxu1 %v10930_v63  ;;  %10619 = vmatprep.subr.bf16.mxu0 %v10930_v63  ;;  %v10632_v2 = vpack.c.bf16 %v8545_v44, %v8544_v31 }
 0x46c   : > { %10537 = vmatpush3.bf16.msra.mxu1 %v10536_v53  ;;  %10621 = vmatpush3.bf16.msra.mxu0 %v10620_v30 }
 0x46d   : > { %10538 = vmatprep.subr.bf16.mxu1 %v10930_v63  ;;  %10622 = vmatprep.subr.bf16.mxu0 %v10930_v63 }
 0x470   : > { %10540 = vmatpush3.bf16.msra.mxu1 %v10539_v5  ;;  %10624 = vmatpush3.bf16.msra.mxu0 %v10623_v33 }
 0x471   : > { %10553 = vmatprep.subr.bf16.mxu1 %v10930_v63 }
 0x473   : > { %9435 = vmatmul.mubr.msk.f32.vlgmr.msra.gmra.mrb[52].mxu1 %vm6622_vm0, %v7025_v41  ;;  %9568 = vmatmul.mubr.msk.f32.vlgmr.msra.gmra.mrb[46].mxu0 %vm6622_vm0, %v7606_v12 }
 0x474   : > { %10555 = vmatpush3.bf16.msra.mxu1 %v10554_v35  ;;  %9472 = vmatprep.mubr.msk.f32.mxu1 %vm10931_vm14, %v14109_v13 }
 0x475   : > { %10556 = vmatprep.subr.bf16.mxu1 %v10930_v63 }
 0x478   : > { %10558 = vmatpush3.bf16.msra.mxu1 %v10557_v36 }
 0x479   : > { %10559 = vmatprep.subr.bf16.mxu1 %v10930_v63 }
 0x47c   : > { %10561 = vmatpush3.bf16.msra.mxu1 %v10560_v19 }
 0x47d   : > { %10562 = vmatprep.subr.bf16.mxu1 %v10930_v63 }
 0x480   : > { %10564 = vmatpush3.bf16.msra.mxu1 %v10563_v28 }
 0x481   : > { %10577 = vmatprep.subr.bf16.mxu1 %v10930_v63 }
 0x483   : > { %9473 = vmatmul.mubr.msk.f32.vlgmr.msra.gmra.mrb[54].mxu1 %vm6622_vm0, %v7191_v1 }
 0x484   : > { %10579 = vmatpush3.bf16.msra.mxu1 %v10578_v59  ;;  %9510 = vmatprep.mubr.msk.f32.mxu1 %vm10931_vm14, %v14109_v13 }
 0x485   : > { %10580 = vmatprep.subr.bf16.mxu1 %v10930_v63 }
 0x488   : > { %10582 = vmatpush3.bf16.msra.mxu1 %v10581_v34 }
 0x489   : > { %10583 = vmatprep.subr.bf16.mxu1 %v10930_v63 }
 0x48c   : > { %10585 = vmatpush3.bf16.msra.mxu1 %v10584_v46 }
 0x48d   : > { %10586 = vmatprep.subr.bf16.mxu1 %v10930_v63 }
 0x490   : > { %10588 = vmatpush3.bf16.msra.mxu1 %v10587_v18 }
 0x491   : > { %10601 = vmatprep.subr.bf16.mxu1 %v10930_v63 }
 0x493   : > { %9511 = vmatmul.mubr.msk.f32.vlgmr.msra.gmra.mrb[56].mxu1 %vm6622_vm0, %v7357_v20 }
 0x494   : > { %10603 = vmatpush3.bf16.msra.mxu1 %v10602_v21  ;;  %9548 = vmatprep.mubr.msk.f32.mxu1 %vm10931_vm14, %v14109_v13  ;;  %v7763_v21 = vld [vmem:[%s14584_s6] sm:$0x1] }
 0x495   : > { %10604 = vmatprep.subr.bf16.mxu1 %v10930_v63 }
 0x498   : > { %10606 = vmatpush3.bf16.msra.mxu1 %v10605_v40 }
 0x499   : > { %10607 = vmatprep.subr.bf16.mxu1 %v10930_v63 }
 0x49c   : > { %10609 = vmatpush3.bf16.msra.mxu1 %v10608_v55 }
 0x49d   : > { %10610 = vmatprep.subr.bf16.mxu1 %v10930_v63 }
 0x4a0   : > { %10612 = vmatpush3.bf16.msra.mxu1 %v10611_v8 }
 0x4a1   : > { %10625 = vmatprep.subr.bf16.mxu1 %v10930_v63 }
 0x4a3   : > { %9549 = vmatmul.mubr.msk.f32.vlgmr.msra.gmra.mrb[58].mxu1 %vm6622_vm0, %v7523_v7 }
 0x4a4   : > { %10627 = vmatpush3.bf16.msra.mxu1 %v10626_v9  ;;  %9586 = vmatprep.mubr.msk.f32.mxu1 %vm10931_vm14, %v14109_v13  ;;  %v8547_v13 = vld [vmem:[%s14583_s5 + $0x378] sm:$0xff] }
 0x4a5   : > { %10628 = vmatprep.subr.bf16.mxu1 %v10930_v63  ;;  %v10635_v16 = vpack.c.bf16 %v8547_v13, %v8546_v0 }
 0x4a8   : > { %10630 = vmatpush3.bf16.msra.mxu1 %v10629_v45 }
 0x4a9   : > { %10631 = vmatprep.subr.bf16.mxu1 %v10930_v63 }
 0x4ac   : > { %10633 = vmatpush3.bf16.msra.mxu1 %v10632_v2 }
 0x4ad   : > { %10634 = vmatprep.subr.bf16.mxu1 %v10930_v63 }
 0x4b0   : > { %10636 = vmatpush3.bf16.msra.mxu1 %v10635_v16 }
 0x4b3   : > { %9587 = vmatmul.mubr.msk.f32.vlgmr.msra.gmra.mrb[60].mxu1 %vm6622_vm0, %v7689_v32 }
 0x506   : > { %v6691_v53 = vpop.f32.mrb[44].mxu1  ;;  %v7011_v30 = vpop.f32.mrb[38].mxu0 }
 0x507   : > { %v9341_v14 = vpop.f32.mrb[45].mxu1  ;;  %v9417_v22 = vpop.f32.mrb[39].mxu0 }
 0x516   : > { %v6763_v23 = vpop.f32.mrb[46].mxu1  ;;  %v7177_v6 = vpop.f32.mrb[40].mxu0 }
 0x517   : > { %v6764_v5 = vadd.f32 %v6763_v23, %v6691_v53  ;;  %v9360_v33 = vpop.f32.mrb[47].mxu1  ;;  %v9455_v48 = vpop.f32.mrb[41].mxu0 }
 0x526   : > { %v6845_v15 = vpop.f32.mrb[48].mxu1  ;;  %v7343_v35 = vpop.f32.mrb[42].mxu0 }
 0x527   : > { %v6849_v41 = vadd.f32 %v6845_v15, %v6764_v5  ;;  %v9379_v12 = vpop.f32.mrb[49].mxu1  ;;  %v9493_v52 = vpop.f32.mrb[43].mxu0 }
 0x536   : > { %v6928_v63 = vpop.f32.mrb[50].mxu1  ;;  %v7509_v54 = vpop.f32.mrb[44].mxu0 }
 0x537   : > { %v6932_v36 = vadd.f32 %v6928_v63, %v6849_v41  ;;  %v9398_v10 = vpop.f32.mrb[51].mxu1  ;;  %v9531_v17 = vpop.f32.mrb[45].mxu0 }
 0x539   : > { %v7015_v26 = vadd.f32 %v7011_v30, %v6932_v36 }
 0x546   : > { %v7094_v19 = vpop.f32.mrb[52].mxu1  ;;  %v7675_v25 = vpop.f32.mrb[46].mxu0 }
 0x547   : > { %v7098_v57 = vadd.f32 %v7094_v19, %v7015_v26  ;;  %v9436_v28 = vpop.f32.mrb[53].mxu1  ;;  %v9569_v56 = vpop.f32.mrb[47].mxu0 }
 0x549   : > { %v7181_v43 = vadd.f32 %v7177_v6, %v7098_v57 }
 0x556   : > { %v7260_v59 = vpop.f32.mrb[54].mxu1 }
 0x557   : > { %v7264_v1 = vadd.f32 %v7260_v59, %v7181_v43  ;;  %v9474_v3 = vpop.f32.mrb[55].mxu1 }
 0x559   : > { %v7347_v4 = vadd.f32 %v7343_v35, %v7264_v1 }
 0x566   : > { %v7426_v34 = vpop.f32.mrb[56].mxu1 }
 0x567   : > { %v7430_v58 = vadd.f32 %v7426_v34, %v7347_v4  ;;  %v9512_v42 = vpop.f32.mrb[57].mxu1 }
 0x569   : > { %v7513_v46 = vadd.f32 %v7509_v54, %v7430_v58 }
 0x576   : > { %v7592_v47 = vpop.f32.mrb[58].mxu1 }
 0x577   : > { %v7596_v29 = vadd.f32 %v7592_v47, %v7513_v46  ;;  %v9550_v18 = vpop.f32.mrb[59].mxu1 }
 0x579   : > { %v7679_v61 = vadd.f32 %v7675_v25, %v7596_v29 }
 0x586   : > { %v7758_v24 = vpop.f32.mrb[60].mxu1 }
 0x587   : > { %v7762_v20 = vadd.f32 %v7758_v24, %v7679_v61  ;;  %v9588_v39 = vpop.f32.mrb[61].mxu1 }
 0x589   : > { %v7764_v11 = vadd.f32 %v7763_v21, %v7762_v20 }
 0x58b   : > { %7766 = vst.msk [vmem:[%s270_s17] sm:$0x1] %vm7765_vm2, %v7764_v11 }
 0x58c   : > { %10878 = shalt.err (!%p10875_p3)
}
 0x58d   : > { %s10879_s20 = scalar_lea.hbm %s14536_s13, 16  ;;  %s10883_s22 = scalar_lea.hbm %s14585_s7, 32 }
 0x58e   : > { %p10880_p4 = scmp.ne.s32.totalorder %s14536_s13, %s10879_s20  ;;  %p10884_p9 = scmp.lt.u32.totalorder %s14536_s13, %s14585_s7 }
 0x58f   : > { %p10885_p10 = scmp.lt.u32.totalorder %s10883_s22, %s10879_s20  ;;  %p10887_p12 = scmp.lt.u32.totalorder %s10879_s20, %s14536_s13 }
 0x590   : > { %p10881_p7 = pnand %p10880_p4, %p11011_p5 }
 0x591   : > { %p10886_p11 = por %p10885_p10, %p10884_p9 }
 0x592   : > { %p10882_p8 = pneg %p10881_p7 }
 0x593   : > { %p10888_p13 = por %p10887_p12, %p10886_p11 }
 0x595   : > { %p10889_p0 = pnand %p10888_p13, %p10882_p8 }
 0x597   : > { %10892 = shalt.err (!%p10889_p0)
}
 0x598   : > { %10818 = dma.vmem_to_hbm [thread:$0]  (%p11011_p5), %s14538_s29, 16, %s14536_s13, %s7768_s14  }
 0x599 PF: > { %p10824_p1 = scmp.ge.s32.totalorder %s10927_s27, 2  ;;  %s7792_s8 = sand.u32 1, %s10915_s24  }
 0x59a   : > { %s7793_s9 = scalar_lea.sflag [#allocation4], %s7792_s8 }
 0x59b   : > { %p10821_p2 = pnand %p10824_p1, %p11015_p6 }
 0x59d   : > { %10910 = dma.done.wait (!%p10821_p2), %s7793_s9, 16  }
 0x59e   : > { %10912 = vsyncadd (!%p10821_p2), %s7793_s9, 4294967280  ;;  %p17_p3 = scmp.ge.s32.totalorder %s10998_s30, 4   ;;  %s14702_s24 = smov %s10919_s25 }
 0x59f   : > { %s14703_s25 = smov %s10923_s26  ;;  %s14704_s26 = smov %s11009_s10 }
 0x5a0   : > { %s14705_s27 = smov %s10998_s30  ;;  %19 = sbr.rel (!%p17_p3) target bundleno = 3 (0x3), region = 109 }
 0x5a7   :  { %7797 = vsyncpa [#allocation4], 1 }
 0x5a8   :  { %7799 = vsyncpa [#allocation4 + $0x1], 1 }

</bundles_post_ra>
